<compile_context>
chip_gen: v7x
topology: tpu7x:2x2x1
jax: 0.10.0
libtpu: 0.0.40
codegen_flags: <defaults>
</compile_context>

<pallas_src>
import numpy as np
import jax
import jax.numpy as jnp
from jax.experimental import pallas as pl
from jax.experimental.pallas import tpu as pltpu

# ----- module hyper-parameters (small demo sizes) -----------------------------
N_FREQS = 4                          # per-encoder frequencies
ENC_DIM = 2 * N_FREQS                # tcnn Frequency: 2*F outputs per input dim
EMBEDDING_SIZE = 32                  # 512 in the real module; kept small here
HIDDEN = 32                          # mlp_config["n_neurons"]
OUTPUT_DIM = 4
MLP_INPUT_DIMS = 2 * ENC_DIM + EMBEDDING_SIZE   # t_enc + pred_enc + embedding

# Frequency scales 2^k * pi baked into a [2, 2F] selector so that
#   phase = t * selector[0] + pred * selector[1]
#         = [t*s0 .. t*s_{F-1}, pred*s0 .. pred*s_{F-1}]
# It is passed to the kernel as a tiny resident input (no captured constants).
_SCALES = (np.exp2(np.arange(N_FREQS, dtype=np.float32)) * np.pi).astype(np.float32)
_SELECTOR = np.zeros((2, 2 * N_FREQS), np.float32)
_SELECTOR[0, :N_FREQS] = _SCALES
_SELECTOR[1, N_FREQS:] = _SCALES


def _round_up(x, m):
    return ((x + m - 1) // m) * m


def conditional_net_kernel(coord_ref, emb_ref, sel_ref,
                           w1_sin_ref, w1_cos_ref, w1e_ref, w2_ref, w3_ref,
                           out_ref):
    coord = coord_ref[...]                               # [T, 2] f32

    # phase[:, :F] = t * scales ; phase[:, F:] = pred * scales (VPU only, no concat)
    phase = (coord[:, 0:1] * sel_ref[0:1, :] +
             coord[:, 1:2] * sel_ref[1:2, :])            # [T, 2F]

    # First layer, K-split: sin / cos / embedding each hit their own regrouped
    # w1 row-block — straight from existing vregs into the MXU, no concatenate.
    h = jnp.dot(jnp.sin(phase), w1_sin_ref[...], preferred_element_type=jnp.float32)
    h = h + jnp.dot(jnp.cos(phase), w1_cos_ref[...], preferred_element_type=jnp.float32)
    # Embedding stays in its storage dtype (bf16 or f32) — native MXU path.
    h = h + jnp.dot(emb_ref[...], w1e_ref[...], preferred_element_type=jnp.float32)
    h = jnp.maximum(h, 0.0)

    h = jnp.maximum(jnp.dot(h, w2_ref[...], preferred_element_type=jnp.float32), 0.0)
    out_ref[...] = jnp.dot(h, w3_ref[...],
                           preferred_element_type=jnp.float32).astype(out_ref.dtype)
    # TODO(synk): lane-dense output trick (view the (N, 4) f32 output as
    # (N/32, 128)) would replace the masked (TILE_N, 4) stores; skipped here to
    # keep lowering simple since the output is a small fraction of HBM traffic.


def conditional_net_forward(coord, embedding, w1, w2, w3, *,
                            tile_n=2048, vmem_limit_bytes=None):
    """ConditionalNet forward (share_encoder=False).

    coord:     [N, 2] float.
    embedding: [N, E] float32 or bfloat16.  Produce it in bf16 upstream to halve
               the dominant HBM stream — this wrapper does NOT add a cast pass.
    w1:        [2*ENC_DIM + E, H], rows ordered [sin_t | cos_t | sin_p | cos_p | emb].
    w2:        [H, H]; w3: [H, out_dim].  Bias-free ReLU MLP (tcnn-style).

    tile_n: batch tile; sweep per generation (see header).  vmem_limit_bytes is
    forwarded to Mosaic for the large-tile configurations.
    """
    n = coord.shape[0]
    out_dim = w3.shape[1]
    f = N_FREQS

    coord = coord.astype(jnp.float32)

    # Regroup w1 rows once, outside the kernel:
    #   sin rows -> [sin_t | sin_p], cos rows -> [cos_t | cos_p], emb rows last.
    w1 = w1.astype(jnp.float32)
    w1_sin = jnp.concatenate([w1[0 * f:1 * f], w1[2 * f:3 * f]], axis=0)   # [2F, H]
    w1_cos = jnp.concatenate([w1[1 * f:2 * f], w1[3 * f:4 * f]], axis=0)   # [2F, H]
    w1_emb = w1[4 * f:].astype(embedding.dtype)   # bf16 weights if emb streamed bf16
    w2 = w2.astype(jnp.float32)
    w3 = w3.astype(jnp.float32)
    sel = jnp.asarray(_SELECTOR)                  # [2, 2F] selector (scales baked in)

    # Tile sizing: always a multiple of 8 (sublane), no wrapper-side padding —
    # Pallas handles the partial last block (rows independent, OOB rows dropped).
    tile_n = max(8, _round_up(int(tile_n), 8))
    # Keep >= 2 grid steps when possible so v7x's 2 TensorCores both get work.
    tile_n = min(tile_n, max(8, _round_up(-(-n // 2), 8)))
    grid_n = -(-n // tile_n)                      # cdiv

    def row_spec(cols):
        return pl.BlockSpec((tile_n, cols), lambda i: (i, 0))

    def full_spec(a):                             # resident weight block
        return pl.BlockSpec(a.shape, lambda i: (0,) * a.ndim)

    out = pl.pallas_call(
        conditional_net_kernel,
        out_shape=jax.ShapeDtypeStruct((n, out_dim), jnp.float32),
        grid=(grid_n,),
        in_specs=[
            row_spec(coord.shape[1]),             # coord     [TILE_N, 2]
            row_spec(embedding.shape[1]),         # embedding [TILE_N, E]
            full_spec(sel),
            full_spec(w1_sin), full_spec(w1_cos), full_spec(w1_emb),
            full_spec(w2), full_spec(w3),
        ],
        out_specs=row_spec(out_dim),
        compiler_params=pltpu.CompilerParams(
            dimension_semantics=("parallel",),
            vmem_limit_bytes=vmem_limit_bytes),
    )(coord, embedding, sel, w1_sin, w1_cos, w1_emb, w2, w3)
    return out


def init_params(key):
    k1, k2, k3 = jax.random.split(key, 3)
    # Deterministic "Kaiming-ish" init; tcnn networks are bias-free.
    w1 = jax.random.normal(k1, (MLP_INPUT_DIMS, HIDDEN), jnp.float32) * (
        2.0 / MLP_INPUT_DIMS) ** 0.5
    w2 = jax.random.normal(k2, (HIDDEN, HIDDEN), jnp.float32) * (2.0 / HIDDEN) ** 0.5
    w3 = jax.random.normal(k3, (HIDDEN, OUTPUT_DIM), jnp.float32) * (2.0 / HIDDEN) ** 0.5
    return w1, w2, w3


def reference_forward(coord, embedding, w1, w2, w3):
    # Pure-JAX reference of the same semantics (for sanity checking).
    t, p = coord[:, :1], coord[:, 1:]
    scales = jnp.asarray(_SCALES).reshape(1, -1)
    enc = lambda c: jnp.concatenate([jnp.sin(c * scales), jnp.cos(c * scales)], axis=1)
    x = jnp.concatenate([enc(t), enc(p), embedding.astype(jnp.float32)], axis=1)
    h = jnp.maximum(x @ w1, 0.0)
    h = jnp.maximum(h @ w2, 0.0)
    return h @ w3


if __name__ == "__main__":
    key = jax.random.PRNGKey(0)
    k_coord, k_emb, k_params = jax.random.split(key, 3)

    batch = 300          # deliberately NOT tile-aligned (exercises partial blocks)
    coord = jax.random.uniform(k_coord, (batch, 2), jnp.float32)              # [N, 2]
    embedding = jax.random.normal(k_emb, (batch, EMBEDDING_SIZE), jnp.float32)

    w1, w2, w3 = init_params(k_params)

    # f32 path — matches the original module semantics exactly.
    out = jax.block_until_ready(
        conditional_net_forward(coord, embedding, w1, w2, w3, tile_n=2048))
    ref = reference_forward(coord, embedding, w1, w2, w3)
    assert out.shape == (batch, OUTPUT_DIM)
    assert jnp.allclose(out, ref, atol=1e-4, rtol=1e-4)

    # bf16-embedding path: the embedding is *produced* in bf16 (this cast stands
    # in for the upstream producer), the kernel feeds it to the MXU directly.
    embedding_bf16 = embedding.astype(jnp.bfloat16)
    out_bf16 = jax.block_until_ready(
        conditional_net_forward(coord, embedding_bf16, w1, w2, w3, tile_n=2048))
    w1_ref = w1.at[4 * N_FREQS:].set(
        w1[4 * N_FREQS:].astype(jnp.bfloat16).astype(jnp.float32))
    ref_bf16 = reference_forward(coord, embedding_bf16.astype(jnp.float32),
                                 w1_ref, w2, w3)
    assert jnp.allclose(out_bf16, ref_bf16, atol=2e-3, rtol=2e-3)

    print("KERNEL_OK")
</pallas_src>

<mosaic_0001>
module attributes {stable_mosaic.version = 11 : i64} {
  func.func @conditional_net_kernel(%arg0: i32, %arg1: memref<152x2xf32, #tpu.memory_space<vmem>>, %arg2: memref<152x32xf32, #tpu.memory_space<vmem>>, %arg3: memref<2x8xf32, #tpu.memory_space<vmem>>, %arg4: memref<8x32xf32, #tpu.memory_space<vmem>>, %arg5: memref<8x32xf32, #tpu.memory_space<vmem>>, %arg6: memref<32x32xf32, #tpu.memory_space<vmem>>, %arg7: memref<32x32xf32, #tpu.memory_space<vmem>>, %arg8: memref<32x4xf32, #tpu.memory_space<vmem>>, %arg9: memref<152x4xf32, #tpu.memory_space<vmem>>) attributes {dimension_semantics = [#tpu.dimension_semantics<parallel>], iteration_bounds = array<i64: 2>, scalar_prefetch = 0 : i64, scratch_operands = 0 : i64, tpu.core_type = #tpu.core_type<tc>, window_params = [{transform_indices = @transform_0, window_bounds = array<i64: 152, 2>}, {transform_indices = @transform_1, window_bounds = array<i64: 152, 32>}, {pipeline_mode = #tpu.pipeline_mode<synchronous>, transform_indices = @transform_2, window_bounds = array<i64: 2, 8>}, {pipeline_mode = #tpu.pipeline_mode<synchronous>, transform_indices = @transform_3, window_bounds = array<i64: 8, 32>}, {pipeline_mode = #tpu.pipeline_mode<synchronous>, transform_indices = @transform_4, window_bounds = array<i64: 8, 32>}, {pipeline_mode = #tpu.pipeline_mode<synchronous>, transform_indices = @transform_5, window_bounds = array<i64: 32, 32>}, {pipeline_mode = #tpu.pipeline_mode<synchronous>, transform_indices = @transform_6, window_bounds = array<i64: 32, 32>}, {pipeline_mode = #tpu.pipeline_mode<synchronous>, transform_indices = @transform_7, window_bounds = array<i64: 32, 4>}, {transform_indices = @transform_8, window_bounds = array<i64: 152, 4>}]} {
    %c0 = arith.constant 0 : index
    %c0_0 = arith.constant 0 : index
    %0 = vector.load %arg1[%c0, %c0_0] : memref<152x2xf32, #tpu.memory_space<vmem>>, vector<152x2xf32>
    %1 = vector.extract_strided_slice %0 {offsets = [0, 0], sizes = [152, 1], strides = [1, 1]} : vector<152x2xf32> to vector<152x1xf32>
    %c0_1 = arith.constant 0 : index
    %c0_2 = arith.constant 0 : index
    %2 = vector.load %arg3[%c0_1, %c0_2] : memref<2x8xf32, #tpu.memory_space<vmem>>, vector<1x8xf32>
    %3 = vector.broadcast %1 : vector<152x1xf32> to vector<152x8xf32>
    %4 = vector.broadcast %2 : vector<1x8xf32> to vector<152x8xf32>
    %5 = arith.mulf %3, %4 : vector<152x8xf32>
    %6 = vector.extract_strided_slice %0 {offsets = [0, 1], sizes = [152, 1], strides = [1, 1]} : vector<152x2xf32> to vector<152x1xf32>
    %c1 = arith.constant 1 : index
    %c0_3 = arith.constant 0 : index
    %7 = vector.load %arg3[%c1, %c0_3] : memref<2x8xf32, #tpu.memory_space<vmem>>, vector<1x8xf32>
    %8 = vector.broadcast %6 : vector<152x1xf32> to vector<152x8xf32>
    %9 = vector.broadcast %7 : vector<1x8xf32> to vector<152x8xf32>
    %10 = arith.mulf %8, %9 : vector<152x8xf32>
    %11 = arith.addf %5, %10 : vector<152x8xf32>
    %12 = math.sin %11 : vector<152x8xf32>
    %c0_4 = arith.constant 0 : index
    %c0_5 = arith.constant 0 : index
    %13 = vector.load %arg4[%c0_4, %c0_5] : memref<8x32xf32, #tpu.memory_space<vmem>>, vector<8x32xf32>
    %cst = arith.constant dense<0.000000e+00> : vector<152x32xf32>
    %14 = tpu.matmul %12, %13, %cst {dimension_numbers = #tpu.dot_dimension_numbers<[1], [0], [0], [1], [0, 0, 1, 1], [], []>} : vector<152x8xf32>, vector<8x32xf32>, vector<152x32xf32> -> vector<152x32xf32>
    %15 = math.cos %11 : vector<152x8xf32>
    %c0_6 = arith.constant 0 : index
    %c0_7 = arith.constant 0 : index
    %16 = vector.load %arg5[%c0_6, %c0_7] : memref<8x32xf32, #tpu.memory_space<vmem>>, vector<8x32xf32>
    %cst_8 = arith.constant dense<0.000000e+00> : vector<152x32xf32>
    %17 = tpu.matmul %15, %16, %cst_8 {dimension_numbers = #tpu.dot_dimension_numbers<[1], [0], [0], [1], [0, 0, 1, 1], [], []>} : vector<152x8xf32>, vector<8x32xf32>, vector<152x32xf32> -> vector<152x32xf32>
    %18 = arith.addf %14, %17 : vector<152x32xf32>
    %c0_9 = arith.constant 0 : index
    %c0_10 = arith.constant 0 : index
    %19 = vector.load %arg2[%c0_9, %c0_10] : memref<152x32xf32, #tpu.memory_space<vmem>>, vector<152x32xf32>
    %c0_11 = arith.constant 0 : index
    %c0_12 = arith.constant 0 : index
    %20 = vector.load %arg6[%c0_11, %c0_12] : memref<32x32xf32, #tpu.memory_space<vmem>>, vector<32x32xf32>
    %cst_13 = arith.constant dense<0.000000e+00> : vector<152x32xf32>
    %21 = tpu.matmul %19, %20, %cst_13 {dimension_numbers = #tpu.dot_dimension_numbers<[1], [0], [0], [1], [0, 0, 1, 1], [], []>} : vector<152x32xf32>, vector<32x32xf32>, vector<152x32xf32> -> vector<152x32xf32>
    %22 = arith.addf %18, %21 : vector<152x32xf32>
    %cst_14 = arith.constant 0.000000e+00 : f32
    %23 = vector.broadcast %cst_14 : f32 to vector<152x32xf32>
    %24 = arith.maximumf %22, %23 : vector<152x32xf32>
    %c0_15 = arith.constant 0 : index
    %c0_16 = arith.constant 0 : index
    %25 = vector.load %arg7[%c0_15, %c0_16] : memref<32x32xf32, #tpu.memory_space<vmem>>, vector<32x32xf32>
    %cst_17 = arith.constant dense<0.000000e+00> : vector<152x32xf32>
    %26 = tpu.matmul %24, %25, %cst_17 {dimension_numbers = #tpu.dot_dimension_numbers<[1], [0], [0], [1], [0, 0, 1, 1], [], []>} : vector<152x32xf32>, vector<32x32xf32>, vector<152x32xf32> -> vector<152x32xf32>
    %cst_18 = arith.constant 0.000000e+00 : f32
    %27 = vector.broadcast %cst_18 : f32 to vector<152x32xf32>
    %28 = arith.maximumf %26, %27 : vector<152x32xf32>
    %c0_19 = arith.constant 0 : index
    %c0_20 = arith.constant 0 : index
    %29 = vector.load %arg8[%c0_19, %c0_20] : memref<32x4xf32, #tpu.memory_space<vmem>>, vector<32x4xf32>
    %cst_21 = arith.constant dense<0.000000e+00> : vector<152x4xf32>
    %30 = tpu.matmul %28, %29, %cst_21 {dimension_numbers = #tpu.dot_dimension_numbers<[1], [0], [0], [1], [0, 0, 1, 1], [], []>} : vector<152x32xf32>, vector<32x4xf32>, vector<152x4xf32> -> vector<152x4xf32>
    %c0_22 = arith.constant 0 : index
    %c0_23 = arith.constant 0 : index
    %31 = vector.load %arg9[%c0_22, %c0_23] : memref<152x4xf32, #tpu.memory_space<vmem>>, vector<152x4xf32>
    tpu.vector_store %arg9[%c0_22, %c0_23], %30 {strides = array<i32>} : memref<152x4xf32, #tpu.memory_space<vmem>>, vector<152x4xf32>,
    return
  }
  func.func @transform_0(%arg0: i32) -> (i32, i32) {
    %c0_i32 = arith.constant 0 : i32
    %c0_i32_0 = arith.constant 0 : i32
    return %arg0, %c0_i32 : i32, i32
  }
  func.func @transform_1(%arg0: i32) -> (i32, i32) {
    %c0_i32 = arith.constant 0 : i32
    %c0_i32_0 = arith.constant 0 : i32
    return %arg0, %c0_i32 : i32, i32
  }
  func.func @transform_2(%arg0: i32) -> (i32, i32) {
    %c0_i32 = arith.constant 0 : i32
    %c0_i32_0 = arith.constant 0 : i32
    %c0_i32_1 = arith.constant 0 : i32
    return %c0_i32, %c0_i32_0 : i32, i32
  }
  func.func @transform_3(%arg0: i32) -> (i32, i32) {
    %c0_i32 = arith.constant 0 : i32
    %c0_i32_0 = arith.constant 0 : i32
    %c0_i32_1 = arith.constant 0 : i32
    return %c0_i32, %c0_i32_0 : i32, i32
  }
  func.func @transform_4(%arg0: i32) -> (i32, i32) {
    %c0_i32 = arith.constant 0 : i32
    %c0_i32_0 = arith.constant 0 : i32
    %c0_i32_1 = arith.constant 0 : i32
    return %c0_i32, %c0_i32_0 : i32, i32
  }
  func.func @transform_5(%arg0: i32) -> (i32, i32) {
    %c0_i32 = arith.constant 0 : i32
    %c0_i32_0 = arith.constant 0 : i32
    %c0_i32_1 = arith.constant 0 : i32
    return %c0_i32, %c0_i32_0 : i32, i32
  }
  func.func @transform_6(%arg0: i32) -> (i32, i32) {
    %c0_i32 = arith.constant 0 : i32
    %c0_i32_0 = arith.constant 0 : i32
    %c0_i32_1 = arith.constant 0 : i32
    return %c0_i32, %c0_i32_0 : i32, i32
  }
  func.func @transform_7(%arg0: i32) -> (i32, i32) {
    %c0_i32 = arith.constant 0 : i32
    %c0_i32_0 = arith.constant 0 : i32
    %c0_i32_1 = arith.constant 0 : i32
    return %c0_i32, %c0_i32_0 : i32, i32
  }
  func.func @transform_8(%arg0: i32) -> (i32, i32) {
    %c0_i32 = arith.constant 0 : i32
    %c0_i32_0 = arith.constant 0 : i32
    return %arg0, %c0_i32 : i32, i32
  }
}

</mosaic_0001>

<bundles_post_ra>
// kernel: tpu_custom_call.1
= control target key start
LH: loop header
LB: loop body
LE: loop exit
PB: predicated region body
PF: predicated region fallthrough
CT: control target
= control target key end

     0   :  { %s6798_s27 = smov 0   ;;  %s9465_s0 = inlined_call_operand.vmem [shape: f32[300,2], index: 0, kind: input, shape index: {}]   ;;  %s9466_s1 = inlined_call_operand.vmem [shape: f32[300,32], index: 1, kind: input, shape index: {}]   ;;  %s9467_s2 = inlined_call_operand.vmem [shape: f32[2,8], index: 2, kind: input, shape index: {}]   ;;  %s9468_s3 = inlined_call_operand.vmem [shape: f32[8,32], index: 3, kind: input, shape index: {}]   ;;  %s9469_s4 = inlined_call_operand.vmem [shape: f32[8,32], index: 4, kind: input, shape index: {}]   ;;  %s9470_s5 = inlined_call_operand.vmem [shape: f32[32,32], index: 5, kind: input, shape index: {}]   ;;  %s9471_s6 = inlined_call_operand.vmem [shape: f32[32,32], index: 6, kind: input, shape index: {}]   ;;  %s9472_s7 = inlined_call_operand.vmem [shape: f32[32,4], index: 7, kind: input, shape index: {}]   ;;  %s9473_s8 = inlined_call_operand.vmem [shape: f32[300,4], index: 8, kind: output, shape index: {}]  }
   0x1 LB: > { %s5786_s28 = sadd.s32 4294967295, %s6740_s27   ;;  %p5790_p0 = scmp.ge.s32.totalorder %s6740_s27, 1  ;;  %s6740_s27 = sphi %s6798_s27, %s18_s27  }
   0x2   : > { %p274_p1 = scmp.lt.s32.totalorder %s6740_s27, 3 }
   0x4   : > { %p275_p2 = pnand %p5790_p0, %p274_p1 }
   0x6   : > { %278 = sbr.rel (%p275_p2) target bundleno = 1432 (0x598), region = 52 }
   0xd   : > { %s313_s29 = smul.u32 19, %s5786_s28  ;;  %v6742_v0 = vmov 0   ;;  %v6743_v3 = vmov 1   ;;  %v6836_v23 = vld [vmem:[%s9467_s2] ss:$0 sm:$0xff] }
   0xe   : > { %6651 = vset.pattern.permute.xlu1 %v6742_v0  ;;  %6649 = vset.pattern.permute.xlu0 %v6742_v0  ;;  %v6841_v24 = vld [vmem:[%s9467_s2 + $0x1] ss:$0 sm:$0xff] }
   0xf   : > { %p314_p3 = scmp.lt.s32.totalorder %s313_s29, 37 }
  0x11   : > { %s9821_s29 = smov (!%p314_p3, %s313_s29), 37 }
  0x12   : > { %s6806_s30 = sshll.u32 %s9821_s29, 3 }
  0x13   : > { %s6812_s11 = scalar_lea.vmem %s9465_s0, %s6806_s30  ;;  %s9171_s18 = scalar_lea.vmem %s9466_s1, %s6806_s30 }
  0x14   : > { %v332_v1 = vld [vmem:[%s6812_s11 + $0x8] sm:$0xff]  ;;  %v331_v2 = vld [vmem:[%s6812_s11] sm:$0xff]  ;;  %v333_v4 = vld [vmem:[%s6812_s11 + $0x10] sm:$0xff]  ;;  %s9422_s17 = scalar_lea.vmem %s9473_s8, %s6806_s30 }
  0x15   : > { %358 = vperm.xlu1 %6651, %v332_v1   ;;  %353 = vperm.xlu0 %6649, %v331_v2   ;;  %v334_v5 = vld [vmem:[%s6812_s11 + $0x18] sm:$0xff]  ;;  %v335_v6 = vld [vmem:[%s6812_s11 + $0x20] sm:$0xff]  ;;  %v336_v7 = vld [vmem:[%s6812_s11 + $0x28] sm:$0xff] }
  0x16   : > { %v337_v8 = vld [vmem:[%s6812_s11 + $0x30] sm:$0xff]  ;;  %v338_v9 = vld [vmem:[%s6812_s11 + $0x38] sm:$0xff]  ;;  %v339_v10 = vld [vmem:[%s6812_s11 + $0x40] sm:$0xff] }
  0x17   : > { %v340_v11 = vld [vmem:[%s6812_s11 + $0x48] sm:$0xff]  ;;  %v341_v12 = vld [vmem:[%s6812_s11 + $0x50] sm:$0xff]  ;;  %v342_v13 = vld [vmem:[%s6812_s11 + $0x58] sm:$0xff] }
  0x18   : > { %v343_v14 = vld [vmem:[%s6812_s11 + $0x60] sm:$0xff]  ;;  %v344_v15 = vld [vmem:[%s6812_s11 + $0x68] sm:$0xff]  ;;  %v345_v16 = vld [vmem:[%s6812_s11 + $0x70] sm:$0xff] }
  0x19   : > { %6652 = vset.pattern.permute.xlu1 %v6743_v3  ;;  %6650 = vset.pattern.permute.xlu0 %v6743_v3  ;;  %v346_v17 = vld [vmem:[%s6812_s11 + $0x78] sm:$0xff]  ;;  %v347_v18 = vld [vmem:[%s6812_s11 + $0x80] sm:$0xff]  ;;  %v348_v19 = vld [vmem:[%s6812_s11 + $0x88] sm:$0xff] }
  0x1a   : > { %475 = vperm.xlu1 %6652, %v332_v1   ;;  %471 = vperm.xlu0 %6650, %v331_v2   ;;  %v349_v20 = vld [vmem:[%s6812_s11 + $0x90] sm:$0xff] }
  0x1e   : > { %6653 = vset.pattern.permute.xlu1 %v6742_v0  ;;  %479 = vperm.xlu0 %6650, %v333_v4  }
  0x1f   : > { %363 = vperm.xlu1 %6653, %v333_v4  }
  0x22   : > { %483 = vperm.xlu0 %6650, %v334_v5  }
  0x23   : > { %368 = vperm.xlu1 %6653, %v334_v5  }
  0x26   : > { %487 = vperm.xlu0 %6650, %v335_v6  }
  0x27   : > { %373 = vperm.xlu1 %6653, %v335_v6   ;;  %v9492_v6 = vmov 683565275  }
  0x2a   : > { %491 = vperm.xlu0 %6650, %v336_v7  }
  0x2b   : > { %378 = vperm.xlu1 %6653, %v336_v7  }
  0x2e   : > { %495 = vperm.xlu0 %6650, %v337_v8  }
  0x2f   : > { %383 = vperm.xlu1 %6653, %v337_v8   ;;  %v9486_v8 = vmov 2475754826  }
  0x32   : > { %499 = vperm.xlu0 %6650, %v338_v9  }
  0x33   : > { %388 = vperm.xlu1 %6653, %v338_v9  }
  0x36   : > { %503 = vperm.xlu0 %6650, %v339_v10  }
  0x37   : > { %393 = vperm.xlu1 %6653, %v339_v10  }
  0x3a   : > { %507 = vperm.xlu0 %6650, %v340_v11  }
  0x3b   : > { %398 = vperm.xlu1 %6653, %v340_v11   ;;  %v9484_v11 = vmov 2131351028  }
  0x3e   : > { %511 = vperm.xlu0 %6650, %v341_v12  }
  0x3f   : > { %403 = vperm.xlu1 %6653, %v341_v12  }
  0x42   : > { %515 = vperm.xlu0 %6650, %v342_v13  }
  0x43   : > { %408 = vperm.xlu1 %6653, %v342_v13   ;;  %v9482_v13 = vmov 2102212464  }
  0x46   : > { %519 = vperm.xlu0 %6650, %v343_v14  }
  0x47   : > { %413 = vperm.xlu1 %6653, %v343_v14  }
  0x4a   : > { %523 = vperm.xlu0 %6650, %v344_v15  }
  0x4b   : > { %418 = vperm.xlu1 %6653, %v344_v15   ;;  %v9490_v15 = vmov 920167782  }
  0x4e   : > { %527 = vperm.xlu0 %6650, %v345_v16  }
  0x4f   : > { %423 = vperm.xlu1 %6653, %v345_v16  }
  0x52   : > { %531 = vperm.xlu0 %6650, %v346_v17  }
  0x53   : > { %428 = vperm.xlu1 %6653, %v346_v17  }
  0x56   : > { %535 = vperm.xlu0 %6650, %v347_v18  }
  0x57   : > { %433 = vperm.xlu1 %6653, %v347_v18  }
  0x5a   : > { %539 = vperm.xlu0 %6650, %v348_v19  }
  0x5b   : > { %438 = vperm.xlu1 %6653, %v348_v19  }
  0x5e   : > { %543 = vperm.xlu0 %6650, %v349_v20  }
  0x5f   : > { %443 = vperm.xlu1 %6653, %v349_v20  }
  0x94   : > { %v354_v21 = vpop.permute.xlu0 %353  ;;  %v359_v22 = vpop.permute.xlu1 %358 }
  0x95   : > { %v450_v27 = vmul.f32 %v6836_v23, %v354_v21  ;;  %v451_v28 = vmul.f32 %v6836_v23, %v359_v22  ;;  %v9488_v22 = vmov 1326507024  }
  0x99   : > { %v476_v25 = vpop.permute.xlu1 %475  ;;  %v472_v26 = vpop.permute.xlu0 %471 }
  0x9a   : > { %v551_v29 = vmul.f32 %v6841_v24, %v476_v25  ;;  %v550_v30 = vmul.f32 %v6841_v24, %v472_v26 }
  0x9c   : > { %v6847_v31 = vadd.f32 %v551_v29, %v451_v28  ;;  %v6849_v32 = vadd.f32 %v550_v30, %v450_v27 }
  0x9d   : > { %v480_v33 = vpop.permute.xlu0 %479 }
  0x9e   : > { %v9480_v34 = vand.u32 2147483647, %v6847_v31  ;;  %v695_v35 = vand.u32 2139095040, %v6847_v31  ;;  %v9481_v36 = vand.u32 2147483647, %v6849_v32  ;;  %v364_v37 = vpop.permute.xlu1 %363  ;;  %v591_v38 = vand.u32 2139095040, %v6849_v32 }
  0x9f   : > { %v552_v39 = vmul.f32 %v6841_v24, %v480_v33  ;;  %v452_v40 = vmul.f32 %v6836_v23, %v364_v37 }
  0xa0   : > { %v696_v41 = vshrl.u32 %v695_v35, 23  ;;  %v699_v42 = vand.u32 8388607, %v9480_v34  ;;  %v595_v43 = vand.u32 8388607, %v9481_v36  ;;  %v592_v44 = vshrl.u32 %v591_v38, 23 }
  0xa1   : > { %v6861_v45 = vadd.f32 %v552_v39, %v452_v40  ;;  %v484_v50 = vpop.permute.xlu0 %483 }
  0xa2   : > { %v5800_v46 = vadd.s32 4294967169, %v696_v41  ;;  %v700_v47 = vor.u32 8388608, %v699_v42  ;;  %v5796_v48 = vadd.s32 4294967169, %v592_v44  ;;  %v596_v52 = vor.u32 8388608, %v595_v43  ;;  %v369_v57 = vpop.permute.xlu1 %368 }
  0xa3   : > { %v799_v49 = vand.u32 2139095040, %v6861_v45  ;;  %v9478_v54 = vand.u32 2147483647, %v6861_v45  ;;  %v6866_v56 = vmul.f32 %v6841_v24, %v484_v50  ;;  %v6879_v4 = vmul.f32 %v6836_v23, %v369_v57 }
  0xa4   : > { %v702_v51 = vadd.s32 1, %v5800_v46  ;;  %v598_v53 = vadd.s32 1, %v5796_v48  ;;  %v6868_v59 = vshll.u32 %v700_v47, 8  ;;  %v6870_v0 = vshll.u32 %v596_v52, 8 }
  0xa5   : > { %v800_v55 = vshrl.u32 %v799_v49, 23  ;;  %v6876_v3 = vand.u32 8388607, %v9478_v54 }
  0xa6   : > { %vm703_vm0 = vcmp.gt.s32.totalorder %v702_v51, 0  ;;  %vm599_vm1 = vcmp.gt.s32.totalorder %v598_v53, 0 }
  0xa7   : > { %v704_v58 = vsel %vm703_vm0, %v702_v51, 0  ;;  %v5804_v60 = vadd.s32 4294967169, %v800_v55  ;;  %v600_v63 = vsel %vm599_vm1, %v598_v53, 0 }
  0xa8   : > { %v705_v61 = vshrl.u32 %v704_v58, 5  ;;  %v706_v62 = vand.u32 31, %v704_v58  ;;  %v6872_v1 = vshrl.u32 %v600_v63, 5  ;;  %v602_v2 = vand.u32 31, %v600_v63 }
  0xa9   : > { %v6883_v10 = vadd.s32 1, %v5804_v60 }
  0xaa   : > { %v707_v5 = vsub.s32 32, %v706_v62  ;;  %v709_v7 = vshll.u32 %v9492_v6, %v706_v62  ;;  %v712_v9 = vshll.u32 %v9486_v8, %v706_v62  ;;  %v715_v12 = vshll.u32 %v9484_v11, %v706_v62 }
  0xab   : > { %v718_v14 = vshll.u32 %v9482_v13, %v706_v62  ;;  %v721_v16 = vshll.u32 %v9490_v15, %v706_v62  ;;  %vm724_vm2 = vcmp.lt.s32.totalorder %v705_v61, 1  ;;  %vm725_vm3 = vcmp.lt.s32.totalorder %v705_v61, 2 }
  0xac   : > { %v710_v17 = vshrl.u32 %v9486_v8, %v707_v5  ;;  %v713_v18 = vshrl.u32 %v9484_v11, %v707_v5  ;;  %v716_v19 = vshrl.u32 %v9482_v13, %v707_v5  ;;  %v708_v20 = vshrl.u32 %v9492_v6, %v707_v5 }
  0xad   : > { %v719_v21 = vshrl.u32 %v9490_v15, %v707_v5  ;;  %v722_v25 = vshrl.u32 %v9488_v22, %v707_v5  ;;  %vm726_vm4 = vcmp.lt.s32.totalorder %v705_v61, 3  ;;  %v603_v29 = vsub.s32 32, %v602_v2 }
  0xae   : > { %v711_v26 = vor.u32 %v710_v17, %v709_v7  ;;  %v714_v27 = vor.u32 %v713_v18, %v712_v9  ;;  %v717_v28 = vor.u32 %v716_v19, %v715_v12  ;;  %vm727_vm5 = vcmp.lt.s32.totalorder %v705_v61, 4 }
  0xaf   : > { %v720_v30 = vor.u32 %v719_v21, %v718_v14  ;;  %v723_v33 = vor.u32 %v722_v25, %v721_v16  ;;  %v605_v35 = vshll.u32 %v9492_v6, %v602_v2  ;;  %v608_v44 = vshll.u32 %v9486_v8, %v602_v2 }
  0xb0   : > { %v728_v37 = vsel %vm724_vm2, %v708_v20, %v711_v26  ;;  %v729_v38 = vsel %vm727_vm5, %v717_v28, 2102212464  ;;  %v732_v39 = vsel %vm724_vm2, %v711_v26, %v714_v27  ;;  %v736_v40 = vsel %vm724_vm2, %v714_v27, %v717_v28 }
  0xb1   : > { %v730_v41 = vsel %vm726_vm4, %v714_v27, %v729_v38  ;;  %v733_v42 = vsel %vm727_vm5, %v720_v30, 920167782  ;;  %v737_v43 = vsel %vm727_vm5, %v723_v33, 1326507024  ;;  %v604_v48 = vshrl.u32 %v9492_v6, %v603_v29 }
  0xb2   : > { %v734_v46 = vsel %vm726_vm4, %v717_v28, %v733_v42  ;;  %v738_v47 = vsel %vm726_vm4, %v720_v30, %v737_v43  ;;  %v606_v49 = vshrl.u32 %v9486_v8, %v603_v29  ;;  %v731_v50 = vsel %vm725_vm3, %v728_v37, %v730_v41 }
  0xb3   : > { %v735_v51 = vsel %vm725_vm3, %v732_v39, %v734_v46  ;;  %v739_v52 = vsel %vm725_vm3, %v736_v40, %v738_v47  ;;  %v609_v53 = vshrl.u32 %v9484_v11, %v603_v29  ;;  %v611_v5 = vshll.u32 %v9484_v11, %v602_v2 }
  0xb4   : > { %v6909_v55 = vmul.u32.u64.low %v6868_v59, %v739_v52  ;;  %v6910_v57 = vmul.u32.u64.high %v6868_v59, %v739_v52, %v6909_v55  ;;  %v6913_v58 = vmul.u32.u64.low %v6868_v59, %v735_v51  ;;  %v6914_v60 = vmul.u32.u64.high %v6868_v59, %v735_v51, %v6913_v58 }
  0xb5   : > { %v607_v62 = vor.u32 %v606_v49, %v605_v35  ;;  %v610_v63 = vor.u32 %v609_v53, %v608_v44  ;;  %v612_v7 = vshrl.u32 %v9482_v13, %v603_v29  ;;  %v747_v61 = vmul.u32 %v6868_v59, %v731_v50 }
  0xb6   : > { %v614_v9 = vshll.u32 %v9482_v13, %v602_v2  ;;  %v615_v12 = vshrl.u32 %v9490_v15, %v603_v29  ;;  %v618_v14 = vshrl.u32 %v9488_v22, %v603_v29  ;;  %v617_v17 = vshll.u32 %v9490_v15, %v602_v2 }
  0xb7   : > { %v613_v16 = vor.u32 %v612_v7, %v611_v5  ;;  %vm620_vm6 = vcmp.lt.s32.totalorder %v6872_v1, 1  ;;  %vm621_vm7 = vcmp.lt.s32.totalorder %v6872_v1, 2  ;;  %vm749_vm8 = vc.u32 %v6910_v57, %v6913_v58 }
  0xb8   : > { %v750_v18 = vadd.s32 1, %v6914_v60  ;;  %v616_v19 = vor.u32 %v615_v12, %v614_v9  ;;  %vm622_vm9 = vcmp.lt.s32.totalorder %v6872_v1, 3  ;;  %v619_v59 = vor.u32 %v618_v14, %v617_v17 }
  0xb9   : > { %vm623_vm10 = vcmp.lt.s32.totalorder %v6872_v1, 4  ;;  %v624_v20 = vsel %vm620_vm6, %v604_v48, %v607_v62  ;;  %v628_v21 = vsel %vm620_vm6, %v607_v62, %v610_v63  ;;  %v632_v27 = vsel %vm620_vm6, %v610_v63, %v613_v16 }
  0xba   : > { %v751_v25 = vsel %vm749_vm8, %v750_v18, %v6914_v60  ;;  %v625_v2 = vsel %vm623_vm10, %v613_v16, 2102212464  ;;  %v629_v26 = vsel %vm623_vm10, %v616_v19, 920167782  ;;  %v633_v33 = vsel %vm623_vm10, %v619_v59, 1326507024 }
  0xbb   : > { %v752_v28 = vadd.s32 %v751_v25, %v747_v61  ;;  %v626_v29 = vsel %vm622_vm9, %v610_v63, %v625_v2  ;;  %v630_v30 = vsel %vm622_vm9, %v613_v16, %v629_v26  ;;  %v634_v37 = vsel %vm622_vm9, %v616_v19, %v633_v33 }
  0xbc   : > { %v631_v35 = vsel %vm621_vm7, %v628_v21, %v630_v30  ;;  %v804_v38 = vor.u32 8388608, %v6876_v3  ;;  %vm807_vm11 = vcmp.gt.s32.totalorder %v6883_v10, 0  ;;  %v635_v40 = vsel %vm621_vm7, %v632_v27, %v634_v37 }
  0xbd   : > { %v753_v39 = vadd.s32 536870912, %v752_v28  ;;  %v6939_v41 = vmul.u32.u64.low %v6870_v0, %v631_v35  ;;  %v6940_v42 = vmul.u32.u64.high %v6870_v0, %v631_v35, %v6939_v41  ;;  %v627_v43 = vsel %vm621_vm7, %v624_v20, %v626_v29 }
  0xbe   : > { %v6946_v44 = vmul.u32.u64.low %v6870_v0, %v635_v40  ;;  %v6947_v46 = vmul.u32.u64.high %v6870_v0, %v635_v40, %v6946_v44  ;;  %v808_v3 = vsel %vm807_vm11, %v6883_v10, 0  ;;  %v6952_v49 = vshll.u32 %v804_v38, 8 }
  0xbf   : > { %v6950_v47 = vshrl.u32 %v753_v39, 30  ;;  %v810_v48 = vand.u32 31, %v808_v3  ;;  %v6956_v50 = vadd.f32 %v6866_v56, %v6879_v4  ;;  %v643_v1 = vmul.u32 %v6870_v0, %v627_v43 }
  0xc0   : > { %v646_v52 = vadd.s32 1, %v6940_v42  ;;  %vm645_vm12 = vc.u32 %v6947_v46, %v6939_v41  ;;  %v809_v10 = vshrl.u32 %v808_v3, 5 }
  0xc1   : > { %9608 = vst [vmem:[#allocation2_spill] sm:$0xff] %v6956_v50  ;;  %v755_v51 = vshll.u32 %v6950_v47, 30  ;;  %v811_v53 = vsub.s32 32, %v810_v48  ;;  %v813_v55 = vshll.u32 %v9492_v6, %v810_v48  ;;  %v816_v60 = vshll.u32 %v9486_v8, %v810_v48 }
  0xc2   : > { %v647_v56 = vsel %vm645_vm12, %v646_v52, %v6940_v42  ;;  %v819_v63 = vshll.u32 %v9484_v11, %v810_v48  ;;  %v822_v61 = vshll.u32 %v9482_v13, %v810_v48  ;;  %v825_v16 = vshll.u32 %v9490_v15, %v810_v48 }
  0xc3   : > { %v6965_v62 = vsub.s32 %v752_v28, %v755_v51  ;;  %v814_v4 = vshrl.u32 %v9486_v8, %v811_v53  ;;  %v648_v0 = vadd.s32 %v647_v56, %v643_v1  ;;  %v817_v5 = vshrl.u32 %v9484_v11, %v811_v53 }
  0xc4   : > { %v820_v7 = vshrl.u32 %v9482_v13, %v811_v53  ;;  %v823_v14 = vshrl.u32 %v9490_v15, %v811_v53  ;;  %v826_v59 = vshrl.u32 %v9488_v22, %v811_v53  ;;  %v812_v21 = vshrl.u32 %v9492_v6, %v811_v53  ;;  %v488_v53 = vpop.permute.xlu0 %487 }
  0xc5   : > { %v758_v9 = vsub.s32 0, %v6965_v62  ;;  %v815_v12 = vor.u32 %v814_v4, %v813_v55  ;;  %v649_v17 = vadd.s32 536870912, %v648_v0  ;;  %v818_v18 = vor.u32 %v817_v5, %v816_v60  ;;  %v374_v4 = vpop.permute.xlu1 %373 }
  0xc6   : > { %v821_v19 = vor.u32 %v820_v7, %v819_v63  ;;  %v824_v25 = vor.u32 %v823_v14, %v822_v61  ;;  %v903_v2 = vand.u32 2139095040, %v6956_v50  ;;  %v827_v27 = vor.u32 %v826_v59, %v825_v16 }
  0xc7   : > { %v5801_v20 = vmin.u32 %v758_v9, %v6965_v62  ;;  %v6980_v26 = vshrl.u32 %v649_v17, 30  ;;  %vm828_vm13 = vcmp.lt.s32.totalorder %v809_v10, 1  ;;  %vm831_vm14 = vcmp.lt.s32.totalorder %v809_v10, 4 }
  0xc8   : > { %vm829_vm15 = vcmp.lt.s32.totalorder %v809_v10, 2  ;;  %v833_v29 = vsel %vm831_vm14, %v821_v19, 2102212464  ;;  %v836_v30 = vsel %vm828_vm13, %v815_v12, %v818_v18  ;;  %vm830_vm0 = vcmp.lt.s32.totalorder %v809_v10, 3 }
  0xc9   : > { %v760_v28 = vclz %v5801_v20  ;;  %v651_v33 = vshll.u32 %v6980_v26, 30  ;;  %v837_v35 = vsel %vm831_vm14, %v824_v25, 920167782  ;;  %v840_v37 = vsel %vm828_vm13, %v818_v18, %v821_v19 }
  0xca   : > { %v832_v39 = vsel %vm828_vm13, %v812_v21, %v815_v12  ;;  %v838_v40 = vsel %vm830_vm0, %v821_v19, %v837_v35  ;;  %v841_v42 = vsel %vm831_vm14, %v827_v27, 1326507024  ;;  %v834_v44 = vsel %vm830_vm0, %v818_v18, %v833_v29 }
  0xcb   : > { %v5802_v38 = vadd.s32 4294967294, %v760_v28  ;;  %v6983_v43 = vsub.s32 %v648_v0, %v651_v33  ;;  %v839_v3 = vsel %vm829_vm15, %v836_v30, %v838_v40  ;;  %v842_v48 = vsel %vm830_vm0, %v824_v25, %v841_v42 }
  0xcc   : > { %v843_v51 = vsel %vm829_vm15, %v840_v37, %v842_v48  ;;  %v6988_v1 = vmul.u32.u64.low %v6952_v49, %v839_v3  ;;  %v6989_v52 = vmul.u32.u64.high %v6952_v49, %v839_v3, %v6988_v1  ;;  %v835_v63 = vsel %vm829_vm15, %v832_v39, %v834_v44 }
  0xcd   : > { %v654_v55 = vsub.s32 0, %v6983_v43  ;;  %v6994_v60 = vmul.u32.u64.low %v6952_v49, %v843_v51  ;;  %v6995_v56 = vmul.u32.u64.high %v6952_v49, %v843_v51, %v6994_v60  ;;  %vm5803_vm1 = vcmp.lt.s32.totalorder %v5802_v38, 0 }
  0xce   : > { %v904_v0 = vshrl.u32 %v903_v2, 23  ;;  %v554_v7 = vmul.f32 %v6841_v24, %v488_v53  ;;  %v854_v61 = vadd.s32 1, %v6989_v52  ;;  %v9475_v9 = vand.u32 2147483647, %v6956_v50 }
  0xcf   : > { %v5797_v5 = vmin.u32 %v654_v55, %v6983_v43  ;;  %v454_v14 = vmul.f32 %v6836_v23, %v374_v4  ;;  %v763_v16 = vsel %vm5803_vm1, 0, %v5802_v38  ;;  %v851_v18 = vmul.u32 %v6952_v49, %v835_v63 }
  0xd0   : > { %v5808_v12 = vadd.s32 4294967169, %v904_v0  ;;  %vm853_vm2 = vc.u32 %v6995_v56, %v6988_v1  ;;  %v764_v21 = vsub.s32 32, %v763_v16  ;;  %v768_v25 = vsub.s32 4294967266, %v763_v16 }
  0xd1   : > { %v656_v17 = vclz %v5797_v5  ;;  %v855_v10 = vsel %vm853_vm2, %v854_v61, %v6989_v52  ;;  %v907_v2 = vand.u32 8388607, %v9475_v9  ;;  %v7009_v29 = vadd.f32 %v554_v7, %v454_v14 }
  0xd2   : > { %v910_v19 = vadd.s32 1, %v5808_v12  ;;  %v856_v20 = vadd.s32 %v855_v10, %v851_v18  ;;  %v748_v49 = vadd.s32 %v6913_v58, %v6910_v57  ;;  %v769_v38 = vadd.s32 127, %v768_v25 }
  0xd3   : > { %v5798_v59 = vadd.s32 4294967294, %v656_v17  ;;  %9609 = vst [vmem:[#allocation3_spill] sm:$0xff] %v7009_v29  ;;  %v908_v39 = vor.u32 8388608, %v907_v2  ;;  %v765_v42 = vshll.u32 %v6965_v62, %v763_v16  ;;  %v644_v44 = vadd.s32 %v6939_v41, %v6947_v46 }
  0xd4   : > { %vm911_vm3 = vcmp.gt.s32.totalorder %v910_v19, 0  ;;  %v857_v27 = vadd.s32 536870912, %v856_v20  ;;  %v766_v37 = vshrl.u32 %v748_v49, %v764_v21  ;;  %v9474_v48 = vand.u32 2147483647, %v7009_v29 }
  0xd5   : > { %vm5799_vm4 = vcmp.lt.s32.totalorder %v5798_v59, 0  ;;  %v912_v28 = vsel %vm911_vm3, %v910_v19, 0  ;;  %v770_v60 = vshll.u32 %v769_v38, 23  ;;  %v7033_v63 = vshll.u32 %v908_v39, 8 }
  0xd6   : > { %v914_v30 = vand.u32 31, %v912_v28  ;;  %v7013_v33 = vsel %vm5799_vm4, 0, %v5798_v59  ;;  %v7015_v35 = vshrl.u32 %v857_v27, 30  ;;  %v7031_v46 = vor.u32 %v766_v37, %v765_v42 }
  0xd7   : > { %v664_v57 = vsub.s32 4294967266, %v7013_v33  ;;  %v913_v4 = vshrl.u32 %v912_v28, 5  ;;  %v1007_v19 = vand.u32 2139095040, %v7009_v29  ;;  %v1011_v59 = vand.u32 8388607, %v9474_v48 }
  0xd8   : > { %v915_v40 = vsub.s32 32, %v914_v30  ;;  %v859_v3 = vshll.u32 %v7015_v35, 30  ;;  %v917_v58 = vshll.u32 %v9492_v6, %v914_v30  ;;  %v920_v55 = vshll.u32 %v9486_v8, %v914_v30 }
  0xd9   : > { %v923_v62 = vshll.u32 %v9484_v11, %v914_v30  ;;  %v926_v12 = vshll.u32 %v9482_v13, %v914_v30  ;;  %v929_v16 = vshll.u32 %v9490_v15, %v914_v30  ;;  %v665_v18 = vadd.s32 127, %v664_v57 }
  0xda   : > { %v918_v51 = vshrl.u32 %v9486_v8, %v915_v40  ;;  %v921_v52 = vshrl.u32 %v9484_v11, %v915_v40  ;;  %v7026_v53 = vsub.s32 %v856_v20, %v859_v3  ;;  %v924_v41 = vshrl.u32 %v9482_v13, %v915_v40 }
  0xdb   : > { %v927_v14 = vshrl.u32 %v9490_v15, %v915_v40  ;;  %v930_v17 = vshrl.u32 %v9488_v22, %v915_v40  ;;  %v916_v20 = vshrl.u32 %v9492_v6, %v915_v40  ;;  %vm935_vm5 = vcmp.lt.s32.totalorder %v913_v4, 4 }
  0xdc   : > { %v862_v0 = vsub.s32 0, %v7026_v53  ;;  %v919_v5 = vor.u32 %v918_v51, %v917_v58  ;;  %v922_v7 = vor.u32 %v921_v52, %v920_v55  ;;  %v925_v61 = vor.u32 %v924_v41, %v923_v62  ;;  %v492_v51 = vpop.permute.xlu0 %491  ;;  %v379_v52 = vpop.permute.xlu1 %378 }
  0xdd   : > { %v928_v21 = vor.u32 %v927_v14, %v926_v12  ;;  %v931_v25 = vor.u32 %v930_v17, %v929_v16  ;;  %vm932_vm6 = vcmp.lt.s32.totalorder %v913_v4, 1  ;;  %vm934_vm7 = vcmp.lt.s32.totalorder %v913_v4, 3 }
  0xde   : > { %v5805_v10 = vmin.u32 %v862_v0, %v7026_v53  ;;  %v937_v27 = vsel %vm935_vm5, %v925_v61, 2102212464  ;;  %v940_v28 = vsel %vm932_vm6, %v919_v5, %v922_v7  ;;  %v944_v30 = vsel %vm932_vm6, %v922_v7, %v925_v61 }
  0xdf   : > { %v941_v49 = vsel %vm935_vm5, %v928_v21, 920167782  ;;  %v945_v37 = vsel %vm935_vm5, %v931_v25, 1326507024  ;;  %v660_v38 = vsub.s32 32, %v7013_v33  ;;  %v666_v39 = vshll.u32 %v665_v18, 23 }
  0xe0   : > { %v864_v2 = vclz %v5805_v10  ;;  %v942_v3 = vsel %vm934_vm7, %v925_v61, %v941_v49  ;;  %vm933_vm8 = vcmp.lt.s32.totalorder %v913_v4, 2  ;;  %v936_v57 = vsel %vm932_vm6, %v916_v20, %v919_v5 }
  0xe1   : > { %v946_v40 = vsel %vm934_vm7, %v928_v21, %v945_v37  ;;  %v1008_v58 = vshrl.u32 %v1007_v19, 23  ;;  %v938_v55 = vsel %vm934_vm7, %v922_v7, %v937_v27  ;;  %v943_v62 = vsel %vm933_vm8, %v940_v28, %v942_v3 }
  0xe2   : > { %v5806_v42 = vadd.s32 4294967294, %v864_v2  ;;  %v947_v41 = vsel %vm933_vm8, %v944_v30, %v946_v40  ;;  %v7057_v5 = vor.u32 4788187, %v770_v60  ;;  %v662_v16 = vshrl.u32 %v644_v44, %v660_v38  ;;  %v384_v30 = vpop.permute.xlu1 %383 }
  0xe3   : > { %v7054_v12 = vmul.u32.u64.low %v7033_v63, %v947_v41  ;;  %v7055_v14 = vmul.u32.u64.high %v7033_v63, %v947_v41, %v7054_v12  ;;  %v5812_v61 = vadd.s32 4294967169, %v1008_v58  ;;  %v555_v17 = vmul.f32 %v6841_v24, %v492_v51 }
  0xe4   : > { %vm5807_vm9 = vcmp.lt.s32.totalorder %v5806_v42, 0  ;;  %v455_v18 = vmul.f32 %v6836_v23, %v379_v52  ;;  %v7061_v10 = vor.u32 4788187, %v666_v39  ;;  %v661_v21 = vshll.u32 %v6983_v43, %v7013_v33  ;;  %v496_v33 = vpop.permute.xlu0 %495 }
  0xe5   : > { %v7051_v0 = vsel %vm5807_vm9, 0, %v5806_v42  ;;  %v7064_v7 = vmul.u32.u64.low %v7033_v63, %v943_v62  ;;  %v7065_v19 = vmul.u32.u64.high %v7033_v63, %v943_v62, %v7064_v7  ;;  %v1014_v20 = vadd.s32 1, %v5812_v61 }
  0xe6   : > { %v872_v25 = vsub.s32 4294967266, %v7051_v0  ;;  %v939_v60 = vsel %vm933_vm8, %v936_v57, %v938_v55  ;;  %v1012_v44 = vor.u32 8388608, %v1011_v59  ;;  %v774_v2 = vcvt.s32.f32 %v7031_v46 }
  0xe7   : > { %v7075_v27 = vadd.s32 %v6988_v1, %v6995_v56  ;;  %vm1015_vm10 = vcmp.gt.s32.totalorder %v1014_v20, 0  ;;  %v772_v28 = vand.u32 2147483647, %v7057_v5  ;;  %v7078_v49 = vor.u32 %v662_v16, %v661_v21 }
  0xe8   : > { %vm957_vm11 = vc.u32 %v7055_v14, %v7064_v7  ;;  %v1016_v43 = vsel %vm1015_vm10, %v1014_v20, 0  ;;  %v668_v4 = vand.u32 2147483647, %v7061_v10  ;;  %v955_v59 = vmul.u32 %v7033_v63, %v939_v60 }
  0xe9   : > { %v958_v37 = vadd.s32 1, %v7065_v19  ;;  %v1018_v38 = vand.u32 31, %v1016_v43  ;;  %v868_v1 = vsub.s32 32, %v7051_v0  ;;  %v7086_v56 = vadd.s32 127, %v872_v25 }
  0xea   : > { %v7088_v39 = vshll.u32 %v1012_v44, 8  ;;  %v7090_v42 = vadd.f32 %v555_v17, %v455_v18  ;;  %v556_v40 = vmul.f32 %v6841_v24, %v496_v33  ;;  %v456_v58 = vmul.f32 %v6836_v23, %v384_v30 }
  0xeb   : > { %v959_v3 = vsel %vm957_vm11, %v958_v37, %v7065_v19  ;;  %v1019_v57 = vsub.s32 32, %v1018_v38  ;;  %v1017_v63 = vshrl.u32 %v1016_v43, 5  ;;  %v1021_v52 = vshll.u32 %v9492_v6, %v1018_v38 }
  0xec   : > { %9610 = vst [vmem:[#allocation4_spill] sm:$0xff] %v7090_v42  ;;  %v960_v51 = vadd.s32 %v959_v3, %v955_v59  ;;  %v1024_v55 = vshll.u32 %v9486_v8, %v1018_v38  ;;  %v1027_v12 = vshll.u32 %v9484_v11, %v1018_v38  ;;  %v1030_v17 = vshll.u32 %v9482_v13, %v1018_v38 }
  0xed   : > { %v1022_v62 = vshrl.u32 %v9486_v8, %v1019_v57  ;;  %v1025_v41 = vshrl.u32 %v9484_v11, %v1019_v57  ;;  %v1028_v61 = vshrl.u32 %v9482_v13, %v1019_v57  ;;  %v1031_v18 = vshrl.u32 %v9490_v15, %v1019_v57 }
  0xee   : > { %v961_v16 = vadd.s32 536870912, %v960_v51  ;;  %v1033_v19 = vshll.u32 %v9490_v15, %v1018_v38  ;;  %v1034_v60 = vshrl.u32 %v9488_v22, %v1019_v57  ;;  %v9477_v33 = vand.u32 2147483647, %v7090_v42 }
  0xef   : > { %v1023_v20 = vor.u32 %v1022_v62, %v1021_v52  ;;  %v1026_v21 = vor.u32 %v1025_v41, %v1024_v55  ;;  %v1029_v25 = vor.u32 %v1028_v61, %v1027_v12  ;;  %v1032_v43 = vor.u32 %v1031_v18, %v1030_v17 }
  0xf0   : > { %v7105_v44 = vshrl.u32 %v961_v16, 30  ;;  %v1111_v30 = vand.u32 2139095040, %v7090_v42  ;;  %v1020_v59 = vshrl.u32 %v9492_v6, %v1019_v57  ;;  %v1035_v37 = vor.u32 %v1034_v60, %v1033_v19 }
  0xf1   : > { %vm1039_vm12 = vcmp.lt.s32.totalorder %v1017_v63, 4  ;;  %v7110_v3 = vadd.f32 %v556_v40, %v456_v58  ;;  %vm1036_vm13 = vcmp.lt.s32.totalorder %v1017_v63, 1  ;;  %vm1037_vm14 = vcmp.lt.s32.totalorder %v1017_v63, 2 }
  0xf2   : > { %9611 = vst [vmem:[#allocation5_spill] sm:$0xff] %v7105_v44  ;;  %v963_v38 = vshll.u32 %v7105_v44, 30  ;;  %v1041_v52 = vsel %vm1039_vm12, %v1029_v25, 2102212464  ;;  %vm1038_vm15 = vcmp.lt.s32.totalorder %v1017_v63, 3  ;;  %v1044_v55 = vsel %vm1036_vm13, %v1023_v20, %v1026_v21 }
  0xf3   : > { %9612 = vst [vmem:[#allocation6_spill] sm:$0xff] %v7110_v3  ;;  %v1045_v62 = vsel %vm1039_vm12, %v1032_v43, 920167782  ;;  %v1048_v41 = vsel %vm1036_vm13, %v1026_v21, %v1029_v25  ;;  %v1040_v61 = vsel %vm1036_vm13, %v1020_v59, %v1023_v20  ;;  %v1049_v17 = vsel %vm1039_vm12, %v1035_v37, 1326507024 }
  0xf4   : > { %v7113_v12 = vsub.s32 %v960_v51, %v963_v38  ;;  %v1046_v16 = vsel %vm1038_vm15, %v1029_v25, %v1045_v62  ;;  %v1042_v18 = vsel %vm1038_vm15, %v1026_v21, %v1041_v52  ;;  %v1050_v19 = vsel %vm1038_vm15, %v1032_v43, %v1049_v17 }
  0xf5   : > { %v1047_v57 = vsel %vm1037_vm14, %v1044_v55, %v1046_v16  ;;  %v1112_v40 = vshrl.u32 %v1111_v30, 23  ;;  %v1051_v60 = vsel %vm1037_vm14, %v1048_v41, %v1050_v19  ;;  %v670_v51 = vcvt.s32.f32 %v7078_v49  ;;  %v500_v16 = vpop.permute.xlu0 %499 }
  0xf6   : > { %v966_v58 = vsub.s32 0, %v7113_v12  ;;  %v7119_v48 = vmul.u32.u64.low %v7088_v39, %v1047_v57  ;;  %v7120_v9 = vmul.u32.u64.high %v7088_v39, %v1047_v57, %v7119_v48  ;;  %v874_v59 = vshll.u32 %v7086_v56, 23 }
  0xf7   : > { %v7125_v20 = vmul.u32.u64.low %v7088_v39, %v1051_v60  ;;  %v7126_v25 = vmul.u32.u64.high %v7088_v39, %v1051_v60, %v7125_v20  ;;  %v5816_v21 = vadd.s32 4294967169, %v1112_v40  ;;  %v1043_v30 = vsel %vm1037_vm14, %v1040_v61, %v1042_v18 }
  0xf8   : > { %v5809_v43 = vmin.u32 %v966_v58, %v7113_v12  ;;  %v1115_v37 = vand.u32 8388607, %v9477_v33  ;;  %v7137_v38 = vmul.f32 %v774_v2, %v772_v28  ;;  %v7141_v52 = vmul.f32 %v670_v51, %v668_v4 }
  0xf9   : > { %v1118_v49 = vadd.s32 1, %v5816_v21  ;;  %v870_v56 = vshrl.u32 %v7075_v27, %v868_v1  ;;  %v1062_v63 = vadd.s32 1, %v7120_v9  ;;  %v1215_v55 = vand.u32 2139095040, %v7110_v3 }
  0xfa   : > { %v968_v62 = vclz %v5809_v43  ;;  %v1059_v5 = vmul.u32 %v7088_v39, %v1043_v30  ;;  %vm1061_vm0 = vc.u32 %v7126_v25, %v7119_v48  ;;  %v7151_v46 = vor.u32 4788187, %v874_v59 }
  0xfb   : > { %vm1119_vm1 = vcmp.gt.s32.totalorder %v1118_v49, 0  ;;  %v1063_v10 = vsel %vm1061_vm0, %v1062_v63, %v7120_v9  ;;  %v1116_v2 = vor.u32 8388608, %v1115_v37  ;;  %v776_v27 = vxor.u32 2147483648, %v7137_v38 }
  0xfc   : > { %v1120_v28 = vsel %vm1119_vm1, %v1118_v49, 0  ;;  %v1064_v4 = vadd.s32 %v1063_v10, %v1059_v5  ;;  %v869_v1 = vshll.u32 %v7026_v53, %v7051_v0  ;;  %v1216_v61 = vshrl.u32 %v1215_v55, 23 }
  0xfd   : > { %v1122_v41 = vand.u32 31, %v1120_v28  ;;  %v672_v39 = vxor.u32 2147483648, %v7141_v52  ;;  %v5810_v17 = vadd.s32 4294967294, %v968_v62  ;;  %v876_v9 = vand.u32 2147483647, %v7151_v46 }
  0xfe   : > { %v1065_v18 = vadd.s32 536870912, %v1064_v4  ;;  %v7158_v19 = vor.u32 %v870_v56, %v869_v1  ;;  %v7161_v40 = vshll.u32 %v1116_v2, 8  ;;  %v9476_v58 = vand.u32 2147483647, %v7110_v3  ;;  %v389_v56 = vpop.permute.xlu1 %388 }
  0xff   : > { %v1123_v57 = vsub.s32 32, %v1122_v41  ;;  %v557_v0 = vmul.f32 %v6841_v24, %v500_v16  ;;  %v1125_v20 = vshll.u32 %v9492_v6, %v1122_v41  ;;  %v1128_v21 = vshll.u32 %v9486_v8, %v1122_v41 }
 0x100   : > { %v7164_v60 = vshrl.u32 %v1065_v18, 30  ;;  %v5820_v43 = vadd.s32 4294967169, %v1216_v61  ;;  %vm5811_vm2 = vcmp.lt.s32.totalorder %v5810_v17, 0  ;;  %v1121_v37 = vshrl.u32 %v1120_v28, 5 }
 0x101   : > { %v1126_v51 = vshrl.u32 %v9486_v8, %v1123_v57  ;;  %v1129_v53 = vshrl.u32 %v9484_v11, %v1123_v57  ;;  %v1132_v59 = vshrl.u32 %v9482_v13, %v1123_v57  ;;  %v1131_v49 = vshll.u32 %v9484_v11, %v1122_v41 }
 0x102   : > { %9613 = vst [vmem:[#allocation7_spill] sm:$0xff] %v7164_v60  ;;  %v1067_v30 = vshll.u32 %v7164_v60, 30  ;;  %v1134_v62 = vshll.u32 %v9482_v13, %v1122_v41  ;;  %v1135_v24 = vshrl.u32 %v9490_v15, %v1123_v57  ;;  %v1137_v2 = vshll.u32 %v9490_v15, %v1122_v41 }
 0x103   : > { %v1127_v63 = vor.u32 %v1126_v51, %v1125_v20  ;;  %v1130_v55 = vor.u32 %v1129_v53, %v1128_v21  ;;  %v1133_v10 = vor.u32 %v1132_v59, %v1131_v49  ;;  %v1138_v1 = vshrl.u32 %v9488_v22, %v1123_v57 }
 0x104   : > { %v7176_v5 = vsub.s32 %v1064_v4, %v1067_v30  ;;  %v1136_v61 = vor.u32 %v1135_v24, %v1134_v62  ;;  %v7182_v28 = vand.u32 8388607, %v9476_v58  ;;  %v1222_v16 = vadd.s32 1, %v5820_v43 }
 0x105   : > { %v457_v18 = vmul.f32 %v6836_v23, %v389_v56  ;;  %vm694_vm3 = vcmp.lt.s32.totalorder %v6847_v31, 0  ;;  %v7187_v51 = vsel %vm5811_vm2, 0, %v5810_v17  ;;  %v1139_v53 = vor.u32 %v1138_v1, %v1137_v2 }
 0x106   : > { %v1070_v4 = vsub.s32 0, %v7176_v5  ;;  %vm1140_vm4 = vcmp.lt.s32.totalorder %v1121_v37, 1  ;;  %v1124_v41 = vshrl.u32 %v9492_v6, %v1123_v57  ;;  %vm1142_vm5 = vcmp.lt.s32.totalorder %v1121_v37, 3 }
 0x107   : > { %vm1143_vm6 = vcmp.lt.s32.totalorder %v1121_v37, 4  ;;  %v1148_v20 = vsel %vm1140_vm4, %v1127_v63, %v1130_v55  ;;  %v1152_v30 = vsel %vm1140_vm4, %v1130_v55, %v1133_v10  ;;  %v976_v23 = vsub.s32 4294967266, %v7187_v51 }
 0x108   : > { %v5813_v21 = vmin.u32 %v1070_v4, %v7176_v5  ;;  %v1145_v59 = vsel %vm1143_vm6, %v1133_v10, 2102212464  ;;  %v1149_v43 = vsel %vm1143_vm6, %v1136_v61, 920167782  ;;  %vm1141_vm7 = vcmp.lt.s32.totalorder %v1121_v37, 2 }
 0x109   : > { %v1150_v49 = vsel %vm1142_vm5, %v1133_v10, %v1149_v43  ;;  %v1153_v17 = vsel %vm1143_vm6, %v1139_v53, 1326507024  ;;  %v1144_v62 = vsel %vm1140_vm4, %v1124_v41, %v1127_v63  ;;  %v1146_v1 = vsel %vm1142_vm5, %v1130_v55, %v1145_v59 }
 0x10a   : > { %v1072_v56 = vclz %v5813_v21  ;;  %v1151_v24 = vsel %vm1141_vm7, %v1148_v20, %v1150_v49  ;;  %v1154_v2 = vsel %vm1142_vm5, %v1136_v61, %v1153_v17  ;;  %vm1223_vm8 = vcmp.gt.s32.totalorder %v1222_v16, 0 }
 0x10b   : > { %v1155_v57 = vsel %vm1141_vm7, %v1152_v30, %v1154_v2  ;;  %v7196_v58 = vmul.u32.u64.low %v7161_v40, %v1151_v24  ;;  %v7197_v33 = vmul.u32.u64.high %v7161_v40, %v1151_v24, %v7196_v58  ;;  %v7204_v10 = vadd.f32 %v557_v0, %v457_v18 }
 0x10c   : > { %v7201_v4 = vmul.u32.u64.low %v7161_v40, %v1155_v57  ;;  %v7202_v54 = vmul.u32.u64.high %v7161_v40, %v1155_v57, %v7201_v4  ;;  %vm590_vm9 = vcmp.lt.s32.totalorder %v6849_v32, 0  ;;  %v878_v63 = vcvt.s32.f32 %v7158_v19 }
 0x10d   : > { %9614 = vst [vmem:[#allocation8_spill] sm:$0xff] %v7204_v10  ;;  %v972_v55 = vsub.s32 32, %v7187_v51  ;;  %v1224_v61 = vsel %vm1223_vm8, %v1222_v16, 0  ;;  %v7209_v53 = vadd.s32 127, %v976_v23  ;;  %v5814_v41 = vadd.s32 4294967294, %v1072_v56 }
 0x10e   : > { %v1147_v20 = vsel %vm1141_vm7, %v1144_v62, %v1146_v1  ;;  %v1226_v21 = vand.u32 31, %v1224_v61  ;;  %v7217_v0 = vsel %vm694_vm3, %v776_v27, %v7137_v38  ;;  %v7224_v19 = vsel %vm590_vm9, %v672_v39, %v7141_v52 }
 0x10f   : > { %v956_v16 = vadd.s32 %v7064_v7, %v7055_v14  ;;  %v1166_v37 = vadd.s32 1, %v7197_v33  ;;  %v7231_v18 = vmul.f32 %v878_v63, %v876_v9  ;;  %v973_v38 = vshll.u32 %v7113_v12, %v7187_v51 }
 0x110   : > { %v1220_v27 = vor.u32 8388608, %v7182_v28  ;;  %v9479_v59 = vand.u32 2147483647, %v7204_v10  ;;  %v1163_v52 = vmul.u32 %v7161_v40, %v1147_v20  ;;  %vm1165_vm10 = vc.u32 %v7202_v54, %v7196_v58 }
 0x111   : > { %v974_v43 = vshrl.u32 %v956_v16, %v972_v55  ;;  %v1227_v14 = vsub.s32 32, %v1226_v21  ;;  %v978_v7 = vshll.u32 %v7209_v53, 23  ;;  %vm5815_vm11 = vcmp.lt.s32.totalorder %v5814_v41, 0 }
 0x112   : > { %v1167_v46 = vsel %vm1165_vm10, %v1166_v37, %v7197_v33  ;;  %v1319_v39 = vand.u32 2139095040, %v7204_v10  ;;  %v1225_v30 = vshrl.u32 %v1224_v61, 5  ;;  %v1229_v49 = vshll.u32 %v9492_v6, %v1226_v21 }
 0x113   : > { %v1168_v9 = vadd.s32 %v1167_v46, %v1163_v52  ;;  %v1230_v28 = vshrl.u32 %v9486_v8, %v1227_v14  ;;  %v1233_v23 = vshrl.u32 %v9484_v11, %v1227_v14  ;;  %v1232_v40 = vshll.u32 %v9486_v8, %v1226_v21 }
 0x114   : > { %v1235_v17 = vshll.u32 %v9484_v11, %v1226_v21  ;;  %v1236_v56 = vshrl.u32 %v9482_v13, %v1227_v14  ;;  %v7249_v62 = vsel %vm5815_vm11, 0, %v5814_v41  ;;  %v1238_v33 = vshll.u32 %v9482_v13, %v1226_v21 }
 0x115   : > { %v1169_v24 = vadd.s32 536870912, %v1168_v9  ;;  %v1239_v2 = vshrl.u32 %v9490_v15, %v1227_v14  ;;  %v1231_v1 = vor.u32 %v1230_v28, %v1229_v49  ;;  %v1234_v57 = vor.u32 %v1233_v23, %v1232_v40 }
 0x116   : > { %v1237_v4 = vor.u32 %v1236_v56, %v1235_v17  ;;  %v7253_v63 = vshll.u32 %v1220_v27, 8  ;;  %v1241_v53 = vshll.u32 %v9490_v15, %v1226_v21  ;;  %v1242_v20 = vshrl.u32 %v9488_v22, %v1227_v14 }
 0x117   : > { %v7255_v55 = vshrl.u32 %v1169_v24, 30  ;;  %v1240_v61 = vor.u32 %v1239_v2, %v1238_v33  ;;  %v1080_v41 = vsub.s32 4294967266, %v7249_v62  ;;  %vm1247_vm12 = vcmp.lt.s32.totalorder %v1225_v30, 4 }
 0x118   : > { %v1320_v16 = vshrl.u32 %v1319_v39, 23  ;;  %v7262_v37 = vand.u32 8388607, %v9479_v59  ;;  %v1243_v46 = vor.u32 %v1242_v20, %v1241_v53  ;;  %vm1244_vm13 = vcmp.lt.s32.totalorder %v1225_v30, 1 }
 0x119   : > { %9615 = vst [vmem:[#allocation9_spill] sm:$0xff] %v7255_v55  ;;  %v1171_v52 = vshll.u32 %v7255_v55, 30  ;;  %v1249_v27 = vsel %vm1247_vm12, %v1237_v4, 2102212464  ;;  %v1228_v28 = vshrl.u32 %v9492_v6, %v1227_v14  ;;  %vm1246_vm14 = vcmp.lt.s32.totalorder %v1225_v30, 3 }
 0x11a   : > { %v1252_v21 = vsel %vm1244_vm13, %v1231_v1, %v1234_v57  ;;  %v1253_v23 = vsel %vm1247_vm12, %v1240_v61, 920167782  ;;  %vm1245_vm15 = vcmp.lt.s32.totalorder %v1225_v30, 2  ;;  %v1256_v40 = vsel %vm1244_vm13, %v1234_v57, %v1237_v4 }
 0x11b   : > { %v7268_v49 = vsub.s32 %v1168_v9, %v1171_v52  ;;  %v1254_v39 = vsel %vm1246_vm14, %v1237_v4, %v1253_v23  ;;  %vm798_vm0 = vcmp.lt.s32.totalorder %v6861_v45, 0  ;;  %v1248_v17 = vsel %vm1244_vm13, %v1228_v28, %v1231_v1  ;;  %v504_v1 = vpop.permute.xlu0 %503 }
 0x11c   : > { %v1250_v56 = vsel %vm1246_vm14, %v1234_v57, %v1249_v27  ;;  %v1255_v24 = vsel %vm1245_vm15, %v1252_v21, %v1254_v39  ;;  %v1257_v33 = vsel %vm1247_vm12, %v1243_v46, 1326507024  ;;  %v1076_v9 = vsub.s32 32, %v7249_v62 }
 0x11d   : > { %v1174_v2 = vsub.s32 0, %v7268_v49  ;;  %v1258_v14 = vsel %vm1246_vm14, %v1240_v61, %v1257_v33  ;;  %v7275_v53 = vmul.u32.u64.low %v7253_v63, %v1255_v24  ;;  %v7276_v20 = vmul.u32.u64.high %v7253_v63, %v1255_v24, %v7275_v53  ;;  %v394_v24 = vpop.permute.xlu1 %393 }
 0x11e   : > { %v1081_v52 = vadd.s32 127, %v1080_v41  ;;  %v1259_v4 = vsel %vm1245_vm15, %v1256_v40, %v1258_v14  ;;  %v5824_v23 = vadd.s32 4294967169, %v1320_v16  ;;  %v1251_v27 = vsel %vm1245_vm15, %v1248_v17, %v1250_v56  ;;  %v7301_v17 = vld [vmem:[%s9467_s2 + $0x1] ss:$0 sm:$0xff]  ;;  %v7314_v14 = vld [vmem:[%s9467_s2] ss:$0 sm:$0xff] }
 0x11f   : > { %v5817_v57 = vmin.u32 %v1174_v2, %v7268_v49  ;;  %v7284_v46 = vmul.u32.u64.low %v7253_v63, %v1259_v4  ;;  %v7285_v28 = vmul.u32.u64.high %v7253_v63, %v1259_v4, %v7284_v46  ;;  %v880_v61 = vxor.u32 2147483648, %v7231_v18 }
 0x120   : > { %v7291_v21 = vor.u32 %v974_v43, %v973_v38  ;;  %v1060_v41 = vadd.s32 %v7119_v48, %v7126_v25  ;;  %v1326_v16 = vadd.s32 1, %v5824_v23  ;;  %v7295_v39 = vor.u32 4788187, %v978_v7 }
 0x121   : > { %v1176_v40 = vclz %v5817_v57  ;;  %v1270_v30 = vadd.s32 1, %v7276_v20  ;;  %v558_v56 = vmul.f32 %v7301_v17, %v504_v1  ;;  %v1082_v51 = vshll.u32 %v1081_v52, 23 }
 0x122   : > { %v1078_v12 = vshrl.u32 %v1060_v41, %v1076_v9  ;;  %v1267_v38 = vmul.u32 %v7253_v63, %v1251_v27  ;;  %vm1327_vm1 = vcmp.gt.s32.totalorder %v1326_v16, 0  ;;  %vm1269_vm2 = vc.u32 %v7285_v28, %v7275_v53  ;;  %v508_v9 = vpop.permute.xlu0 %507 }
 0x123   : > { %v5818_v48 = vadd.s32 4294967294, %v1176_v40  ;;  %v1324_v25 = vor.u32 8388608, %v7262_v37  ;;  %v1328_v43 = vsel %vm1327_vm1, %v1326_v16, 0  ;;  %v1077_v7 = vshll.u32 %v7176_v5, %v7249_v62  ;;  %v399_v40 = vpop.permute.xlu1 %398 }
 0x124   : > { %v1271_v33 = vsel %vm1269_vm2, %v1270_v30, %v7276_v20  ;;  %v1330_v2 = vand.u32 31, %v1328_v43  ;;  %v458_v63 = vmul.f32 %v7314_v14, %v394_v24  ;;  %v7320_v52 = vsel %vm798_vm0, %v880_v61, %v7231_v18 }
 0x125   : > { %v980_v37 = vand.u32 2147483647, %v7295_v39  ;;  %v982_v5 = vcvt.s32.f32 %v7291_v21  ;;  %v1272_v62 = vadd.s32 %v1271_v33, %v1267_v38  ;;  %v7324_v20 = vor.u32 %v1078_v12, %v1077_v7 }
 0x126   : > { %v7326_v4 = vor.u32 4788187, %v1082_v51  ;;  %v1164_v23 = vadd.s32 %v7196_v58, %v7202_v54  ;;  %v1331_v1 = vsub.s32 32, %v1330_v2  ;;  %vm5819_vm4 = vcmp.lt.s32.totalorder %v5818_v48, 0 }
 0x127   : > { %v1273_v57 = vadd.s32 536870912, %v1272_v62  ;;  %v7330_v27 = vshll.u32 %v1324_v25, 8  ;;  %v559_v18 = vmul.f32 %v7301_v17, %v508_v9  ;;  %v1329_v46 = vshrl.u32 %v1328_v43, 5 }
 0x128   : > { %v1334_v61 = vshrl.u32 %v9486_v8, %v1331_v1  ;;  %v1337_v41 = vshrl.u32 %v9484_v11, %v1331_v1  ;;  %v7335_v16 = vadd.f32 %v558_v56, %v458_v63  ;;  %v1333_v24 = vshll.u32 %v9492_v6, %v1330_v2 }
 0x129   : > { %v7337_v30 = vshrl.u32 %v1273_v57, 30  ;;  %v1336_v54 = vshll.u32 %v9486_v8, %v1330_v2  ;;  %v1340_v58 = vshrl.u32 %v9482_v13, %v1331_v1  ;;  %v1179_v12 = vsel %vm5819_vm4, 0, %v5818_v48 }
 0x12a   : > { %9616 = vst [vmem:[#allocation10_spill] sm:$0xff] %v7335_v16  ;;  %v1339_v51 = vshll.u32 %v9484_v11, %v1330_v2  ;;  %v1342_v38 = vshll.u32 %v9482_v13, %v1330_v2  ;;  %v1343_v25 = vshrl.u32 %v9490_v15, %v1331_v1  ;;  %v1335_v56 = vor.u32 %v1334_v61, %v1333_v24 }
 0x12b   : > { %9617 = vst [vmem:[#allocation11_spill] sm:$0xff] %v7337_v30  ;;  %v1275_v43 = vshll.u32 %v7337_v30, 30  ;;  %v1338_v7 = vor.u32 %v1337_v41, %v1336_v54  ;;  %v459_v33 = vmul.f32 %v7314_v14, %v399_v40  ;;  %v1345_v57 = vshll.u32 %v9490_v15, %v1330_v2 }
 0x12c   : > { %v1341_v63 = vor.u32 %v1340_v58, %v1339_v51  ;;  %v1344_v9 = vor.u32 %v1343_v25, %v1342_v38  ;;  %v1346_v59 = vshrl.u32 %v9488_v22, %v1331_v1  ;;  %v1184_v34 = vsub.s32 4294967266, %v1179_v12 }
 0x12d   : > { %v7349_v48 = vsub.s32 %v1272_v62, %v1275_v43  ;;  %v9494_v36 = vand.u32 2147483647, %v7335_v16  ;;  %v1423_v13 = vand.u32 2139095040, %v7335_v16  ;;  %v1180_v11 = vsub.s32 32, %v1179_v12 }
 0x12e   : > { %v1332_v8 = vshrl.u32 %v9492_v6, %v1331_v1  ;;  %v1347_v61 = vor.u32 %v1346_v59, %v1345_v57  ;;  %vm1348_vm5 = vcmp.lt.s32.totalorder %v1329_v46, 1  ;;  %vm1350_vm6 = vcmp.lt.s32.totalorder %v1329_v46, 3 }
 0x12f   : > { %v1278_v41 = vsub.s32 0, %v7349_v48  ;;  %vm1351_vm7 = vcmp.lt.s32.totalorder %v1329_v46, 4  ;;  %v1356_v2 = vsel %vm1348_vm5, %v1335_v56, %v1338_v7  ;;  %v1360_v62 = vsel %vm1348_vm5, %v1338_v7, %v1341_v63 }
 0x130   : > { %v1353_v40 = vsel %vm1351_vm7, %v1341_v63, 2102212464  ;;  %v1357_v24 = vsel %vm1351_vm7, %v1344_v9, 920167782  ;;  %v1361_v54 = vsel %vm1351_vm7, %v1347_v61, 1326507024  ;;  %v1182_v1 = vshrl.u32 %v1164_v23, %v1180_v11 }
 0x131   : > { %v1185_v58 = vadd.s32 127, %v1184_v34  ;;  %v5821_v51 = vmin.u32 %v1278_v41, %v7349_v48  ;;  %vm1349_vm8 = vcmp.lt.s32.totalorder %v1329_v46, 2  ;;  %v1358_v38 = vsel %vm1350_vm6, %v1341_v63, %v1357_v24 }
 0x132   : > { %v1359_v59 = vsel %vm1349_vm8, %v1356_v2, %v1358_v38  ;;  %v1362_v25 = vsel %vm1350_vm6, %v1344_v9, %v1361_v54  ;;  %v1424_v43 = vshrl.u32 %v1423_v13, 23  ;;  %v1352_v22 = vsel %vm1348_vm5, %v1332_v8, %v1335_v56 }
 0x133   : > { %v1280_v57 = vclz %v5821_v51  ;;  %v1354_v15 = vsel %vm1350_vm6, %v1338_v7, %v1353_v40  ;;  %v1363_v6 = vsel %vm1349_vm8, %v1360_v62, %v1362_v25  ;;  %v1186_v11 = vshll.u32 %v1185_v58, 23 }
 0x134   : > { %v7365_v34 = vmul.u32.u64.low %v7330_v27, %v1363_v6  ;;  %v7366_v61 = vmul.u32.u64.high %v7330_v27, %v1363_v6, %v7365_v34  ;;  %v7369_v41 = vmul.u32.u64.low %v7330_v27, %v1359_v59  ;;  %v7370_v63 = vmul.u32.u64.high %v7330_v27, %v1359_v59, %v7369_v41 }
 0x135   : > { %v5822_v23 = vadd.s32 4294967294, %v1280_v57  ;;  %v5828_v9 = vadd.s32 4294967169, %v1424_v43  ;;  %v1427_v13 = vand.u32 8388607, %v9494_v36  ;;  %v7379_v8 = vmul.f32 %v982_v5, %v980_v37  ;;  %v404_v37 = vpop.permute.xlu1 %403 }
 0x136   : > { %v1181_v6 = vshll.u32 %v7268_v49, %v1179_v12  ;;  %v1355_v56 = vsel %vm1349_vm8, %v1352_v22, %v1354_v15  ;;  %v7383_v7 = vadd.f32 %v559_v18, %v459_v33  ;;  %v1084_v2 = vand.u32 2147483647, %v7326_v4  ;;  %v512_v49 = vpop.permute.xlu0 %511 }
 0x137   : > { %v1086_v40 = vcvt.s32.f32 %v7324_v20  ;;  %vm5823_vm10 = vcmp.lt.s32.totalorder %v5822_v23, 0  ;;  %v1430_v24 = vadd.s32 1, %v5828_v9  ;;  %vm1373_vm11 = vc.u32 %v7366_v61, %v7369_v41 }
 0x138   : > { %9618 = vst [vmem:[#allocation12_spill] sm:$0xff] %v7383_v7  ;;  %v7387_v62 = vor.u32 %v1182_v1, %v1181_v6  ;;  %v7389_v54 = vsel %vm5823_vm10, 0, %v5822_v23  ;;  %v1374_v21 = vadd.s32 1, %v7370_v63  ;;  %v7394_v39 = vor.u32 4788187, %v1186_v11 }
 0x139   : > { %v1371_v15 = vmul.u32 %v7330_v27, %v1355_v56  ;;  %v1428_v22 = vor.u32 8388608, %v1427_v13  ;;  %vm1431_vm12 = vcmp.gt.s32.totalorder %v1430_v24, 0  ;;  %v1288_v5 = vsub.s32 4294967266, %v7389_v54 }
 0x13a   : > { %v1375_v20 = vsel %vm1373_vm11, %v1374_v21, %v7370_v63  ;;  %v1432_v4 = vsel %vm1431_vm12, %v1430_v24, 0  ;;  %v1527_v18 = vand.u32 2139095040, %v7383_v7  ;;  %v7401_v12 = vmul.f32 %v1086_v40, %v1084_v2 }
 0x13b   : > { %v1376_v33 = vadd.s32 %v1375_v20, %v1371_v15  ;;  %v7404_v58 = vmul.f32 %v7301_v17, %v512_v49  ;;  %v1268_v51 = vadd.s32 %v7275_v53, %v7285_v28  ;;  %v1434_v38 = vand.u32 31, %v1432_v4 }
 0x13c   : > { %v7410_v1 = vmul.f32 %v7314_v14, %v404_v37  ;;  %v7413_v43 = vshll.u32 %v1428_v22, 8  ;;  %v1284_v34 = vsub.s32 32, %v7389_v54  ;;  %v1289_v63 = vadd.s32 127, %v1288_v5 }
 0x13d   : > { %v1377_v25 = vadd.s32 536870912, %v1376_v33  ;;  %v1435_v11 = vsub.s32 32, %v1434_v38  ;;  %v1528_v23 = vshrl.u32 %v1527_v18, 23  ;;  %v1433_v13 = vshrl.u32 %v1432_v4, 5 }
 0x13e   : > { %v9620_v53 = vmov 683565275   ;;  %v9621_v6 = vmov 2475754826   ;;  %v9622_v40 = vmov 2131351028   ;;  %v1286_v46 = vshrl.u32 %v1268_v51, %v1284_v34 }
 0x13f   : > { %v7417_v9 = vshrl.u32 %v1377_v25, 30  ;;  %v1437_v28 = vshll.u32 %v9620_v53, %v1434_v38  ;;  %v1440_v56 = vshll.u32 %v9621_v6, %v1434_v38  ;;  %v1438_v2 = vshrl.u32 %v9621_v6, %v1435_v11 }
 0x140   : > { %v1441_v24 = vshrl.u32 %v9622_v40, %v1435_v11  ;;  %v1443_v21 = vshll.u32 %v9622_v40, %v1434_v38  ;;  %v9623_v49 = vmov 2102212464   ;;  %v9624_v5 = vmov 920167782  }
 0x141   : > { %9619 = vst [vmem:[#allocation13_spill] sm:$0xff] %v7417_v9  ;;  %v1444_v15 = vshrl.u32 %v9623_v49, %v1435_v11  ;;  %v1379_v22 = vshll.u32 %v7417_v9, 30  ;;  %v1446_v37 = vshll.u32 %v9623_v49, %v1434_v38  ;;  %v1447_v20 = vshrl.u32 %v9624_v5, %v1435_v11 }
 0x142   : > { %v1449_v4 = vshll.u32 %v9624_v5, %v1434_v38  ;;  %v1439_v18 = vor.u32 %v1438_v2, %v1437_v28  ;;  %v1442_v25 = vor.u32 %v1441_v24, %v1440_v56  ;;  %v9625_v27 = vmov 1326507024  }
 0x143   : > { %v1445_v36 = vor.u32 %v1444_v15, %v1443_v21  ;;  %v1450_v59 = vshrl.u32 %v9625_v27, %v1435_v11  ;;  %vm902_vm13 = vcmp.lt.s32.totalorder %v6956_v50, 0  ;;  %v7431_v57 = vsub.s32 %v1376_v33, %v1379_v22 }
 0x144   : > { %v1448_v30 = vor.u32 %v1447_v20, %v1446_v37  ;;  %v5832_v55 = vadd.s32 4294967169, %v1528_v23  ;;  %v1290_v60 = vshll.u32 %v1289_v63, 23  ;;  %vm1452_vm14 = vcmp.lt.s32.totalorder %v1433_v13, 1 }
 0x145   : > { %v1451_v9 = vor.u32 %v1450_v59, %v1449_v4  ;;  %vm1455_vm15 = vcmp.lt.s32.totalorder %v1433_v13, 4  ;;  %v1382_v44 = vsub.s32 0, %v7431_v57  ;;  %v1436_v38 = vshrl.u32 %v9620_v53, %v1435_v11 }
 0x146   : > { %v1457_v28 = vsel %vm1455_vm15, %v1445_v36, 2102212464  ;;  %v1460_v56 = vsel %vm1452_vm14, %v1439_v18, %v1442_v25  ;;  %vm1454_vm1 = vcmp.lt.s32.totalorder %v1433_v13, 3  ;;  %v1461_v2 = vsel %vm1455_vm15, %v1448_v30, 920167782 }
 0x147   : > { %v1464_v24 = vsel %vm1452_vm14, %v1442_v25, %v1445_v36  ;;  %v1465_v21 = vsel %vm1455_vm15, %v1451_v9, 1326507024  ;;  %v5825_v51 = vmin.u32 %v1382_v44, %v7431_v57  ;;  %vm1453_vm2 = vcmp.lt.s32.totalorder %v1433_v13, 2 }
 0x148   : > { %v1456_v33 = vsel %vm1452_vm14, %v1436_v38, %v1439_v18  ;;  %v1462_v34 = vsel %vm1454_vm1, %v1445_v36, %v1461_v2  ;;  %v1458_v23 = vsel %vm1454_vm1, %v1442_v25, %v1457_v28  ;;  %v1466_v59 = vsel %vm1454_vm1, %v1448_v30, %v1465_v21  ;;  %v516_v36 = vpop.permute.xlu0 %515 }
 0x149   : > { %v1463_v63 = vsel %vm1453_vm2, %v1460_v56, %v1462_v34  ;;  %v1534_v15 = vadd.s32 1, %v5832_v55  ;;  %v1285_v22 = vshll.u32 %v7349_v48, %v7389_v54  ;;  %v1467_v37 = vsel %vm1453_vm2, %v1464_v24, %v1466_v59  ;;  %v409_v56 = vpop.permute.xlu1 %408 }
 0x14a   : > { %v7439_v11 = vmul.u32.u64.low %v7413_v43, %v1463_v63  ;;  %v7440_v20 = vmul.u32.u64.high %v7413_v43, %v1463_v63, %v7439_v11  ;;  %v1291_v4 = vor.u32 4788187, %v1290_v60  ;;  %v1384_v13 = vclz %v5825_v51 }
 0x14b   : > { %v7444_v9 = vmul.u32.u64.low %v7413_v43, %v1467_v37  ;;  %v7445_v44 = vmul.u32.u64.high %v7413_v43, %v1467_v37, %v7444_v9  ;;  %vm1535_vm4 = vcmp.gt.s32.totalorder %v1534_v15, 0  ;;  %v1459_v18 = vsel %vm1453_vm2, %v1456_v33, %v1458_v23 }
 0x14c   : > { %v9626_v55 = vand.u32 2147483647, %v7383_v7  ;;  %v1536_v25 = vsel %vm1535_vm4, %v1534_v15, 0  ;;  %v9627_v48 = vxor.u32 2147483648, %v7379_v8  ;;  %v1287_v60 = vor.u32 %v1286_v46, %v1285_v22 }
 0x14d   : > { %v1538_v38 = vand.u32 31, %v1536_v25  ;;  %v7458_v28 = vadd.f32 %v7404_v58, %v7410_v1  ;;  %v9630_v24 = vand.u32 2147483647, %v7394_v39  ;;  %v9631_v21 = vcvt.s32.f32 %v7387_v62 }
 0x14e   : > { %v1531_v30 = vand.u32 8388607, %v9626_v55  ;;  %v7454_v54 = vsel %vm902_vm13, %v9627_v48, %v7379_v8  ;;  %v1478_v33 = vadd.s32 1, %v7440_v20  ;;  %v7469_v8 = vmul.f32 %v7301_v17, %v516_v36 }
 0x14f   : > { %9628 = vst [vmem:[#allocation14_spill] sm:$0xff] %v7454_v54  ;;  %9629 = vst [vmem:[#allocation15_spill] sm:$0xff] %v7458_v28  ;;  %v7465_v51 = vmul.f32 %v9631_v21, %v9630_v24  ;;  %v1292_v46 = vand.u32 2147483647, %v1291_v4  ;;  %v1475_v34 = vmul.u32 %v7413_v43, %v1459_v18  ;;  %vm1477_vm5 = vc.u32 %v7445_v44, %v7439_v11 }
 0x150   : > { %v1539_v58 = vsub.s32 32, %v1538_v38  ;;  %v5826_v1 = vadd.s32 4294967294, %v1384_v13  ;;  %v1479_v23 = vsel %vm1477_vm5, %v1478_v33, %v7440_v20  ;;  %v1532_v39 = vor.u32 8388608, %v1531_v30 }
 0x151   : > { %v461_v62 = vmul.f32 %v7314_v14, %v409_v56  ;;  %v1294_v63 = vcvt.s32.f32 %v1287_v60  ;;  %v1480_v59 = vadd.s32 %v1479_v23, %v1475_v34  ;;  %v1541_v37 = vshll.u32 %v9620_v53, %v1538_v38 }
 0x152   : > { %v1542_v15 = vshrl.u32 %v9621_v6, %v1539_v58  ;;  %v1544_v43 = vshll.u32 %v9621_v6, %v1538_v38  ;;  %v1545_v4 = vshrl.u32 %v9622_v40, %v1539_v58  ;;  %v1631_v9 = vand.u32 2139095040, %v7458_v28 }
 0x153   : > { %v7482_v36 = vmul.f32 %v1294_v63, %v1292_v46  ;;  %v1481_v20 = vadd.s32 536870912, %v1480_v59  ;;  %v1547_v13 = vshll.u32 %v9622_v40, %v1538_v38  ;;  %v1548_v18 = vshrl.u32 %v9623_v49, %v1539_v58 }
 0x154   : > { %vm5827_vm6 = vcmp.lt.s32.totalorder %v5826_v1, 0  ;;  %v1537_v55 = vshrl.u32 %v1536_v25, 5  ;;  %v1543_v30 = vor.u32 %v1542_v15, %v1541_v37  ;;  %v1546_v48 = vor.u32 %v1545_v4, %v1544_v43 }
 0x155   : > { %v7486_v60 = vshrl.u32 %v1481_v20, 30  ;;  %v1549_v56 = vor.u32 %v1548_v18, %v1547_v13  ;;  %v1550_v24 = vshll.u32 %v9623_v49, %v1538_v38  ;;  %v1551_v21 = vshrl.u32 %v9624_v5, %v1539_v58 }
 0x156   : > { %v1553_v33 = vshll.u32 %v9624_v5, %v1538_v38  ;;  %v1554_v46 = vshrl.u32 %v9625_v27, %v1539_v58  ;;  %v1572_v34 = vshll.u32 %v1532_v39, 8  ;;  %v1632_v23 = vshrl.u32 %v1631_v9, 23 }
 0x157   : > { %9632 = vst [vmem:[#allocation16_spill] sm:$0xff] %v7486_v60  ;;  %vm9553_vm7 = vcmp.lt.s32.totalorder %v7009_v29, 0  ;;  %v1387_v63 = vsel %vm5827_vm6, 0, %v5826_v1  ;;  %v1483_v25 = vshll.u32 %v7486_v60, 30  ;;  %v1540_v15 = vshrl.u32 %v9620_v53, %v1539_v58 }
 0x158   : > { %v1552_v37 = vor.u32 %v1551_v21, %v1550_v24  ;;  %v1555_v43 = vor.u32 %v1554_v46, %v1553_v33  ;;  %vm1556_vm8 = vcmp.lt.s32.totalorder %v1537_v55, 1  ;;  %vm1558_vm10 = vcmp.lt.s32.totalorder %v1537_v55, 3 }
 0x159   : > { %vm1559_vm11 = vcmp.lt.s32.totalorder %v1537_v55, 4  ;;  %v7495_v4 = vsub.s32 %v1480_v59, %v1483_v25  ;;  %v1564_v38 = vsel %vm1556_vm8, %v1543_v30, %v1546_v48  ;;  %vm9552_vm12 = vcmp.lt.s32.totalorder %v7090_v42, 0 }
 0x15a   : > { %v1561_v20 = vsel %vm1559_vm11, %v1549_v56, 2102212464  ;;  %v1565_v13 = vsel %vm1559_vm11, %v1552_v37, 920167782  ;;  %v1388_v39 = vsub.s32 32, %v1387_v63  ;;  %vm1557_vm14 = vcmp.lt.s32.totalorder %v1537_v55, 2 }
 0x15b   : > { %v1566_v1 = vsel %vm1558_vm10, %v1549_v56, %v1565_v13  ;;  %v1568_v9 = vsel %vm1556_vm8, %v1546_v48, %v1549_v56  ;;  %vm9551_vm15 = vcmp.lt.s32.totalorder %v7110_v3, 0  ;;  %v1486_v58 = vsub.s32 0, %v7495_v4 }
 0x15c   : > { %v1560_v18 = vsel %vm1556_vm8, %v1540_v15, %v1543_v30  ;;  %v1567_v24 = vsel %vm1557_vm14, %v1564_v38, %v1566_v1  ;;  %v1569_v21 = vsel %vm1559_vm11, %v1555_v43, 1326507024  ;;  %v1562_v59 = vsel %vm1558_vm10, %v1546_v48, %v1561_v20 }
 0x15d   : > { %v1570_v33 = vsel %vm1558_vm10, %v1552_v37, %v1569_v21  ;;  %v7504_v46 = vmul.u32.u64.low %v1572_v34, %v1567_v24  ;;  %v7505_v25 = vmul.u32.u64.high %v1572_v34, %v1567_v24, %v7504_v46  ;;  %v1392_v22 = vsub.s32 4294967266, %v1387_v63 }
 0x15e   : > { %v5829_v13 = vmin.u32 %v1486_v58, %v7495_v4  ;;  %v1571_v56 = vsel %vm1557_vm14, %v1568_v9, %v1570_v33  ;;  %v5836_v2 = vadd.s32 4294967169, %v1632_v23  ;;  %v1192_v60 = vxor.u32 2147483648, %v7465_v51 }
 0x15f   : > { %v7511_v30 = vmul.u32.u64.low %v1572_v34, %v1571_v56  ;;  %v7512_v15 = vmul.u32.u64.high %v1572_v34, %v1571_v56, %v7511_v30  ;;  %v7515_v43 = vadd.f32 %v7469_v8, %v461_v62  ;;  %v1372_v48 = vadd.s32 %v7369_v41, %v7366_v61 }
 0x160   : > { %v1488_v37 = vclz %v5829_v13  ;;  %v1563_v20 = vsel %vm1557_vm14, %v1560_v18, %v1562_v59  ;;  %v1638_v38 = vadd.s32 1, %v5836_v2  ;;  %v9634_v1 = vxor.u32 2147483648, %v7401_v12  ;;  %v520_v2 = vpop.permute.xlu0 %519 }
 0x161   : > { %9633 = vst [vmem:[#allocation17_spill] sm:$0xff] %v7515_v43  ;;  %v1296_v9 = vxor.u32 2147483648, %v7482_v36  ;;  %v1582_v58 = vadd.s32 1, %v7505_v25  ;;  %v9636_v8 = vand.u32 2147483647, %v7458_v28  ;;  %v1390_v24 = vshrl.u32 %v1372_v48, %v1388_v39 }
 0x162   : > { %v7525_v23 = vsel %vm9553_vm7, %v9634_v1, %v7401_v12  ;;  %v7531_v61 = vadd.s32 127, %v1392_v22  ;;  %v5830_v41 = vadd.s32 4294967294, %v1488_v37  ;;  %vm1639_vm1 = vcmp.gt.s32.totalorder %v1638_v38, 0 }
 0x163   : > { %9635 = vst [vmem:[#allocation18_spill] sm:$0xff] %v7525_v23  ;;  %v1635_v62 = vand.u32 8388607, %v9636_v8  ;;  %v1579_v55 = vmul.u32 %v1572_v34, %v1563_v20  ;;  %vm1581_vm2 = vc.u32 %v7512_v15, %v7504_v46  ;;  %v1640_v18 = vsel %vm1639_vm1, %v1638_v38, 0 }
 0x164   : > { %v1735_v12 = vand.u32 2139095040, %v7515_v43  ;;  %v7539_v21 = vsel %vm9552_vm12, %v1192_v60, %v7465_v51  ;;  %v1389_v59 = vshll.u32 %v7431_v57, %v1387_v63  ;;  %v1583_v22 = vsel %vm1581_vm2, %v1582_v58, %v7505_v25 }
 0x165   : > { %9637 = vst [vmem:[#allocation19_spill] sm:$0xff] %v7539_v21  ;;  %v1642_v39 = vand.u32 31, %v1640_v18  ;;  %v7546_v34 = vsel %vm9551_vm15, %v1296_v9, %v7482_v36  ;;  %vm5831_vm4 = vcmp.lt.s32.totalorder %v5830_v41, 0  ;;  %v1584_v33 = vadd.s32 %v1583_v22, %v1579_v55 }
 0x166   : > { %9638 = vst [vmem:[#allocation20_spill] sm:$0xff] %v7546_v34  ;;  %v7549_v13 = vmul.f32 %v7301_v17, %v520_v2  ;;  %v7551_v56 = vor.u32 %v1390_v24, %v1389_v59  ;;  %v1476_v51 = vadd.s32 %v7439_v11, %v7445_v44  ;;  %v1636_v60 = vor.u32 8388608, %v1635_v62 }
 0x167   : > { %v1643_v57 = vsub.s32 32, %v1642_v39  ;;  %v1394_v63 = vshll.u32 %v7531_v61, 23  ;;  %v1585_v25 = vadd.s32 536870912, %v1584_v33  ;;  %v1736_v48 = vshrl.u32 %v1735_v12, 23 }
 0x168   : > { %v7557_v36 = vsel %vm5831_vm4, 0, %v5830_v41  ;;  %v1645_v37 = vshll.u32 %v9620_v53, %v1642_v39  ;;  %v1648_v38 = vshll.u32 %v9621_v6, %v1642_v39  ;;  %v1651_v44 = vshll.u32 %v9622_v40, %v1642_v39 }
 0x169   : > { %v1646_v20 = vshrl.u32 %v9621_v6, %v1643_v57  ;;  %v7562_v1 = vshrl.u32 %v1585_v25, 30  ;;  %v1649_v11 = vshrl.u32 %v9622_v40, %v1643_v57  ;;  %v1652_v9 = vshrl.u32 %v9623_v49, %v1643_v57 }
 0x16a   : > { %v1641_v58 = vshrl.u32 %v1640_v18, 5  ;;  %v1654_v8 = vshll.u32 %v9623_v49, %v1642_v39  ;;  %v1655_v62 = vshrl.u32 %v9624_v5, %v1643_v57  ;;  %v7569_v24 = vshll.u32 %v1636_v60, 8 }
 0x16b   : > { %9639 = vst [vmem:[#allocation21_spill] sm:$0xff] %v7562_v1  ;;  %v1587_v61 = vshll.u32 %v7562_v1, 30  ;;  %v1647_v41 = vor.u32 %v1646_v20, %v1645_v37  ;;  %v1650_v2 = vor.u32 %v1649_v11, %v1648_v38  ;;  %v1653_v55 = vor.u32 %v1652_v9, %v1651_v44 }
 0x16c   : > { %v1496_v12 = vsub.s32 4294967266, %v7557_v36  ;;  %v1656_v59 = vor.u32 %v1655_v62, %v1654_v8  ;;  %v1657_v22 = vshll.u32 %v9624_v5, %v1642_v39  ;;  %v1658_v25 = vshrl.u32 %v9625_v27, %v1643_v57 }
 0x16d   : > { %v1492_v18 = vsub.s32 32, %v7557_v36  ;;  %v7576_v30 = vsub.s32 %v1584_v33, %v1587_v61  ;;  %v1644_v34 = vshrl.u32 %v9620_v53, %v1643_v57  ;;  %v5840_v60 = vadd.s32 4294967169, %v1736_v48 }
 0x16e   : > { %v1659_v3 = vor.u32 %v1658_v25, %v1657_v22  ;;  %vm1660_vm5 = vcmp.lt.s32.totalorder %v1641_v58, 1  ;;  %vm1662_vm6 = vcmp.lt.s32.totalorder %v1641_v58, 3  ;;  %vm1663_vm8 = vcmp.lt.s32.totalorder %v1641_v58, 4 }
 0x16f   : > { %v1590_v37 = vsub.s32 0, %v7576_v30  ;;  %v1665_v20 = vsel %vm1663_vm8, %v1653_v55, 2102212464  ;;  %v1668_v38 = vsel %vm1660_vm5, %v1647_v41, %v1650_v2  ;;  %v1669_v11 = vsel %vm1663_vm8, %v1656_v59, 920167782 }
 0x170   : > { %v1497_v44 = vadd.s32 127, %v1496_v12  ;;  %vm1661_vm10 = vcmp.lt.s32.totalorder %v1641_v58, 2  ;;  %v1670_v39 = vsel %vm1662_vm6, %v1653_v55, %v1669_v11  ;;  %v1672_v9 = vsel %vm1660_vm5, %v1650_v2, %v1653_v55  ;;  %v414_v55 = vpop.permute.xlu1 %413 }
 0x171   : > { %v5833_v8 = vmin.u32 %v1590_v37, %v7576_v30  ;;  %v1664_v33 = vsel %vm1660_vm5, %v1644_v34, %v1647_v41  ;;  %v1671_v62 = vsel %vm1661_vm10, %v1668_v38, %v1670_v39  ;;  %v1673_v57 = vsel %vm1663_vm8, %v1659_v3, 1326507024 }
 0x172   : > { %v1666_v48 = vsel %vm1662_vm6, %v1650_v2, %v1665_v20  ;;  %v1674_v61 = vsel %vm1662_vm6, %v1656_v59, %v1673_v57  ;;  %v7583_v22 = vmul.u32.u64.low %v7569_v24, %v1671_v62  ;;  %v7584_v25 = vmul.u32.u64.high %v7569_v24, %v1671_v62, %v7583_v22 }
 0x173   : > { %v7587_v1 = vor.u32 4788187, %v1394_v63  ;;  %v1592_v21 = vclz %v5833_v8  ;;  %v1675_v12 = vsel %vm1661_vm10, %v1672_v9, %v1674_v61  ;;  %v1742_v11 = vadd.s32 1, %v5840_v60  ;;  %v524_v63 = vpop.permute.xlu0 %523 }
 0x174   : > { %v7592_v34 = vmul.u32.u64.low %v7569_v24, %v1675_v12  ;;  %v7593_v41 = vmul.u32.u64.high %v7569_v24, %v1675_v12, %v7592_v34  ;;  %v9640_v3 = vand.u32 2147483647, %v7515_v43  ;;  %v1494_v59 = vshrl.u32 %v1476_v51, %v1492_v18 }
 0x175   : > { %v5834_v20 = vadd.s32 4294967294, %v1592_v21  ;;  %v1667_v38 = vsel %vm1661_vm10, %v1664_v33, %v1666_v48  ;;  %vm1743_vm11 = vcmp.gt.s32.totalorder %v1742_v11, 0  ;;  %v1498_v39 = vshll.u32 %v1497_v44, 23 }
 0x176   : > { %v1739_v2 = vand.u32 8388607, %v9640_v3  ;;  %v1686_v9 = vadd.s32 1, %v7584_v25  ;;  %v1744_v60 = vsel %vm1743_vm11, %v1742_v11, 0  ;;  %v462_v8 = vmul.f32 %v7314_v14, %v414_v55 }
 0x177   : > { %v1493_v57 = vshll.u32 %v7495_v4, %v7557_v36  ;;  %vm5835_vm14 = vcmp.lt.s32.totalorder %v5834_v20, 0  ;;  %v1746_v61 = vand.u32 31, %v1744_v60  ;;  %v1683_v21 = vmul.u32 %v7569_v24, %v1667_v38 }
 0x178   : > { %v7603_v12 = vsel %vm5835_vm14, 0, %v5834_v20  ;;  %vm1685_vm1 = vc.u32 %v7593_v41, %v7583_v22  ;;  %v7609_v51 = vmul.f32 %v7301_v17, %v524_v63  ;;  %v1580_v18 = vadd.s32 %v7504_v46, %v7512_v15 }
 0x179   : > { %v7611_v58 = vor.u32 %v1494_v59, %v1493_v57  ;;  %v1687_v44 = vsel %vm1685_vm1, %v1686_v9, %v7584_v25  ;;  %v1740_v4 = vor.u32 8388608, %v1739_v2  ;;  %v7616_v36 = vor.u32 4788187, %v1498_v39  ;;  %v419_v2 = vpop.permute.xlu1 %418 }
 0x17a   : > { %v1688_v33 = vadd.s32 %v1687_v44, %v1683_v21  ;;  %v1747_v48 = vsub.s32 32, %v1746_v61  ;;  %v7619_v24 = vadd.f32 %v7549_v13, %v462_v8  ;;  %v1596_v11 = vsub.s32 32, %v7603_v12 }
 0x17b   : > { %v1600_v55 = vsub.s32 4294967266, %v7603_v12  ;;  %v1745_v34 = vshrl.u32 %v1744_v60, 5  ;;  %v1749_v3 = vshll.u32 %v9620_v53, %v1746_v61  ;;  %v1752_v15 = vshll.u32 %v9621_v6, %v1746_v61 }
 0x17c   : > { %v1689_v59 = vadd.s32 536870912, %v1688_v33  ;;  %v1750_v46 = vshrl.u32 %v9621_v6, %v1747_v48  ;;  %v1753_v25 = vshrl.u32 %v9622_v40, %v1747_v48  ;;  %v1755_v20 = vshll.u32 %v9622_v40, %v1746_v61 }
 0x17d   : > { %v1756_v13 = vshrl.u32 %v9623_v49, %v1747_v48  ;;  %v1758_v38 = vshll.u32 %v9623_v49, %v1746_v61  ;;  %v1759_v63 = vshrl.u32 %v9624_v5, %v1747_v48  ;;  %v1780_v8 = vshll.u32 %v1740_v4, 8 }
 0x17e   : > { %v7631_v39 = vshrl.u32 %v1689_v59, 30  ;;  %v1751_v9 = vor.u32 %v1750_v46, %v1749_v3  ;;  %v1754_v60 = vor.u32 %v1753_v25, %v1752_v15  ;;  %v1601_v57 = vadd.s32 127, %v1600_v55 }
 0x17f   : > { %v1757_v21 = vor.u32 %v1756_v13, %v1755_v20  ;;  %v1760_v44 = vor.u32 %v1759_v63, %v1758_v38  ;;  %v463_v37 = vmul.f32 %v7314_v14, %v419_v2  ;;  %v1761_v42 = vshll.u32 %v9624_v5, %v1746_v61 }
 0x180   : > { %9641 = vst [vmem:[#allocation22_spill] sm:$0xff] %v7631_v39  ;;  %v1691_v62 = vshll.u32 %v7631_v39, 30  ;;  %v1762_v23 = vshrl.u32 %v9625_v27, %v1747_v48  ;;  %v1598_v54 = vshrl.u32 %v1580_v18, %v1596_v11  ;;  %v1748_v59 = vshrl.u32 %v9620_v53, %v1747_v48 }
 0x181   : > { %vm1764_vm2 = vcmp.lt.s32.totalorder %v1745_v34, 1  ;;  %vm1767_vm4 = vcmp.lt.s32.totalorder %v1745_v34, 4  ;;  %v1602_v15 = vshll.u32 %v1601_v57, 23  ;;  %vm1766_vm5 = vcmp.lt.s32.totalorder %v1745_v34, 3 }
 0x182   : > { %v7639_v3 = vsub.s32 %v1688_v33, %v1691_v62  ;;  %v1763_v4 = vor.u32 %v1762_v23, %v1761_v42  ;;  %v1769_v55 = vsel %vm1767_vm4, %v1757_v21, 2102212464  ;;  %v1772_v46 = vsel %vm1764_vm2, %v1751_v9, %v1754_v60 }
 0x183   : > { %v1773_v25 = vsel %vm1767_vm4, %v1760_v44, 920167782  ;;  %v1776_v2 = vsel %vm1764_vm2, %v1754_v60, %v1757_v21  ;;  %vm1765_vm6 = vcmp.lt.s32.totalorder %v1745_v34, 2  ;;  %v1768_v38 = vsel %vm1764_vm2, %v1748_v59, %v1751_v9 }
 0x184   : > { %v1694_v61 = vsub.s32 0, %v7639_v3  ;;  %v1774_v20 = vsel %vm1766_vm5, %v1757_v21, %v1773_v25  ;;  %v1777_v13 = vsel %vm1767_vm4, %v1763_v4, 1326507024  ;;  %v1770_v18 = vsel %vm1766_vm5, %v1754_v60, %v1769_v55 }
 0x185   : > { %v1775_v11 = vsel %vm1765_vm6, %v1772_v46, %v1774_v20  ;;  %v1778_v48 = vsel %vm1766_vm5, %v1760_v44, %v1777_v13  ;;  %v1500_v23 = vand.u32 2147483647, %v7616_v36  ;;  %v1839_v34 = vand.u32 2139095040, %v7619_v24 }
 0x186   : > { %v5837_v63 = vmin.u32 %v1694_v61, %v7639_v3  ;;  %v1779_v62 = vsel %vm1765_vm6, %v1776_v2, %v1778_v48  ;;  %v7643_v33 = vmul.u32.u64.low %v1780_v8, %v1775_v11  ;;  %v7644_v42 = vmul.u32.u64.high %v1780_v8, %v1775_v11, %v7643_v33  ;;  %v528_v2 = vpop.permute.xlu0 %527 }
 0x187   : > { %v7648_v57 = vmul.u32.u64.low %v1780_v8, %v1779_v62  ;;  %v7649_v29 = vmul.u32.u64.high %v1780_v8, %v1779_v62, %v7648_v57  ;;  %v1597_v9 = vshll.u32 %v7576_v30, %v7603_v12  ;;  %v1771_v21 = vsel %vm1765_vm6, %v1768_v38, %v1770_v18 }
 0x188   : > { %v1696_v60 = vclz %v5837_v63  ;;  %v7655_v44 = vadd.f32 %v7609_v51, %v463_v37  ;;  %v9642_v59 = vand.u32 2147483647, %v7587_v1  ;;  %v9643_v4 = vcvt.s32.f32 %v7551_v56  ;;  %v424_v51 = vpop.permute.xlu1 %423 }
 0x189   : > { %v1502_v36 = vcvt.s32.f32 %v7611_v58  ;;  %v1603_v46 = vor.u32 4788187, %v1602_v15  ;;  %v1840_v25 = vshrl.u32 %v1839_v34, 23  ;;  %v1599_v61 = vor.u32 %v1598_v54, %v1597_v9 }
 0x18a   : > { %v7661_v55 = vmul.f32 %v9643_v4, %v9642_v59  ;;  %v5838_v20 = vadd.s32 4294967294, %v1696_v60  ;;  %v1790_v30 = vadd.s32 1, %v7644_v42  ;;  %v9644_v12 = vand.u32 2147483647, %v7619_v24  ;;  %v532_v9 = vpop.permute.xlu0 %531 }
 0x18b   : > { %v1787_v37 = vmul.u32 %v1780_v8, %v1771_v21  ;;  %vm1789_vm8 = vc.u32 %v7649_v29, %v7643_v33  ;;  %v5844_v1 = vadd.s32 4294967169, %v1840_v25  ;;  %v9515_v56 = vand.u32 2147483647, %v7655_v44 }
 0x18c   : > { %v1843_v13 = vand.u32 8388607, %v9644_v12  ;;  %v7670_v38 = vmul.f32 %v1502_v36, %v1500_v23  ;;  %vm5839_vm10 = vcmp.lt.s32.totalorder %v5838_v20, 0  ;;  %v1791_v58 = vsel %vm1789_vm8, %v1790_v30, %v7644_v42 }
 0x18d   : > { %v1943_v54 = vand.u32 2139095040, %v7655_v44  ;;  %v1604_v15 = vand.u32 2147483647, %v1603_v46  ;;  %v7674_v18 = vsel %vm5839_vm10, 0, %v5838_v20  ;;  %v1792_v11 = vadd.s32 %v1791_v58, %v1787_v37 }
 0x18e   : > { %v1846_v48 = vadd.s32 1, %v5844_v1  ;;  %v1606_v8 = vcvt.s32.f32 %v1599_v61  ;;  %v1844_v63 = vor.u32 8388608, %v1843_v13  ;;  %v564_v62 = vmul.f32 %v7301_v17, %v528_v2 }
 0x18f   : > { %v464_v57 = vmul.f32 %v7314_v14, %v424_v51  ;;  %v1704_v34 = vsub.s32 4294967266, %v7674_v18  ;;  %v1793_v23 = vadd.s32 536870912, %v1792_v11  ;;  %v7681_v42 = vand.u32 8388607, %v9515_v56 }
 0x190   : > { %vm1847_vm11 = vcmp.gt.s32.totalorder %v1846_v48, 0  ;;  %v1944_v4 = vshrl.u32 %v1943_v54, 23  ;;  %v7685_v36 = vmul.f32 %v1606_v8, %v1604_v15  ;;  %v1684_v14 = vadd.s32 %v7583_v22, %v7593_v41 }
 0x191   : > { %v1848_v59 = vsel %vm1847_vm11, %v1846_v48, 0  ;;  %v7689_v46 = vshrl.u32 %v1793_v23, 30  ;;  %v1700_v2 = vsub.s32 32, %v7674_v18  ;;  %v7692_v61 = vshll.u32 %v1844_v63, 8 }
 0x192   : > { %v1850_v25 = vand.u32 31, %v1848_v59  ;;  %v7694_v20 = vadd.f32 %v564_v62, %v464_v57  ;;  %v7697_v30 = vmul.f32 %v7301_v17, %v532_v9  ;;  %v1705_v12 = vadd.s32 127, %v1704_v34 }
 0x193   : > { %9645 = vst [vmem:[#allocation23_spill] sm:$0xff] %v7689_v46  ;;  %v1795_v13 = vshll.u32 %v7689_v46, 30  ;;  %v1948_v1 = vor.u32 8388608, %v7681_v42  ;;  %v1849_v51 = vshrl.u32 %v1848_v59, 5  ;;  %v5848_v58 = vadd.s32 4294967169, %v1944_v4 }
 0x194   : > { %v1851_v37 = vsub.s32 32, %v1850_v25  ;;  %v1853_v22 = vshll.u32 %v9620_v53, %v1850_v25  ;;  %v1856_v41 = vshll.u32 %v9621_v6, %v1850_v25  ;;  %v1859_v17 = vshll.u32 %v9622_v40, %v1850_v25 }
 0x195   : > { %v7703_v54 = vsub.s32 %v1792_v11, %v1795_v13  ;;  %v1862_v63 = vshll.u32 %v9623_v49, %v1850_v25  ;;  %v1865_v57 = vshll.u32 %v9624_v5, %v1850_v25  ;;  %v1702_v9 = vshrl.u32 %v1684_v14, %v1700_v2 }
 0x196   : > { %v1854_v15 = vshrl.u32 %v9621_v6, %v1851_v37  ;;  %v1857_v48 = vshrl.u32 %v9622_v40, %v1851_v37  ;;  %v1860_v8 = vshrl.u32 %v9623_v49, %v1851_v37  ;;  %v1863_v62 = vshrl.u32 %v9624_v5, %v1851_v37 }
 0x197   : > { %v1798_v34 = vsub.s32 0, %v7703_v54  ;;  %v1866_v11 = vshrl.u32 %v9625_v27, %v1851_v37  ;;  %v1706_v59 = vshll.u32 %v1705_v12, 23  ;;  %vm1868_vm14 = vcmp.lt.s32.totalorder %v1849_v51, 1 }
 0x198   : > { %v1855_v23 = vor.u32 %v1854_v15, %v1853_v22  ;;  %v1858_v42 = vor.u32 %v1857_v48, %v1856_v41  ;;  %v1861_v4 = vor.u32 %v1860_v8, %v1859_v17  ;;  %v1864_v13 = vor.u32 %v1863_v62, %v1862_v63 }
 0x199   : > { %v5841_v56 = vmin.u32 %v1798_v34, %v7703_v54  ;;  %v1867_v21 = vor.u32 %v1866_v11, %v1865_v57  ;;  %v1950_v60 = vadd.s32 1, %v5848_v58  ;;  %v1852_v46 = vshrl.u32 %v9620_v53, %v1851_v37 }
 0x19a   : > { %vm1870_vm1 = vcmp.lt.s32.totalorder %v1849_v51, 3  ;;  %vm1871_vm2 = vcmp.lt.s32.totalorder %v1849_v51, 4  ;;  %v1876_v25 = vsel %vm1868_vm14, %v1855_v23, %v1858_v42  ;;  %v1880_v41 = vsel %vm1868_vm14, %v1858_v42, %v1861_v4 }
 0x19b   : > { %v1800_v39 = vclz %v5841_v56  ;;  %v1873_v50 = vsel %vm1871_vm2, %v1861_v4, 2102212464  ;;  %v1877_v22 = vsel %vm1871_vm2, %v1864_v13, 920167782  ;;  %vm1869_vm4 = vcmp.lt.s32.totalorder %v1849_v51, 2 }
 0x19c   : > { %v1872_v15 = vsel %vm1868_vm14, %v1852_v46, %v1855_v23  ;;  %v1878_v14 = vsel %vm1870_vm1, %v1861_v4, %v1877_v22  ;;  %v1881_v2 = vsel %vm1871_vm2, %v1867_v21, 1326507024  ;;  %v1874_v48 = vsel %vm1870_vm1, %v1858_v42, %v1873_v50 }
 0x19d   : > { %v5842_v12 = vadd.s32 4294967294, %v1800_v39  ;;  %v1879_v17 = vsel %vm1869_vm4, %v1876_v25, %v1878_v14  ;;  %v1882_v8 = vsel %vm1870_vm1, %v1864_v13, %v1881_v2  ;;  %v7717_v63 = vor.u32 4788187, %v1706_v59 }
 0x19e   : > { %v1883_v37 = vsel %vm1869_vm4, %v1880_v41, %v1882_v8  ;;  %v7721_v58 = vmul.u32.u64.low %v7692_v61, %v1879_v17  ;;  %v7722_v62 = vmul.u32.u64.high %v7692_v61, %v1879_v17, %v7721_v58  ;;  %vm1951_vm6 = vcmp.gt.s32.totalorder %v1950_v60, 0 }
 0x19f   : > { %vm5843_vm5 = vcmp.lt.s32.totalorder %v5842_v12, 0  ;;  %v7726_v56 = vmul.u32.u64.low %v7692_v61, %v1883_v37  ;;  %v7727_v46 = vmul.u32.u64.high %v7692_v61, %v1883_v37, %v7726_v56  ;;  %v1701_v50 = vshll.u32 %v7639_v3, %v7674_v18 }
 0x1a0   : > { %v1803_v39 = vsel %vm5843_vm5, 0, %v5842_v12  ;;  %v1875_v21 = vsel %vm1869_vm4, %v1872_v15, %v1874_v48  ;;  %v1952_v57 = vsel %vm1951_vm6, %v1950_v60, 0  ;;  %v1788_v34 = vadd.s32 %v7643_v33, %v7649_v29 }
 0x1a1   : > { %v1804_v23 = vsub.s32 32, %v1803_v39  ;;  %v1808_v42 = vsub.s32 4294967266, %v1803_v39  ;;  %v9522_v11 = vand.u32 2147483647, %v7694_v20  ;;  %v7735_v59 = vor.u32 %v1702_v9, %v1701_v50 }
 0x1a2   : > { %v1894_v4 = vadd.s32 1, %v7722_v62  ;;  %v1954_v13 = vand.u32 31, %v1952_v57  ;;  %v7738_v25 = vshll.u32 %v1948_v1, 8  ;;  %v1708_v3 = vand.u32 2147483647, %v7717_v63 }
 0x1a3   : > { %v1809_v18 = vadd.s32 127, %v1808_v42  ;;  %v1891_v51 = vmul.u32 %v7692_v61, %v1875_v21  ;;  %vm1893_vm8 = vc.u32 %v7727_v46, %v7721_v58  ;;  %v1806_v29 = vshrl.u32 %v1788_v34, %v1804_v23 }
 0x1a4   : > { %v1895_v33 = vsel %vm1893_vm8, %v1894_v4, %v7722_v62  ;;  %v1955_v60 = vsub.s32 32, %v1954_v13  ;;  %v2047_v9 = vand.u32 2139095040, %v7694_v20  ;;  %v1957_v15 = vshll.u32 %v9620_v53, %v1954_v13 }
 0x1a5   : > { %v1810_v22 = vshll.u32 %v1809_v18, 23  ;;  %v1896_v41 = vadd.s32 %v1895_v33, %v1891_v51  ;;  %v1960_v1 = vshll.u32 %v9621_v6, %v1954_v13  ;;  %v1963_v61 = vshll.u32 %v9622_v40, %v1954_v13 }
 0x1a6   : > { %v1958_v14 = vshrl.u32 %v9621_v6, %v1955_v60  ;;  %v1961_v2 = vshrl.u32 %v9622_v40, %v1955_v60  ;;  %v1964_v12 = vshrl.u32 %v9623_v49, %v1955_v60  ;;  %v1805_v48 = vshll.u32 %v7703_v54, %v1803_v39 }
 0x1a7   : > { %v1897_v17 = vadd.s32 536870912, %v1896_v41  ;;  %v1953_v8 = vshrl.u32 %v1952_v57, 5  ;;  %v1966_v37 = vshll.u32 %v9623_v49, %v1954_v13  ;;  %v1967_v21 = vshrl.u32 %v9624_v5, %v1955_v60 }
 0x1a8   : > { %v1959_v62 = vor.u32 %v1958_v14, %v1957_v15  ;;  %v1962_v56 = vor.u32 %v1961_v2, %v1960_v1  ;;  %v1965_v50 = vor.u32 %v1964_v12, %v1963_v61  ;;  %v1969_v23 = vshll.u32 %v9624_v5, %v1954_v13 }
 0x1a9   : > { %v7755_v34 = vshrl.u32 %v1897_v17, 30  ;;  %v1970_v42 = vshrl.u32 %v9625_v27, %v1955_v60  ;;  %v7761_v4 = vand.u32 8388607, %v9522_v11  ;;  %vm9550_vm10 = vcmp.lt.s32.totalorder %v7204_v10, 0 }
 0x1aa   : > { %v1807_v54 = vor.u32 %v1806_v29, %v1805_v48  ;;  %v1811_v39 = vor.u32 4788187, %v1810_v22  ;;  %v1968_v57 = vor.u32 %v1967_v21, %v1966_v37  ;;  %v2048_v18 = vshrl.u32 %v2047_v9, 23 }
 0x1ab   : > { %9646 = vst [vmem:[#allocation24_spill] sm:$0xff] %v7755_v34  ;;  %v1899_v51 = vshll.u32 %v7755_v34, 30  ;;  %v1971_v33 = vor.u32 %v1970_v42, %v1969_v23  ;;  %vm1972_vm11 = vcmp.lt.s32.totalorder %v1953_v8, 1  ;;  %vm1975_vm14 = vcmp.lt.s32.totalorder %v1953_v8, 4 }
 0x1ac   : > { %vm1974_vm1 = vcmp.lt.s32.totalorder %v1953_v8, 3  ;;  %v1977_v15 = vsel %vm1975_vm14, %v1965_v50, 2102212464  ;;  %v1980_v13 = vsel %vm1972_vm11, %v1959_v62, %v1962_v56  ;;  %v1981_v1 = vsel %vm1975_vm14, %v1968_v57, 920167782 }
 0x1ad   : > { %vm9549_vm2 = vcmp.lt.s32.totalorder %v7335_v16, 0  ;;  %v7767_v14 = vsub.s32 %v1896_v41, %v1899_v51  ;;  %v1956_v2 = vshrl.u32 %v9620_v53, %v1955_v60  ;;  %vm1973_vm4 = vcmp.lt.s32.totalorder %v1953_v8, 2  ;;  %v429_v60 = vpop.permute.xlu1 %428 }
 0x1ae   : > { %v1982_v29 = vsel %vm1974_vm1, %v1965_v50, %v1981_v1  ;;  %vm9548_vm5 = vcmp.lt.s32.totalorder %v7383_v7, 0  ;;  %v1812_v9 = vand.u32 2147483647, %v1811_v39  ;;  %v1984_v61 = vsel %vm1972_vm11, %v1962_v56, %v1965_v50 }
 0x1af   : > { %v1983_v22 = vsel %vm1973_vm4, %v1980_v13, %v1982_v29  ;;  %v1985_v12 = vsel %vm1975_vm14, %v1971_v33, 1326507024  ;;  %v1902_v48 = vsub.s32 0, %v7767_v14  ;;  %v1976_v17 = vsel %vm1972_vm11, %v1956_v2, %v1959_v62  ;;  %v7794_v13 = vld [vmem:[%s9467_s2] ss:$0 sm:$0xff] }
 0x1b0   : > { %v1978_v41 = vsel %vm1974_vm1, %v1962_v56, %v1977_v15  ;;  %v1986_v37 = vsel %vm1974_vm1, %v1968_v57, %v1985_v12  ;;  %v7780_v23 = vmul.u32.u64.low %v7738_v25, %v1983_v22  ;;  %v7781_v42 = vmul.u32.u64.high %v7738_v25, %v1983_v22, %v7780_v23  ;;  %v536_v12 = vpop.permute.xlu0 %535 }
 0x1b1   : > { %v1987_v21 = vsel %vm1973_vm4, %v1984_v61, %v1986_v37  ;;  %v5852_v39 = vadd.s32 4294967169, %v2048_v18  ;;  %v1710_v50 = vcvt.s32.f32 %v7735_v59  ;;  %v5845_v51 = vmin.u32 %v1902_v48, %v7767_v14  ;;  %v434_v37 = vpop.permute.xlu1 %433 }
 0x1b2   : > { %v7787_v33 = vmul.u32.u64.low %v7738_v25, %v1987_v21  ;;  %v7788_v62 = vmul.u32.u64.high %v7738_v25, %v1987_v21, %v7787_v33  ;;  %v1814_v56 = vcvt.s32.f32 %v1807_v54  ;;  %v1979_v57 = vsel %vm1973_vm4, %v1976_v17, %v1978_v41  ;;  %v7835_v21 = vld [vmem:[%s9467_s2 + $0x1] ss:$0 sm:$0xff] }
 0x1b3   : > { %v2054_v15 = vadd.s32 1, %v5852_v39  ;;  %v465_v1 = vmul.f32 %v7794_v13, %v429_v60  ;;  %v9647_v59 = vxor.u32 2147483648, %v7661_v55  ;;  %v1608_v2 = vxor.u32 2147483648, %v7685_v36 }
 0x1b4   : > { %v7807_v8 = vmul.f32 %v1710_v50, %v1708_v3  ;;  %v1904_v54 = vclz %v5845_v51  ;;  %v7809_v29 = vmul.f32 %v1814_v56, %v1812_v9  ;;  %v1998_v22 = vadd.s32 1, %v7781_v42  ;;  %v540_v34 = vpop.permute.xlu0 %539 }
 0x1b5   : > { %v7802_v18 = vsel %vm9550_vm10, %v9647_v59, %v7661_v55  ;;  %v2052_v61 = vor.u32 8388608, %v7761_v4  ;;  %vm2055_vm6 = vcmp.gt.s32.totalorder %v2054_v15, 0  ;;  %v1995_v17 = vmul.u32 %v7738_v25, %v1979_v57 }
 0x1b6   : > { %9648 = vst [vmem:[#allocation25_spill] sm:$0xff] %v7802_v18  ;;  %v5846_v48 = vadd.s32 4294967294, %v1904_v54  ;;  %vm1997_vm8 = vc.u32 %v7788_v62, %v7780_v23  ;;  %v2056_v55 = vsel %vm2055_vm6, %v2054_v15, 0  ;;  %v9649_v63 = vxor.u32 2147483648, %v7670_v38 }
 0x1b7   : > { %v1999_v9 = vsel %vm1997_vm8, %v1998_v22, %v7781_v42  ;;  %v2058_v41 = vand.u32 31, %v2056_v55  ;;  %v7825_v4 = vadd.f32 %v7697_v30, %v465_v1  ;;  %v7830_v25 = vsel %vm9548_vm5, %v1608_v2, %v7685_v36 }
 0x1b8   : > { %v7821_v3 = vsel %vm9549_vm2, %v9649_v63, %v7670_v38  ;;  %9651 = vst [vmem:[#allocation27_spill] sm:$0xff] %v7830_v25  ;;  %vm5847_vm11 = vcmp.lt.s32.totalorder %v5846_v48, 0  ;;  %v2000_v60 = vadd.s32 %v1999_v9, %v1995_v17  ;;  %v7838_v38 = vmul.f32 %v7835_v21, %v536_v12  ;;  %v439_v25 = vpop.permute.xlu1 %438 }
 0x1b9   : > { %9650 = vst [vmem:[#allocation26_spill] sm:$0xff] %v7821_v3  ;;  %v1892_v39 = vadd.s32 %v7721_v58, %v7727_v46  ;;  %v2059_v50 = vsub.s32 32, %v2058_v41  ;;  %v7844_v36 = vsel %vm5847_vm11, 0, %v5846_v48  ;;  %v7846_v33 = vshll.u32 %v2052_v61, 8 }
 0x1ba   : > { %v2001_v51 = vadd.s32 536870912, %v2000_v60  ;;  %v466_v56 = vmul.f32 %v7794_v13, %v434_v37  ;;  %v2057_v57 = vshrl.u32 %v2056_v55, 5  ;;  %v2061_v54 = vshll.u32 %v9620_v53, %v2058_v41 }
 0x1bb   : > { %v2062_v15 = vshrl.u32 %v9621_v6, %v2059_v50  ;;  %v2065_v1 = vshrl.u32 %v9622_v40, %v2059_v50  ;;  %v2064_v58 = vshll.u32 %v9621_v6, %v2058_v41  ;;  %v2068_v46 = vshrl.u32 %v9623_v49, %v2059_v50 }
 0x1bc   : > { %v7852_v2 = vshrl.u32 %v2001_v51, 30  ;;  %v1912_v22 = vsub.s32 4294967266, %v7844_v36  ;;  %v2067_v61 = vshll.u32 %v9622_v40, %v2058_v41  ;;  %v2070_v12 = vshll.u32 %v9623_v49, %v2058_v41 }
 0x1bd   : > { %v2071_v48 = vshrl.u32 %v9624_v5, %v2059_v50  ;;  %v2063_v55 = vor.u32 %v2062_v15, %v2061_v54  ;;  %v2066_v63 = vor.u32 %v2065_v1, %v2064_v58  ;;  %v2151_v9 = vand.u32 2139095040, %v7825_v4 }
 0x1be   : > { %9652 = vst [vmem:[#allocation28_spill] sm:$0xff] %v7852_v2  ;;  %v2003_v17 = vshll.u32 %v7852_v2, 30  ;;  %vm9547_vm14 = vcmp.lt.s32.totalorder %v7458_v28, 0  ;;  %v2069_v37 = vor.u32 %v2068_v46, %v2067_v61  ;;  %v2073_v11 = vshll.u32 %v9624_v5, %v2058_v41 }
 0x1bf   : > { %v2072_v51 = vor.u32 %v2071_v48, %v2070_v12  ;;  %v2074_v30 = vshrl.u32 %v9625_v27, %v2059_v50  ;;  %vm9546_vm1 = vcmp.lt.s32.totalorder %v7515_v43, 0  ;;  %v1908_v42 = vsub.s32 32, %v7844_v36 }
 0x1c0   : > { %v1909_v59 = vshll.u32 %v7767_v14, %v7844_v36  ;;  %v7870_v2 = vsub.s32 %v2000_v60, %v2003_v17  ;;  %v9653_v15 = vand.u32 2147483647, %v7825_v4  ;;  %v1913_v54 = vadd.s32 127, %v1912_v22 }
 0x1c1   : > { %v2060_v58 = vshrl.u32 %v9620_v53, %v2059_v50  ;;  %v2075_v46 = vor.u32 %v2074_v30, %v2073_v11  ;;  %vm2076_vm4 = vcmp.lt.s32.totalorder %v2057_v57, 1  ;;  %vm2078_vm6 = vcmp.lt.s32.totalorder %v2057_v57, 3 }
 0x1c2   : > { %v7874_v1 = vand.u32 8388607, %v9653_v15  ;;  %v2006_v41 = vsub.s32 0, %v7870_v2  ;;  %vm2079_vm8 = vcmp.lt.s32.totalorder %v2057_v57, 4  ;;  %v2084_v61 = vsel %vm2076_vm4, %v2063_v55, %v2066_v63 }
 0x1c3   : > { %v2081_v12 = vsel %vm2079_vm8, %v2069_v37, 2102212464  ;;  %v2085_v48 = vsel %vm2079_vm8, %v2072_v51, 920167782  ;;  %v2088_v14 = vsel %vm2076_vm4, %v2066_v63, %v2069_v37  ;;  %v2089_v60 = vsel %vm2079_vm8, %v2075_v46, 1326507024 }
 0x1c4   : > { %v1910_v36 = vshrl.u32 %v1892_v39, %v1908_v42  ;;  %v5849_v17 = vmin.u32 %v2006_v41, %v7870_v2  ;;  %vm2077_vm11 = vcmp.lt.s32.totalorder %v2057_v57, 2  ;;  %v2086_v22 = vsel %vm2078_vm6, %v2069_v37, %v2085_v48 }
 0x1c5   : > { %v1914_v50 = vshll.u32 %v1913_v54, 23  ;;  %v2087_v11 = vsel %vm2077_vm11, %v2084_v61, %v2086_v22  ;;  %v2090_v30 = vsel %vm2078_vm6, %v2072_v51, %v2089_v60  ;;  %v2152_v15 = vshrl.u32 %v2151_v9, 23 }
 0x1c6   : > { %v2008_v7 = vclz %v5849_v17  ;;  %v2080_v3 = vsel %vm2076_vm4, %v2060_v58, %v2063_v55  ;;  %v2082_v16 = vsel %vm2078_vm6, %v2066_v63, %v2081_v12  ;;  %v2091_v42 = vsel %vm2077_vm11, %v2088_v14, %v2090_v30 }
 0x1c7   : > { %v7888_v39 = vmul.u32.u64.low %v7846_v33, %v2091_v42  ;;  %v7889_v46 = vmul.u32.u64.high %v7846_v33, %v2091_v42, %v7888_v39  ;;  %v7892_v37 = vmul.u32.u64.low %v7846_v33, %v2087_v11  ;;  %v7893_v54 = vmul.u32.u64.high %v7846_v33, %v2087_v11, %v7892_v37 }
 0x1c8   : > { %v9654_v9 = vxor.u32 2147483648, %v7807_v8  ;;  %v5850_v55 = vadd.s32 4294967294, %v2008_v7  ;;  %v5856_v63 = vadd.s32 4294967169, %v2152_v15  ;;  %v7904_v58 = vadd.f32 %v7838_v38, %v466_v56  ;;  %v4522_v7 = vld [vmem:[%s9469_s4] sm:$0xff] }
 0x1c9   : > { %v9656_v41 = vxor.u32 2147483648, %v7809_v29  ;;  %v7913_v12 = vor.u32 %v1910_v36, %v1909_v59  ;;  %v2083_v48 = vsel %vm2077_vm11, %v2080_v3, %v2082_v16  ;;  %v567_v14 = vmul.f32 %v7835_v21, %v540_v34  ;;  %v544_v16 = vpop.permute.xlu0 %543  ;;  %v444_v3 = vpop.permute.xlu1 %443 }
 0x1ca   : > { %v7901_v51 = vsel %vm9547_vm14, %v9654_v9, %v7807_v8  ;;  %v7920_v8 = vor.u32 4788187, %v1914_v50  ;;  %vm5851_vm4 = vcmp.lt.s32.totalorder %v5850_v55, 0  ;;  %v2158_v38 = vadd.s32 1, %v5856_v63 }
 0x1cb   : > { %9655 = vst [vmem:[#allocation29_spill] sm:$0xff] %v7901_v51  ;;  %v7911_v61 = vsel %vm9546_vm1, %v9656_v41, %v7809_v29  ;;  %v7922_v56 = vsel %vm5851_vm4, 0, %v5850_v55  ;;  %vm2101_vm6 = vc.u32 %v7889_v46, %v7892_v37  ;;  %v2102_v29 = vadd.s32 1, %v7893_v54 }
 0x1cc   : > { %9657 = vst [vmem:[#allocation30_spill] sm:$0xff] %v7911_v61  ;;  %v2156_v57 = vor.u32 8388608, %v7874_v1  ;;  %v9532_v34 = vmov 0.0   ;;  %v2099_v59 = vmul.u32 %v7846_v33, %v2083_v48  ;;  %vm2159_vm8 = vcmp.gt.s32.totalorder %v2158_v38, 0 }
 0x1cd   : > { %6154 = vmatprep.subr.mxu0 %v9532_v34  ;;  %6485 = vmatprep.subr.mxu1 %v9532_v34  ;;  %v9531_v60 = vand.u32 2147483647, %v7904_v58  ;;  %v467_v36 = vmul.f32 %v7794_v13, %v439_v25  ;;  %v2016_v17 = vsub.s32 4294967266, %v7922_v56  ;;  %v2103_v1 = vsel %vm2101_vm6, %v2102_v29, %v7893_v54 }
 0x1ce   : > { %6155 = vmatpush3.msra.mxu0 %v4522_v7  ;;  %6486 = vmatpush3.msra.mxu1 %v4522_v7  ;;  %v2160_v22 = vsel %vm2159_vm8, %v2158_v38, 0  ;;  %v2255_v50 = vand.u32 2139095040, %v7904_v58  ;;  %v1996_v11 = vadd.s32 %v7780_v23, %v7788_v62  ;;  %v2104_v33 = vadd.s32 %v2103_v1, %v2099_v59 }
 0x1cf   : > { %6213 = vmatprep.subr.mxu0 %v9532_v34  ;;  %v7940_v30 = vmul.f32 %v7835_v21, %v544_v16  ;;  %v7943_v25 = vmul.f32 %v7794_v13, %v444_v3  ;;  %v1916_v15 = vand.u32 2147483647, %v7920_v8  ;;  %v1918_v42 = vcvt.s32.f32 %v7913_v12 }
 0x1d0   : > { %v2162_v39 = vand.u32 31, %v2160_v22  ;;  %v7947_v54 = vshll.u32 %v2156_v57, 8  ;;  %v2012_v9 = vsub.s32 32, %v7922_v56  ;;  %v2013_v55 = vshll.u32 %v7870_v2, %v7922_v56 }
 0x1d1   : > { %v2105_v23 = vadd.s32 536870912, %v2104_v33  ;;  %v7952_v62 = vadd.f32 %v567_v14, %v467_v36  ;;  %v2017_v21 = vadd.s32 127, %v2016_v17  ;;  %v2256_v41 = vshrl.u32 %v2255_v50, 23 }
 0x1d2   : > { %v2163_v63 = vsub.s32 32, %v2162_v39  ;;  %v7956_v13 = vand.u32 8388607, %v9531_v60  ;;  %v2161_v12 = vshrl.u32 %v2160_v22, 5  ;;  %v2165_v7 = vshll.u32 %v9620_v53, %v2162_v39 }
 0x1d3   : > { %v7958_v48 = vshrl.u32 %v2105_v23, 30  ;;  %v2168_v8 = vshll.u32 %v9621_v6, %v2162_v39  ;;  %v2171_v14 = vshll.u32 %v9622_v40, %v2162_v39  ;;  %v2174_v57 = vshll.u32 %v9623_v49, %v2162_v39 }
 0x1d4   : > { %v2166_v38 = vshrl.u32 %v9621_v6, %v2163_v63  ;;  %v2169_v2 = vshrl.u32 %v9622_v40, %v2163_v63  ;;  %v2172_v56 = vshrl.u32 %v9623_v49, %v2163_v63  ;;  %v2175_v16 = vshrl.u32 %v9624_v5, %v2163_v63 }
 0x1d5   : > { %9658 = vst [vmem:[#allocation31_spill] sm:$0xff] %v7958_v48  ;;  %v2107_v29 = vshll.u32 %v7958_v48, 30  ;;  %v2177_v3 = vshll.u32 %v9624_v5, %v2162_v39  ;;  %v2178_v1 = vshrl.u32 %v9625_v27, %v2163_v63  ;;  %v2014_v22 = vshrl.u32 %v1996_v11, %v2012_v9 }
 0x1d6   : > { %v2167_v59 = vor.u32 %v2166_v38, %v2165_v7  ;;  %v2170_v36 = vor.u32 %v2169_v2, %v2168_v8  ;;  %v2173_v17 = vor.u32 %v2172_v56, %v2171_v14  ;;  %v2176_v23 = vor.u32 %v2175_v16, %v2174_v57 }
 0x1d7   : > { %v7971_v50 = vsub.s32 %v2104_v33, %v2107_v29  ;;  %v5860_v60 = vadd.s32 4294967169, %v2256_v41  ;;  %v2018_v34 = vshll.u32 %v2017_v21, 23  ;;  %v2179_v61 = vor.u32 %v2178_v1, %v2177_v3 }
 0x1d8   : > { %vm2180_vm11 = vcmp.lt.s32.totalorder %v2161_v12, 1  ;;  %vm2183_vm4 = vcmp.lt.s32.totalorder %v2161_v12, 4  ;;  %v2164_v43 = vshrl.u32 %v9620_v53, %v2163_v63  ;;  %vm2182_vm6 = vcmp.lt.s32.totalorder %v2161_v12, 3 }
 0x1d9   : > { %v2110_v48 = vsub.s32 0, %v7971_v50  ;;  %v2185_v51 = vsel %vm2183_vm4, %v2173_v17, 2102212464  ;;  %v2188_v39 = vsel %vm2180_vm11, %v2167_v59, %v2170_v36  ;;  %v2189_v7 = vsel %vm2183_vm4, %v2176_v23, 920167782 }
 0x1da   : > { %v2192_v8 = vsel %vm2180_vm11, %v2170_v36, %v2173_v17  ;;  %v2193_v38 = vsel %vm2183_vm4, %v2179_v61, 1326507024  ;;  %vm2181_vm8 = vcmp.lt.s32.totalorder %v2161_v12, 2  ;;  %v2184_v33 = vsel %vm2180_vm11, %v2164_v43, %v2167_v59 }
 0x1db   : > { %v5853_v11 = vmin.u32 %v2110_v48, %v7971_v50  ;;  %v2190_v9 = vsel %vm2182_vm6, %v2173_v17, %v2189_v7  ;;  %v2186_v41 = vsel %vm2182_vm6, %v2170_v36, %v2185_v51  ;;  %v2194_v2 = vsel %vm2182_vm6, %v2176_v23, %v2193_v38 }
 0x1dc   : > { %v2191_v21 = vsel %vm2181_vm8, %v2188_v39, %v2190_v9  ;;  %v2262_v14 = vadd.s32 1, %v5860_v60  ;;  %v2195_v29 = vsel %vm2181_vm8, %v2192_v8, %v2194_v2  ;;  %v7981_v16 = vmul.f32 %v1918_v42, %v1916_v15 }
 0x1dd   : > { %v2112_v56 = vclz %v5853_v11  ;;  %v7977_v57 = vmul.u32.u64.low %v7947_v54, %v2191_v21  ;;  %v7978_v63 = vmul.u32.u64.high %v7947_v54, %v2191_v21, %v7977_v57  ;;  %v7987_v43 = vor.u32 %v2014_v22, %v2013_v55 }
 0x1de   : > { %v7984_v61 = vmul.u32.u64.low %v7947_v54, %v2195_v29  ;;  %v7985_v3 = vmul.u32.u64.high %v7947_v54, %v2195_v29, %v7984_v61  ;;  %vm2263_vm4 = vcmp.gt.s32.totalorder %v2262_v14, 0  ;;  %v2187_v48 = vsel %vm2181_vm8, %v2184_v33, %v2186_v41 }
 0x1df   : > { %v5854_v51 = vadd.s32 4294967294, %v2112_v56  ;;  %v2264_v12 = vsel %vm2263_vm4, %v2262_v14, 0  ;;  %v7989_v60 = vor.u32 4788187, %v2018_v34  ;;  %v2260_v59 = vor.u32 8388608, %v7956_v13 }
 0x1e0   : > { %v2266_v36 = vand.u32 31, %v2264_v12  ;;  %v7994_v17 = vadd.f32 %v7940_v30, %v7943_v25  ;;  %v2100_v15 = vadd.s32 %v7892_v37, %v7889_v46  ;;  %v2206_v42 = vadd.s32 1, %v7978_v63 }
 0x1e1   : > { %vm5855_vm11 = vcmp.lt.s32.totalorder %v5854_v51, 0  ;;  %v9539_v55 = vand.u32 2147483647, %v7952_v62  ;;  %v2203_v22 = vmul.u32 %v7947_v54, %v2187_v48  ;;  %vm2205_vm6 = vc.u32 %v7985_v3, %v7977_v57 }
 0x1e2   : > { %9659 = vst [vmem:[#allocation32_spill] sm:$0xff] %v7994_v17  ;;  %v2115_v1 = vsel %vm5855_vm11, 0, %v5854_v51  ;;  %v2267_v34 = vsub.s32 32, %v2266_v36  ;;  %v2022_v13 = vcvt.s32.f32 %v7987_v43  ;;  %v2207_v30 = vsel %vm2205_vm6, %v2206_v42, %v7978_v63 }
 0x1e3   : > { %v2120_v23 = vsub.s32 4294967266, %v2115_v1  ;;  %v2359_v25 = vand.u32 2139095040, %v7952_v62  ;;  %v2020_v46 = vand.u32 2147483647, %v7989_v60  ;;  %v2208_v37 = vadd.s32 %v2207_v30, %v2203_v22 }
 0x1e4   : > { %v2270_v39 = vshrl.u32 %v9621_v6, %v2267_v34  ;;  %v8008_v7 = vshll.u32 %v2260_v59, 8  ;;  %v2269_v54 = vshll.u32 %v9620_v53, %v2266_v36  ;;  %v2272_v38 = vshll.u32 %v9621_v6, %v2266_v36 }
 0x1e5   : > { %v2121_v8 = vadd.s32 127, %v2120_v23  ;;  %v2273_v11 = vshrl.u32 %v9622_v40, %v2267_v34  ;;  %v2116_v33 = vsub.s32 32, %v2115_v1  ;;  %v2209_v9 = vadd.s32 536870912, %v2208_v37 }
 0x1e6   : > { %v2275_v41 = vshll.u32 %v9622_v40, %v2266_v36  ;;  %v2276_v21 = vshrl.u32 %v9623_v49, %v2267_v34  ;;  %v2265_v2 = vshrl.u32 %v2264_v12, 5  ;;  %v2271_v14 = vor.u32 %v2270_v39, %v2269_v54 }
 0x1e7   : > { %v2274_v56 = vor.u32 %v2273_v11, %v2272_v38  ;;  %v2360_v29 = vshrl.u32 %v2359_v25, 23  ;;  %v8015_v63 = vshrl.u32 %v2209_v9, 30  ;;  %v2278_v43 = vshll.u32 %v9623_v49, %v2266_v36 }
 0x1e8   : > { %v2277_v61 = vor.u32 %v2276_v21, %v2275_v41  ;;  %v2279_v51 = vshrl.u32 %v9624_v5, %v2267_v34  ;;  %v2117_v48 = vshll.u32 %v7971_v50, %v2115_v1  ;;  %v2122_v60 = vshll.u32 %v2121_v8, 23 }
 0x1e9   : > { %9660 = vst [vmem:[#allocation33_spill] sm:$0xff] %v8015_v63  ;;  %v2281_v59 = vshll.u32 %v9624_v5, %v2266_v36  ;;  %v2282_v42 = vshrl.u32 %v9625_v27, %v2267_v34  ;;  %v2118_v22 = vshrl.u32 %v2100_v15, %v2116_v33  ;;  %v2211_v12 = vshll.u32 %v8015_v63, 30 }
 0x1ea   : > { %v2268_v23 = vshrl.u32 %v9620_v53, %v2267_v34  ;;  %v2280_v30 = vor.u32 %v2279_v51, %v2278_v43  ;;  %vm2284_vm8 = vcmp.lt.s32.totalorder %v2265_v2, 1  ;;  %vm2286_vm4 = vcmp.lt.s32.totalorder %v2265_v2, 3 }
 0x1eb   : > { %v2283_v25 = vor.u32 %v2282_v42, %v2281_v59  ;;  %vm2287_vm11 = vcmp.lt.s32.totalorder %v2265_v2, 4  ;;  %v8024_v39 = vsub.s32 %v2208_v37, %v2211_v12  ;;  %v2292_v38 = vsel %vm2284_vm8, %v2271_v14, %v2274_v56 }
 0x1ec   : > { %v2289_v54 = vsel %vm2287_vm11, %v2277_v61, 2102212464  ;;  %v2293_v50 = vsel %vm2287_vm11, %v2280_v30, 920167782  ;;  %v2123_v1 = vor.u32 4788187, %v2122_v60  ;;  %v2296_v8 = vsel %vm2284_vm8, %v2274_v56, %v2277_v61 }
 0x1ed   : > { %vm2285_vm6 = vcmp.lt.s32.totalorder %v2265_v2, 2  ;;  %v2294_v36 = vsel %vm2286_vm4, %v2277_v61, %v2293_v50  ;;  %v2214_v15 = vsub.s32 0, %v8024_v39  ;;  %v2288_v11 = vsel %vm2284_vm8, %v2268_v23, %v2271_v14 }
 0x1ee   : > { %v2295_v33 = vsel %vm2285_vm6, %v2292_v38, %v2294_v36  ;;  %v2297_v34 = vsel %vm2287_vm11, %v2283_v25, 1326507024  ;;  %v2290_v9 = vsel %vm2286_vm4, %v2274_v56, %v2289_v54  ;;  %v2119_v37 = vor.u32 %v2118_v22, %v2117_v48 }
 0x1ef   : > { %v2298_v41 = vsel %vm2286_vm4, %v2280_v30, %v2297_v34  ;;  %v8029_v21 = vmul.u32.u64.low %v8008_v7, %v2295_v33  ;;  %v8030_v43 = vmul.u32.u64.high %v8008_v7, %v2295_v33, %v8029_v21  ;;  %v5857_v51 = vmin.u32 %v2214_v15, %v8024_v39 }
 0x1f0   : > { %v2299_v60 = vsel %vm2285_vm6, %v2296_v8, %v2298_v41  ;;  %v5864_v59 = vadd.s32 4294967169, %v2360_v29  ;;  %v2363_v56 = vand.u32 8388607, %v9539_v55  ;;  %v8042_v12 = vmul.f32 %v2022_v13, %v2020_v46 }
 0x1f1   : > { %v8037_v14 = vmul.u32.u64.low %v8008_v7, %v2299_v60  ;;  %v8038_v42 = vmul.u32.u64.high %v8008_v7, %v2299_v60, %v8037_v14  ;;  %v2216_v23 = vclz %v5857_v51  ;;  %v2291_v30 = vsel %vm2285_vm6, %v2288_v11, %v2290_v9 }
 0x1f2   : > { %v2366_v48 = vadd.s32 1, %v5864_v59  ;;  %v2124_v22 = vand.u32 2147483647, %v2123_v1  ;;  %v2310_v25 = vadd.s32 1, %v8030_v43  ;;  %v9538_v29 = vand.u32 2147483647, %v7994_v17 }
 0x1f3   : > { %v2126_v54 = vcvt.s32.f32 %v2119_v37  ;;  %v5858_v38 = vadd.s32 4294967294, %v2216_v23  ;;  %v2463_v50 = vand.u32 2139095040, %v7994_v17  ;;  %vm6751_vm4 = vmmov 0  }
 0x1f4   : > { %vm2367_vm8 = vcmp.gt.s32.totalorder %v2366_v48, 0  ;;  %v9661_v36 = vmov 0.0   ;;  %v2307_v13 = vmul.u32 %v8008_v7, %v2291_v30  ;;  %vm2309_vm11 = vc.u32 %v8038_v42, %v8029_v21 }
 0x1f5   : > { %6156 = vmatprep.mubr.msk.f32.mxu0 %vm6751_vm4, %v9661_v36  ;;  %6186 = vmatprep.mubr.msk.f32.mxu1 %vm6751_vm4, %v9661_v36  ;;  %v2364_v46 = vor.u32 8388608, %v2363_v56  ;;  %v2368_v2 = vsel %vm2367_vm8, %v2366_v48, 0  ;;  %vm5859_vm6 = vcmp.lt.s32.totalorder %v5858_v38, 0  ;;  %v2311_v8 = vsel %vm2309_vm11, %v2310_v25, %v8030_v43 }
 0x1f6   : > { %v2370_v15 = vand.u32 31, %v2368_v2  ;;  %v8057_v11 = vmul.f32 %v2126_v54, %v2124_v22  ;;  %v2204_v33 = vadd.s32 %v7977_v57, %v7985_v3  ;;  %v2219_v34 = vsel %vm5859_vm6, 0, %v5858_v38 }
 0x1f7   : > { %v2312_v9 = vadd.s32 %v2311_v8, %v2307_v13  ;;  %v2224_v41 = vsub.s32 4294967266, %v2219_v34  ;;  %v2464_v37 = vshrl.u32 %v2463_v50, 23  ;;  %v8063_v51 = vand.u32 8388607, %v9538_v29 }
 0x1f8   : > { %v2371_v7 = vsub.s32 32, %v2370_v15  ;;  %v2220_v60 = vsub.s32 32, %v2219_v34  ;;  %v8065_v14 = vshll.u32 %v2364_v46, 8  ;;  %v674_v43 = vsub.s32 4, %v6980_v26 }
 0x1f9   : > { %v2313_v59 = vadd.s32 536870912, %v2312_v9  ;;  %v2225_v56 = vadd.s32 127, %v2224_v41  ;;  %v2373_v23 = vshll.u32 %v9620_v53, %v2370_v15  ;;  %v2376_v3 = vshll.u32 %v9621_v6, %v2370_v15 }
 0x1fa   : > { %v2374_v57 = vshrl.u32 %v9621_v6, %v2371_v7  ;;  %v2377_v48 = vshrl.u32 %v9622_v40, %v2371_v7  ;;  %v2379_v22 = vshll.u32 %v9622_v40, %v2370_v15  ;;  %v2380_v25 = vshrl.u32 %v9623_v49, %v2371_v7 }
 0x1fb   : > { %v8071_v30 = vshrl.u32 %v2313_v59, 30  ;;  %v2369_v54 = vshrl.u32 %v2368_v2, 5  ;;  %v2382_v38 = vshll.u32 %v9623_v49, %v2370_v15  ;;  %v2383_v50 = vshrl.u32 %v9624_v5, %v2371_v7 }
 0x1fc   : > { %v5868_v13 = vadd.s32 4294967169, %v2464_v37  ;;  %v2375_v8 = vor.u32 %v2374_v57, %v2373_v23  ;;  %v2378_v41 = vor.u32 %v2377_v48, %v2376_v3  ;;  %v2381_v29 = vor.u32 %v2380_v25, %v2379_v22 }
 0x1fd   : > { %v2315_v46 = vshll.u32 %v8071_v30, 30  ;;  %v2226_v55 = vshll.u32 %v2225_v56, 23  ;;  %v2384_v59 = vor.u32 %v2383_v50, %v2382_v38  ;;  %v2385_v1 = vshll.u32 %v9624_v5, %v2370_v15 }
 0x1fe   : > { %v2386_v61 = vshrl.u32 %v9625_v27, %v2371_v7  ;;  %v2221_v63 = vshll.u32 %v8024_v39, %v2219_v34  ;;  %v2222_v28 = vshrl.u32 %v2204_v33, %v2220_v60  ;;  %v2372_v18 = vshrl.u32 %v9620_v53, %v2371_v7 }
 0x1ff   : > { %v8082_v2 = vsub.s32 %v2312_v9, %v2315_v46  ;;  %vm2388_vm8 = vcmp.lt.s32.totalorder %v2369_v54, 1  ;;  %vm2390_vm11 = vcmp.lt.s32.totalorder %v2369_v54, 3  ;;  %vm2391_vm6 = vcmp.lt.s32.totalorder %v2369_v54, 4 }
 0x200   : > { %v2387_v10 = vor.u32 %v2386_v61, %v2385_v1  ;;  %v2393_v23 = vsel %vm2391_vm6, %v2381_v29, 2102212464  ;;  %v2396_v56 = vsel %vm2388_vm8, %v2375_v8, %v2378_v41  ;;  %v2397_v57 = vsel %vm2391_vm6, %v2384_v59, 920167782 }
 0x201   : > { %v2318_v37 = vsub.s32 0, %v8082_v2  ;;  %v2227_v3 = vor.u32 4788187, %v2226_v55  ;;  %vm2389_vm1 = vcmp.lt.s32.totalorder %v2369_v54, 2  ;;  %v2398_v15 = vsel %vm2390_vm11, %v2381_v29, %v2397_v57 }
 0x202   : > { %v2400_v48 = vsel %vm2388_vm8, %v2378_v41, %v2381_v29  ;;  %v2392_v33 = vsel %vm2388_vm8, %v2372_v18, %v2375_v8  ;;  %v2399_v34 = vsel %vm2389_vm1, %v2396_v56, %v2398_v15  ;;  %v2401_v9 = vsel %vm2391_vm6, %v2387_v10, 1326507024 }
 0x203   : > { %v5861_v39 = vmin.u32 %v2318_v37, %v8082_v2  ;;  %v2394_v7 = vsel %vm2390_vm11, %v2378_v41, %v2393_v23  ;;  %v2402_v61 = vsel %vm2390_vm11, %v2384_v59, %v2401_v9  ;;  %v2223_v22 = vor.u32 %v2222_v28, %v2221_v63 }
 0x204   : > { %v8089_v1 = vmul.u32.u64.low %v8065_v14, %v2399_v34  ;;  %v8090_v60 = vmul.u32.u64.high %v8065_v14, %v2399_v34, %v8089_v1  ;;  %v2403_v38 = vsel %vm2389_vm1, %v2400_v48, %v2402_v61  ;;  %v2470_v55 = vadd.s32 1, %v5868_v13 }
 0x205   : > { %v2320_v25 = vclz %v5861_v39  ;;  %v2128_v50 = vxor.u32 2147483648, %v8057_v11  ;;  %v8095_v29 = vmul.u32.u64.low %v8065_v14, %v2403_v38  ;;  %v8096_v46 = vmul.u32.u64.high %v8065_v14, %v2403_v38, %v8095_v29 }
 0x206   : > { %v2468_v18 = vor.u32 8388608, %v8063_v51  ;;  %v2228_v10 = vand.u32 2147483647, %v2227_v3  ;;  %v2395_v41 = vsel %vm2389_vm1, %v2392_v33, %v2394_v7  ;;  %vm2471_vm8 = vcmp.gt.s32.totalorder %v2470_v55, 0 }
 0x207   : > { %v5862_v8 = vadd.s32 4294967294, %v2320_v25  ;;  %v2414_v59 = vadd.s32 1, %v8090_v60  ;;  %v2472_v28 = vsel %vm2471_vm8, %v2470_v55, 0  ;;  %v9662_v63 = vand.u32 2147483647, %v6849_v32 }
 0x208   : > { %v675_v13 = vsel %vm590_vm9, %v674_v43, %v6980_v26  ;;  %v2230_v37 = vcvt.s32.f32 %v2223_v22  ;;  %v2474_v23 = vand.u32 31, %v2472_v28  ;;  %v2308_v54 = vadd.s32 %v8029_v21, %v8038_v42 }
 0x209   : > { %vm589_vm11 = vcmp.le.f32.partialorder %v9662_v63, 0.7853982  ;;  %vm5863_vm6 = vcmp.lt.s32.totalorder %v5862_v8, 0  ;;  %v2411_v57 = vmul.u32 %v8065_v14, %v2395_v41  ;;  %vm2413_vm1 = vc.u32 %v8096_v46, %v8089_v1 }
 0x20a   : > { %v676_v51 = vsel %vm589_vm11, %v6849_v32, %v7224_v19  ;;  %v8110_v56 = vsel %vm5863_vm6, 0, %v5862_v8  ;;  %v8114_v3 = vmul.f32 %v2230_v37, %v2228_v10  ;;  %v2415_v15 = vsel %vm2413_vm1, %v2414_v59, %v8090_v60 }
 0x20b   : > { %v8117_v26 = vshll.u32 %v2468_v18, 8  ;;  %v677_v43 = vsel %vm589_vm11, 0, %v675_v13  ;;  %v2416_v48 = vadd.s32 %v2415_v15, %v2411_v57  ;;  %v2473_v39 = vshrl.u32 %v2472_v28, 5 }
 0x20c   : > { %v2475_v33 = vsub.s32 32, %v2474_v23  ;;  %6654 = vcosq.f32 %v676_v51  ;;  %v2328_v19 = vsub.s32 4294967266, %v8110_v56  ;;  %v8121_v21 = vadd.s32 %v8089_v1, %v8096_v46 }
 0x20d   : > { %v2477_v42 = vshll.u32 %v9620_v53, %v2474_v23  ;;  %6656 = vsinq.f32 %v676_v51  ;;  %v2417_v14 = vadd.s32 536870912, %v2416_v48  ;;  %v2480_v9 = vshll.u32 %v9621_v6, %v2474_v23 }
 0x20e   : > { %v2478_v34 = vshrl.u32 %v9621_v6, %v2475_v33  ;;  %v2481_v7 = vshrl.u32 %v9622_v40, %v2475_v33  ;;  %v2483_v61 = vshll.u32 %v9622_v40, %v2474_v23  ;;  %v2484_v60 = vshrl.u32 %v9623_v49, %v2475_v33 }
 0x20f   : > { %v2486_v22 = vshll.u32 %v9623_v49, %v2474_v23  ;;  %v2487_v25 = vshrl.u32 %v9624_v5, %v2475_v33  ;;  %v8131_v1 = vshrl.u32 %v2417_v14, 30  ;;  %v681_v29 = vadd.s32 3, %v677_v43 }
 0x210   : > { %v2479_v38 = vor.u32 %v2478_v34, %v2477_v42  ;;  %v2482_v55 = vor.u32 %v2481_v7, %v2480_v9  ;;  %v2324_v46 = vsub.s32 32, %v8110_v56  ;;  %v2325_v6 = vshll.u32 %v8082_v2, %v8110_v56 }
 0x211   : > { %v2485_v18 = vor.u32 %v2484_v60, %v2483_v61  ;;  %v2488_v10 = vor.u32 %v2487_v25, %v2486_v22  ;;  %v2329_v8 = vadd.s32 127, %v2328_v19  ;;  %v2419_v40 = vshll.u32 %v8131_v1, 30 }
 0x212   : > { %v2489_v41 = vshll.u32 %v9624_v5, %v2474_v23  ;;  %v2490_v49 = vshrl.u32 %v9625_v27, %v2475_v33  ;;  %v2476_v59 = vshrl.u32 %v9620_v53, %v2475_v33  ;;  %vm2492_vm9 = vcmp.lt.s32.totalorder %v2473_v39, 1 }
 0x213   : > { %vm2493_vm8 = vcmp.lt.s32.totalorder %v2473_v39, 2  ;;  %vm2495_vm11 = vcmp.lt.s32.totalorder %v2473_v39, 4  ;;  %v8140_v28 = vsub.s32 %v2416_v48, %v2419_v40  ;;  %v2500_v37 = vsel %vm2492_vm9, %v2479_v38, %v2482_v55 }
 0x214   : > { %v2491_v63 = vor.u32 %v2490_v49, %v2489_v41  ;;  %v2497_v13 = vsel %vm2495_vm11, %v2485_v18, 2102212464  ;;  %vm2494_vm6 = vcmp.lt.s32.totalorder %v2473_v39, 3  ;;  %v2496_v2 = vsel %vm2492_vm9, %v2476_v59, %v2479_v38 }
 0x215   : > { %v2501_v51 = vsel %vm2495_vm11, %v2488_v10, 920167782  ;;  %v2504_v56 = vsel %vm2492_vm9, %v2482_v55, %v2485_v18  ;;  %v2422_v15 = vsub.s32 0, %v8140_v28  ;;  %v2498_v5 = vsel %vm2494_vm6, %v2482_v55, %v2497_v13 }
 0x216   : > { %v6655_v57 = vpop.eup %6654  ;;  %v2502_v23 = vsel %vm2494_vm6, %v2485_v18, %v2501_v51  ;;  %v2505_v27 = vsel %vm2495_vm11, %v2491_v63, 1326507024  ;;  %v2326_v53 = vshrl.u32 %v2308_v54, %v2324_v46  ;;  %v2330_v33 = vshll.u32 %v2329_v8, 23 }
 0x217   : > { %v6657_v19 = vpop.eup %6656  ;;  %v2503_v42 = vsel %vm2493_vm8, %v2500_v37, %v2502_v23  ;;  %v2506_v48 = vsel %vm2494_vm6, %v2488_v10, %v2505_v27  ;;  %v5865_v14 = vmin.u32 %v2422_v15, %v8140_v28  ;;  %v2499_v61 = vsel %vm2493_vm8, %v2496_v2, %v2498_v5 }
 0x218   : > { %v2507_v34 = vsel %vm2493_vm8, %v2504_v56, %v2506_v48  ;;  %v8147_v9 = vmul.u32.u64.low %v8117_v26, %v2503_v42  ;;  %v8148_v7 = vmul.u32.u64.high %v8117_v26, %v2503_v42, %v8147_v9  ;;  %vm680_vm1 = vweird.f32 %v6849_v32  ;;  %v2564_v56 = vld [vmem:[%s9468_s3] sm:$0xff] }
 0x219   : > { %v8153_v60 = vmul.u32.u64.low %v8117_v26, %v2507_v34  ;;  %v8154_v22 = vmul.u32.u64.high %v8117_v26, %v2507_v34, %v8153_v60  ;;  %v682_v54 = vand.u32 3, %v681_v29  ;;  %v2424_v25 = vclz %v5865_v14 }
 0x21a   : > { %v685_v38 = vxor.u32 2147483648, %v6657_v19  ;;  %v688_v55 = vxor.u32 2147483648, %v6655_v57  ;;  %v2658_v46 = vand.u32 3, %v677_v43  ;;  %v2327_v18 = vor.u32 %v2326_v53, %v2325_v6 }
 0x21b   : > { %vm683_vm9 = vcmp.lt.s32.totalorder %v682_v54, 2  ;;  %vm684_vm11 = vcmp.eq.s32.totalorder %v682_v54, 0  ;;  %vm687_vm6 = vcmp.eq.s32.totalorder %v682_v54, 2  ;;  %vm1838_vm14 = vcmp.lt.s32.totalorder %v7619_v24, 0 }
 0x21c   : > { %v5866_v10 = vadd.s32 4294967294, %v2424_v25  ;;  %v2518_v39 = vadd.s32 1, %v8148_v7  ;;  %v686_v8 = vsel %vm684_vm11, %v6655_v57, %v685_v38  ;;  %v689_v40 = vsel %vm687_vm6, %v688_v55, %v6657_v19 }
 0x21d   : > { %vm1942_vm8 = vcmp.lt.s32.totalorder %v7655_v44, 0  ;;  %v2331_v41 = vor.u32 4788187, %v2330_v33  ;;  %v2515_v29 = vmul.u32 %v8117_v26, %v2499_v61  ;;  %vm2517_vm5 = vc.u32 %v8154_v22, %v8147_v9 }
 0x21e   : > { %v8163_v43 = vsel %vm683_vm9, %v686_v8, %v689_v40  ;;  %vm9562_vm2 = vcmp.lt.s32.totalorder %v7694_v20, 0  ;;  %vm9554_vm10 = vcmp.lt.s32.totalorder %v7825_v4, 0  ;;  %vm5867_vm15 = vcmp.lt.s32.totalorder %v5866_v10, 0 }
 0x21f   : > { %v2519_v6 = vsel %vm2517_vm5, %v2518_v39, %v8148_v7  ;;  %vm2660_vm12 = vcmp.eq.s32.totalorder %v2658_v46, 0  ;;  %vm4523_vm11 = vcmask 64512   ;;  %v2427_v49 = vsel %vm5867_vm15, 0, %v5866_v10 }
 0x220   : > { %v2520_v59 = vadd.s32 %v2519_v6, %v2515_v29  ;;  %v2662_v63 = vsel %vm2660_vm12, %v6655_v57, %v685_v38  ;;  %vm2663_vm6 = vcmp.eq.s32.totalorder %v2658_v46, 2  ;;  %v2428_v13 = vsub.s32 32, %v2427_v49 }
 0x221   : > { %v2432_v26 = vsub.s32 4294967266, %v2427_v49  ;;  %vm2659_vm7 = vcmp.lt.s32.totalorder %v2658_v46, 2  ;;  %v2665_v37 = vsel %vm2663_vm6, %v688_v55, %v6657_v19  ;;  %v9663_v15 = vand.u32 2147483647, %v6847_v31 }
 0x222   : > { %v2521_v2 = vadd.s32 536870912, %v2520_v59  ;;  %v2666_v51 = vsel %vm2659_vm7, %v2662_v63, %v2665_v37  ;;  %v778_v23 = vsub.s32 4, %v6950_v47  ;;  %v2332_v57 = vand.u32 2147483647, %v2331_v41  ;;  %v9676_v41 = vld [vmem:[#allocation5_spill] sm:$0xff] }
 0x223   : > { %vm8173_vm9 = vcmp.le.f32.partialorder %v9663_v15, 0.7853982  ;;  %v2433_v27 = vadd.s32 127, %v2432_v26  ;;  %v2667_v53 = vsel %vm680_vm1, nan, %v2666_v51  ;;  %v2232_v33 = vxor.u32 2147483648, %v8114_v3 }
 0x224   : > { %v780_v19 = vsel %vm8173_vm9, %v6847_v31, %v7217_v0  ;;  %v2334_v42 = vcvt.s32.f32 %v2327_v18  ;;  %v8185_v48 = vshrl.u32 %v2521_v2, 30  ;;  %6157 = vmatmul.mubr.msk.f32.vlgmr.msra.gmra.mrb[0].mxu0 %vm4523_vm11, %v2667_v53  ;;  %v2430_v14 = vshrl.u32 %v8121_v21, %v2428_v13 }
 0x225   : > { %6658 = vcosq.f32 %v780_v19  ;;  %v2434_v34 = vshll.u32 %v2433_v27, 23  ;;  %6214 = vmatpush3.msra.mxu0 %v2564_v56  ;;  %6159 = vmatprep.mubr.msk.f32.mxu0 %vm6751_vm4, %v9661_v36  ;;  %v779_v7 = vsel %vm694_vm3, %v778_v23, %v6950_v47  ;;  %v9667_v0 = vxor.u32 2147483648, %v7981_v16  ;;  %v9689_v56 = vld [vmem:[#allocation9_spill] sm:$0xff] }
 0x226   : > { %9666 = vst [vmem:[#allocation34_spill] sm:$0xff] %v8185_v48  ;;  %6660 = vsinq.f32 %v780_v19  ;;  %v2523_v60 = vshll.u32 %v8185_v48, 30  ;;  %v9668_v21 = vand.u32 2147483647, %v6861_v45  ;;  %v882_v25 = vsub.s32 4, %v7015_v35 }
 0x227   : > { %v8199_v61 = vsel %vm1838_vm14, %v9667_v0, %v7981_v16  ;;  %v9671_v47 = vxor.u32 2147483648, %v8042_v12  ;;  %v8216_v55 = vmul.f32 %v2334_v42, %v2332_v57  ;;  %v2429_v16 = vshll.u32 %v8140_v28, %v2427_v49  ;;  %v9682_v57 = vld [vmem:[#allocation7_spill] sm:$0xff]  ;;  %v9683_v42 = vld [vmem:[#allocation18_spill] sm:$0xff] }
 0x228   : > { %vm8204_vm7 = vcmp.le.f32.partialorder %v9668_v21, 0.7853982  ;;  %v8228_v18 = vsel %vm9562_vm2, %v2128_v50, %v8057_v11  ;;  %v8235_v10 = vsub.s32 %v2520_v59, %v2523_v60  ;;  %v8239_v28 = vsel %vm8173_vm9, 0, %v779_v7  ;;  %v9672_v50 = vld [vmem:[#allocation2_spill] sm:$0xff] }
 0x229   : > { %v8214_v38 = vsel %vm1942_vm8, %v9671_v47, %v8042_v12  ;;  %v884_v46 = vsel %vm8204_vm7, %v6861_v45, %v7320_v52  ;;  %v8233_v12 = vsel %vm9554_vm10, %v2232_v33, %v8114_v3  ;;  %v2431_v39 = vor.u32 %v2430_v14, %v2429_v16 }
 0x22a   : > { %v2435_v52 = vor.u32 4788187, %v2434_v34  ;;  %v883_v8 = vsel %vm798_vm0, %v882_v25, %v7015_v35  ;;  %6662 = vcosq.f32 %v884_v46  ;;  %v2526_v11 = vsub.s32 0, %v8235_v10  ;;  %v9677_v35 = vld [vmem:[#allocation14_spill] sm:$0xff] }
 0x22b   : > { %6664 = vsinq.f32 %v884_v46  ;;  %v9673_v40 = vand.u32 2147483647, %v9672_v50  ;;  %v986_v29 = vsub.s32 4, %v9676_v41  ;;  %v2336_v6 = vxor.u32 2147483648, %v8216_v55 }
 0x22c   : > { %v2516_v49 = vadd.s32 %v8147_v9, %v8154_v22  ;;  %v2761_v59 = vand.u32 3, %v8239_v28  ;;  %v5869_v13 = vmin.u32 %v2526_v11, %v8235_v10  ;;  %v8263_v26 = vsel %vm8204_vm7, 0, %v883_v8  ;;  %v9678_v22 = vld [vmem:[#allocation3_spill] sm:$0xff] }
 0x22d   : > { %vm8247_vm3 = vcmp.le.f32.partialorder %v9673_v40, 0.7853982  ;;  %v987_v37 = vsel %vm902_vm13, %v986_v29, %v9676_v41  ;;  %v2436_v2 = vand.u32 2147483647, %v2435_v52  ;;  %v2438_v9 = vcvt.s32.f32 %v2431_v39 }
 0x22e   : > { %v988_v63 = vsel %vm8247_vm3, %v9672_v50, %v9677_v35  ;;  %vm784_vm0 = vweird.f32 %v6847_v31  ;;  %v9679_v51 = vand.u32 2147483647, %v9678_v22  ;;  %v2528_v5 = vclz %v5869_v13  ;;  %v9685_v13 = vld [vmem:[#allocation4_spill] sm:$0xff] }
 0x22f   : > { %6666 = vcosq.f32 %v988_v63  ;;  %v8275_v15 = vpop.eup %6658  ;;  %v8279_v23 = vsel %vm8247_vm3, 0, %v987_v37  ;;  %v1090_v27 = vsub.s32 4, %v9682_v57  ;;  %vm2766_vm13 = vcmp.eq.s32.totalorder %v2761_v59, 2 }
 0x230   : > { %vm8271_vm12 = vcmp.le.f32.partialorder %v9679_v51, 0.7853982  ;;  %6668 = vsinq.f32 %v988_v63  ;;  %v8282_v53 = vpop.eup %6660  ;;  %v9568_v19 = vxor.u32 2147483648, %v8275_v15  ;;  %v2864_v33 = vand.u32 3, %v8263_v26 }
 0x231   : > { %v1092_v14 = vsel %vm8271_vm12, %v9678_v22, %v9683_v42  ;;  %v5870_v34 = vadd.s32 4294967294, %v2528_v5  ;;  %v9569_v7 = vxor.u32 2147483648, %v8282_v53  ;;  %vm888_vm15 = vweird.f32 %v6861_v45 }
 0x232   : > { %vm9684_vm5 = vcmp.lt.s32.totalorder %v9678_v22, 0  ;;  %6670 = vcosq.f32 %v1092_v14  ;;  %vm2762_vm6 = vcmp.lt.s32.totalorder %v2761_v59, 2  ;;  %vm2763_vm9 = vcmp.eq.s32.totalorder %v2761_v59, 0 }
 0x233   : > { %v1091_v0 = vsel %vm9684_vm5, %v1090_v27, %v9682_v57  ;;  %v2768_v60 = vsel %vm2766_vm13, %v9568_v19, %v8282_v53  ;;  %v2967_v21 = vand.u32 3, %v8279_v23  ;;  %v8299_v54 = vmul.f32 %v2438_v9, %v2436_v2  ;;  %v9693_v2 = vld [vmem:[#allocation6_spill] sm:$0xff] }
 0x234   : > { %vm5871_vm7 = vcmp.lt.s32.totalorder %v5870_v34, 0  ;;  %v2765_v25 = vsel %vm2763_vm9, %v8275_v15, %v9569_v7  ;;  %6672 = vsinq.f32 %v1092_v14  ;;  %v8304_v47 = vpop.eup %6662  ;;  %vm2865_vm3 = vcmp.lt.s32.totalorder %v2864_v33, 2  ;;  %v9727_v19 = vld [vmem:[#allocation22_spill] sm:$0xff] }
 0x235   : > { %v2531_v16 = vsel %vm5871_vm7, 0, %v5870_v34  ;;  %v2769_v46 = vsel %vm2762_vm6, %v2765_v25, %v2768_v60  ;;  %v8308_v39 = vsel %vm8271_vm12, 0, %v1091_v0  ;;  %v8310_v52 = vpop.eup %6664  ;;  %vm2866_vm13 = vcmp.eq.s32.totalorder %v2864_v33, 0  ;;  %v9690_v34 = vld [vmem:[#allocation19_spill] sm:$0xff] }
 0x236   : > { %v2532_v8 = vsub.s32 32, %v2531_v16  ;;  %v2536_v11 = vsub.s32 4294967266, %v2531_v16  ;;  %v2770_v40 = vsel %vm784_vm0, nan, %v2769_v46  ;;  %vm9555_vm5 = vweird.f32 %v9672_v50 }
 0x237   : > { %6160 = vmatmul.mubr.msk.f32.gmra.mrb[2].mxu0 %vm4523_vm11, %v2770_v40  ;;  %v9567_v3 = vxor.u32 2147483648, %v8310_v52  ;;  %v9566_v41 = vxor.u32 2147483648, %v8304_v47  ;;  %vm2869_vm6 = vcmp.eq.s32.totalorder %v2864_v33, 2  ;;  %vm2972_vm9 = vcmp.eq.s32.totalorder %v2967_v21, 2 }
 0x238   : > { %v2534_v59 = vshrl.u32 %v2516_v49, %v2532_v8  ;;  %v2537_v35 = vadd.s32 127, %v2536_v11  ;;  %6162 = vmatprep.mubr.msk.f32.mxu0 %vm6751_vm4, %v9661_v36  ;;  %v3070_v63 = vand.u32 3, %v8308_v39  ;;  %v9686_v37 = vand.u32 2147483647, %v9685_v13 }
 0x239   : > { %v8318_v29 = vpop.eup %6666  ;;  %v2868_v9 = vsel %vm2866_vm13, %v8304_v47, %v9567_v3  ;;  %v2871_v49 = vsel %vm2869_vm6, %v9566_v41, %v8310_v52  ;;  %v1194_v5 = vsub.s32 4, %v9689_v56  ;;  %v2533_v27 = vshll.u32 %v8235_v10, %v2531_v16 }
 0x23a   : > { %vm8325_vm12 = vcmp.le.f32.partialorder %v9686_v37, 0.7853982  ;;  %v9561_v51 = vxor.u32 2147483648, %v8318_v29  ;;  %v8337_v57 = vpop.eup %6668  ;;  %v2538_v42 = vshll.u32 %v2537_v35, 23  ;;  %v2872_v14 = vsel %vm2865_vm3, %v2868_v9, %v2871_v49 }
 0x23b   : > { %v1196_v0 = vsel %vm8325_vm12, %v9685_v13, %v9690_v34  ;;  %vm9558_vm7 = vcmp.lt.s32.totalorder %v7904_v58, 0  ;;  %v2873_v60 = vsel %vm888_vm15, nan, %v2872_v14  ;;  %v9563_v25 = vxor.u32 2147483648, %v8337_v57 }
 0x23c   : > { %v2974_v10 = vsel %vm2972_vm9, %v9561_v51, %v8337_v57  ;;  %vm9691_vm3 = vcmp.lt.s32.totalorder %v9685_v13, 0  ;;  %v8356_v16 = vpop.eup %6670  ;;  %vm9557_vm13 = vcmp.lt.s32.totalorder %v7952_v62, 0  ;;  %v2539_v46 = vor.u32 4788187, %v2538_v42  ;;  %6163 = vmatmul.mubr.msk.f32.gmra.mrb[4].mxu0 %vm4523_vm11, %v2873_v60 }
 0x23d   : > { %v1195_v33 = vsel %vm9691_vm3, %v1194_v5, %v9689_v56  ;;  %vm2968_vm6 = vcmp.lt.s32.totalorder %v2967_v21, 2  ;;  %vm2969_vm10 = vcmp.eq.s32.totalorder %v2967_v21, 0  ;;  %6674 = vcosq.f32 %v1196_v0  ;;  %6165 = vmatprep.mubr.msk.f32.mxu0 %vm6751_vm4, %v9661_v36  ;;  %v9692_v5 = vld [vmem:[#allocation11_spill] sm:$0xff] }
 0x23e   : > { %v2535_v8 = vor.u32 %v2534_v59, %v2533_v27  ;;  %v2971_v11 = vsel %vm2969_vm10, %v8318_v29, %v9563_v25  ;;  %v9556_v40 = vxor.u32 2147483648, %v8356_v16  ;;  %6676 = vsinq.f32 %v1196_v0  ;;  %v8366_v35 = vpop.eup %6672 }
 0x23f   : > { %v2540_v37 = vand.u32 2147483647, %v2539_v46  ;;  %v2975_v9 = vsel %vm2968_vm6, %v2971_v11, %v2974_v10  ;;  %vm3075_vm9 = vcmp.eq.s32.totalorder %v3070_v63, 2  ;;  %v8370_v21 = vsel %vm8325_vm12, 0, %v1195_v33  ;;  %v9697_v10 = vld [vmem:[#allocation20_spill] sm:$0xff] }
 0x240   : > { %v2976_v59 = vsel %vm9555_vm5, nan, %v2975_v9  ;;  %v9560_v49 = vxor.u32 2147483648, %v8366_v35  ;;  %v3077_v56 = vsel %vm3075_vm9, %v9556_v40, %v8366_v35  ;;  %v1298_v27 = vsub.s32 4, %v9692_v5 }
 0x241   : > { %v2440_v42 = vxor.u32 2147483648, %v8299_v54  ;;  %6166 = vmatmul.mubr.msk.f32.gmra.mrb[6].mxu0 %vm4523_vm11, %v2976_v59  ;;  %vm9559_vm10 = vweird.f32 %v9678_v22  ;;  %vm3072_vm3 = vcmp.eq.s32.totalorder %v3070_v63, 0  ;;  %v9694_v14 = vand.u32 2147483647, %v9693_v2  ;;  %v9699_v59 = vld [vmem:[#allocation8_spill] sm:$0xff] }
 0x242   : > { %v2542_v0 = vcvt.s32.f32 %v2535_v8  ;;  %6168 = vmatprep.mubr.msk.f32.mxu0 %vm6751_vm4, %v9661_v36  ;;  %vm3071_vm6 = vcmp.lt.s32.totalorder %v3070_v63, 2  ;;  %v3074_v60 = vsel %vm3072_vm3, %v8356_v16, %v9560_v49  ;;  %vm9578_vm9 = vcmp.lt.s32.totalorder %v7994_v17, 0 }
 0x243   : > { %vm8384_vm12 = vcmp.le.f32.partialorder %v9694_v14, 0.7853982  ;;  %v3078_v46 = vsel %vm3071_vm6, %v3074_v60, %v3077_v56  ;;  %v3173_v11 = vand.u32 3, %v8370_v21  ;;  %vm9698_vm5 = vcmp.lt.s32.totalorder %v9693_v2, 0 }
 0x244   : > { %v1300_v33 = vsel %vm8384_vm12, %v9693_v2, %v9697_v10  ;;  %v1299_v8 = vsel %vm9698_vm5, %v1298_v27, %v9692_v5  ;;  %v2543_v63 = vmul.f32 %v2542_v0, %v2540_v37  ;;  %v3079_v9 = vsel %vm9559_vm10, nan, %v3078_v46  ;;  %v9703_v5 = vld [vmem:[#allocation13_spill] sm:$0xff] }
 0x245   : > { %6678 = vcosq.f32 %v1300_v33  ;;  %v9700_v14 = vand.u32 2147483647, %v9699_v59  ;;  %v8415_v56 = vsel %vm9558_vm7, %v2336_v6, %v8216_v55  ;;  %v8420_v37 = vsel %vm680_vm1, nan, %v8163_v43  ;;  %6169 = vmatmul.mubr.msk.f32.gmra.mrb[8].mxu0 %vm4523_vm11, %v3079_v9  ;;  %v9704_v0 = vld [vmem:[#allocation25_spill] sm:$0xff]  ;;  %v9706_v6 = vld [vmem:[#allocation10_spill] sm:$0xff] }
 0x246   : > { %6680 = vsinq.f32 %v1300_v33  ;;  %v1402_v27 = vsub.s32 4, %v9703_v5  ;;  %v8431_v10 = vsel %vm9557_vm13, %v2440_v42, %v8299_v54  ;;  %6171 = vmatprep.mubr.msk.f32.mxu0 %vm6751_vm4, %v9661_v36  ;;  %vm1200_vm1 = vweird.f32 %v9685_v13  ;;  %v9710_v33 = vld [vmem:[#allocation16_spill] sm:$0xff] }
 0x247   : > { %vm8406_vm3 = vcmp.le.f32.partialorder %v9700_v14, 0.7853982  ;;  %v8438_v32 = vsel %vm8384_vm12, 0, %v1299_v8  ;;  %v8440_v43 = vpop.eup %6674  ;;  %vm9705_vm5 = vcmp.lt.s32.totalorder %v9699_v59, 0  ;;  %v9707_v54 = vand.u32 2147483647, %v9706_v6 }
 0x248   : > { %v1404_v60 = vsel %vm8406_vm3, %v9699_v59, %v9704_v0  ;;  %v1403_v55 = vsel %vm9705_vm5, %v1402_v27, %v9703_v5  ;;  %v1506_v46 = vsub.s32 4, %v9710_v33  ;;  %v8452_v9 = vpop.eup %6676  ;;  %v2544_v34 = vxor.u32 2147483648, %v2543_v63  ;;  %v9711_v14 = vld [vmem:[#allocation26_spill] sm:$0xff] }
 0x249   : > { %6682 = vcosq.f32 %v1404_v60  ;;  %vm8447_vm6 = vcmp.le.f32.partialorder %v9707_v54, 0.7853982  ;;  %v9564_v8 = vxor.u32 2147483648, %v8440_v43  ;;  %vm3174_vm12 = vcmp.lt.s32.totalorder %v3173_v11, 2 }
 0x24a   : > { %6684 = vsinq.f32 %v1404_v60  ;;  %v1508_v5 = vsel %vm8447_vm6, %v9706_v6, %v9711_v14  ;;  %v9565_v27 = vxor.u32 2147483648, %v8452_v9  ;;  %vm3178_vm5 = vcmp.eq.s32.totalorder %v3173_v11, 2 }
 0x24b   : > { %v3276_v0 = vand.u32 3, %v8438_v32  ;;  %6686 = vcosq.f32 %v1508_v5  ;;  %vm3175_vm13 = vcmp.eq.s32.totalorder %v3173_v11, 0  ;;  %v3180_v60 = vsel %vm3178_vm5, %v9564_v8, %v8452_v9  ;;  %v9714_v11 = vld [vmem:[#allocation12_spill] sm:$0xff] }
 0x24c   : > { %v8466_v54 = vsel %vm8406_vm3, 0, %v1403_v55  ;;  %6688 = vsinq.f32 %v1508_v5  ;;  %v3177_v14 = vsel %vm3175_vm13, %v8440_v43, %v9565_v27  ;;  %vm9579_vm7 = vweird.f32 %v9693_v2  ;;  %v9719_v5 = vld [vmem:[#allocation21_spill] sm:$0xff]  ;;  %v9720_v27 = vld [vmem:[#allocation27_spill] sm:$0xff] }
 0x24d   : > { %9712 = vst [vmem:[#allocation2_spill] sm:$0xff] %v8466_v54  ;;  %vm9713_vm10 = vcmp.lt.s32.totalorder %v9706_v6, 0  ;;  %v9715_v51 = vand.u32 2147483647, %v9714_v11  ;;  %v8483_v40 = vsel %vm9578_vm9, %v2544_v34, %v2543_v63  ;;  %v3181_v55 = vsel %vm3174_vm12, %v3177_v14, %v3180_v60 }
 0x24e   : > { %v1507_v49 = vsel %vm9713_vm10, %v1506_v46, %v9710_v33  ;;  %9718 = vst [vmem:[#allocation5_spill] sm:$0xff] %v8483_v40  ;;  %v1610_v8 = vsub.s32 4, %v9719_v5  ;;  %vm3277_vm13 = vcmp.lt.s32.totalorder %v3276_v0, 2  ;;  %v3379_v33 = vand.u32 3, %v8466_v54  ;;  %v9730_v40 = vld [vmem:[#allocation29_spill] sm:$0xff] }
 0x24f   : > { %vm8477_vm2 = vcmp.le.f32.partialorder %v9715_v51, 0.7853982  ;;  %v8490_v3 = vpop.eup %6678  ;;  %v3182_v51 = vsel %vm1200_vm1, nan, %v3181_v55  ;;  %vm3281_vm10 = vcmp.eq.s32.totalorder %v3276_v0, 2  ;;  %vm1408_vm3 = vweird.f32 %v9699_v59  ;;  %v9742_v59 = vld [vmem:[#allocation30_spill] sm:$0xff] }
 0x250   : > { %v1612_v41 = vsel %vm8477_vm2, %v9714_v11, %v9720_v27  ;;  %v8495_v46 = vpop.eup %6680  ;;  %6172 = vmatmul.mubr.msk.f32.gmra.mrb[10].mxu0 %vm4523_vm11, %v3182_v51  ;;  %v9572_v63 = vxor.u32 2147483648, %v8490_v3  ;;  %v8502_v34 = vsel %vm8447_vm6, 0, %v1507_v49  ;;  %v9722_v27 = vld [vmem:[#allocation15_spill] sm:$0xff]  ;;  %vm9726_vm5 = vcmp.lt.s32.totalorder %v9714_v11, 0 }
 0x251   : > { %6690 = vcosq.f32 %v1612_v41  ;;  %9721 = vst [vmem:[#allocation14_spill] sm:$0xff] %v8502_v34  ;;  %v9723_v60 = vand.u32 2147483647, %v9722_v27  ;;  %6174 = vmatprep.mubr.msk.f32.mxu0 %vm6751_vm4, %v9661_v36  ;;  %v1611_v51 = vsel %vm9726_vm5, %v1610_v8, %v9719_v5  ;;  %v1714_v42 = vsub.s32 4, %v9727_v19 }
 0x252   : > { %6692 = vsinq.f32 %v1612_v41  ;;  %vm3278_vm6 = vcmp.eq.s32.totalorder %v3276_v0, 0  ;;  %v8524_v7 = vsel %vm8477_vm2, 0, %v1611_v51  ;;  %v9732_v41 = vxor.u32 2147483648, %v8495_v46 }
 0x253   : > { %vm8506_vm12 = vcmp.le.f32.partialorder %v9723_v60, 0.7853982  ;;  %v8517_v49 = vpop.eup %6682  ;;  %v3283_v60 = vsel %vm3281_vm10, %v9572_v63, %v8495_v46  ;;  %9729 = vst [vmem:[#allocation7_spill] sm:$0xff] %v8524_v7  ;;  %vm3381_vm5 = vcmp.eq.s32.totalorder %v3379_v33, 0  ;;  %v3482_v63 = vand.u32 3, %v8502_v34 }
 0x254   : > { %9728 = vst [vmem:[#allocation3_spill] sm:$0xff] %v8517_v49  ;;  %v1716_v55 = vsel %vm8506_vm12, %v9722_v27, %v9730_v40  ;;  %v8530_v8 = vpop.eup %6684  ;;  %v3280_v5 = vsel %vm3278_vm6, %v8490_v3, %v9732_v41  ;;  %v9576_v48 = vxor.u32 2147483648, %v8517_v49  ;;  %vm3384_vm2 = vcmp.eq.s32.totalorder %v3379_v33, 2 }
 0x255   : > { %9731 = vst [vmem:[#allocation18_spill] sm:$0xff] %v8530_v8  ;;  %v3284_v25 = vsel %vm3277_vm13, %v3280_v5, %v3283_v60  ;;  %v9581_v51 = vxor.u32 2147483648, %v8530_v8  ;;  %vm9597_vm10 = vweird.f32 %v9706_v6  ;;  %6694 = vcosq.f32 %v1716_v55  ;;  %v8540_v40 = vpop.eup %6686 }
 0x256   : > { %9733 = vst [vmem:[#allocation4_spill] sm:$0xff] %v8540_v40  ;;  %v3285_v17 = vsel %vm9579_vm7, nan, %v3284_v25  ;;  %v3386_v41 = vsel %vm3384_vm2, %v9576_v48, %v8530_v8  ;;  %v3585_v54 = vand.u32 3, %v8524_v7  ;;  %vm9734_vm13 = vcmp.lt.s32.totalorder %v9722_v27, 0  ;;  %v8551_v60 = vpop.eup %6688 }
 0x257   : > { %v1715_v0 = vsel %vm9734_vm13, %v1714_v42, %v9727_v19  ;;  %9735 = vst [vmem:[#allocation9_spill] sm:$0xff] %v8551_v60  ;;  %6175 = vmatmul.mubr.msk.f32.gmra.mrb[12].mxu0 %vm4523_vm11, %v3285_v17  ;;  %vm3380_vm6 = vcmp.lt.s32.totalorder %v3379_v33, 2  ;;  %v3383_v5 = vsel %vm3381_vm5, %v8517_v49, %v9581_v51  ;;  %v9580_v25 = vxor.u32 2147483648, %v8540_v40  ;;  %v9741_v51 = vld [vmem:[#allocation23_spill] sm:$0xff] }
 0x258   : > { %6696 = vsinq.f32 %v1716_v55  ;;  %6177 = vmatprep.mubr.msk.f32.mxu0 %vm6751_vm4, %v9661_v36  ;;  %v3387_v48 = vsel %vm3380_vm6, %v3383_v5, %v3386_v41  ;;  %v9585_v7 = vxor.u32 2147483648, %v8551_v60  ;;  %vm3487_vm2 = vcmp.eq.s32.totalorder %v3482_v63, 2  ;;  %v9737_v41 = vld [vmem:[#allocation17_spill] sm:$0xff] }
 0x259   : > { %vm3483_vm13 = vcmp.lt.s32.totalorder %v3482_v63, 2  ;;  %vm3484_vm9 = vcmp.eq.s32.totalorder %v3482_v63, 0  ;;  %v3489_v17 = vsel %vm3487_vm2, %v9580_v25, %v8551_v60  ;;  %vm1616_vm7 = vweird.f32 %v9714_v11 }
 0x25a   : > { %v8567_v19 = vsel %vm8506_vm12, 0, %v1715_v0  ;;  %v9582_v33 = vmov 0.0|0.0   ;;  %v3388_v63 = vsel %vm1408_vm3, nan, %v3387_v48  ;;  %v3486_v42 = vsel %vm3484_vm9, %v8540_v40, %v9585_v7 }
 0x25b   : > { %9736 = vst [vmem:[#allocation19_spill] sm:$0xff] %v8567_v19  ;;  %6467 = vmatprep.subr.bf16.mxu0 %v9582_v33  ;;  %6473 = vmatprep.subr.bf16.mxu1 %v9582_v33  ;;  %v8571_v55 = vpop.eup %6690  ;;  %vm3586_vm5 = vcmp.lt.s32.totalorder %v3585_v54, 2  ;;  %v9738_v5 = vand.u32 2147483647, %v9737_v41  ;;  %v3490_v0 = vsel %vm3483_vm13, %v3486_v42, %v3489_v17  ;;  %v1818_v33 = vsub.s32 4, %v9741_v51  ;;  %v4977_v17 = vld [vmem:[%s9470_s5] sm:$0xff] }
 0x25c   : > { %6178 = vmatmul.mubr.msk.f32.gmra.mrb[14].mxu0 %vm4523_vm11, %v3388_v63  ;;  %v9593_v25 = vxor.u32 2147483648, %v8571_v55  ;;  %v8591_v7 = vpop.eup %6692  ;;  %vm3590_vm9 = vcmp.eq.s32.totalorder %v3585_v54, 2  ;;  %v4978_v63 = vld [vmem:[%s9470_s5 + $0x8] sm:$0xff]  ;;  %v785_v42 = vadd.s32 3, %v8239_v28  ;;  %vm9600_vm12 = vweird.f32 %v9722_v27 }
 0x25d   : > { %vm8580_vm6 = vcmp.le.f32.partialorder %v9738_v5, 0.7853982  ;;  %6180 = vmatprep.mubr.msk.f32.mxu0 %vm6751_vm4, %v9661_v36  ;;  %v3688_v5 = vand.u32 3, %v8567_v19  ;;  %vm9743_vm2 = vcmp.lt.s32.totalorder %v9737_v41, 0  ;;  %v3491_v60 = vsel %vm9597_vm10, nan, %v3490_v0  ;;  %v9748_v0 = vld [vmem:[#allocation24_spill] sm:$0xff] }
 0x25e   : > { %v1820_v48 = vsel %vm8580_vm6, %v9737_v41, %v9742_v59  ;;  %v3592_v40 = vsel %vm3590_vm9, %v9593_v25, %v8591_v7  ;;  %v1819_v19 = vsel %vm9743_vm2, %v1818_v33, %v9741_v51  ;;  %vm3587_vm13 = vcmp.eq.s32.totalorder %v3585_v54, 0 }
 0x25f   : > { %6698 = vcosq.f32 %v1820_v48  ;;  %v8615_v28 = vsel %vm8580_vm6, 0, %v1819_v19  ;;  %v786_v59 = vand.u32 3, %v785_v42  ;;  %v8617_v49 = vpop.eup %6694  ;;  %v9744_v25 = vxor.u32 2147483648, %v8591_v7 }
 0x260   : > { %6700 = vsinq.f32 %v1820_v48  ;;  %6181 = vmatmul.mubr.msk.f32.gmra.mrb[16].mxu0 %vm4523_vm11, %v3491_v60  ;;  %v6468_v34 = vpack.c.bf16 %v4978_v63, %v4977_v17  ;;  %v9745_v51 = vand.u32 2147483647, %v7619_v24  ;;  %v1922_v14 = vsub.s32 4, %v9748_v0 }
 0x261   : > { %v3589_v8 = vsel %vm3587_vm13, %v8571_v55, %v9744_v25  ;;  %6183 = vmatprep.mubr.msk.f32.mxu0 %vm6751_vm4, %v9661_v36  ;;  %v9598_v60 = vxor.u32 2147483648, %v8617_v49  ;;  %vm3689_vm6 = vcmp.lt.s32.totalorder %v3688_v5, 2  ;;  %vm3690_vm2 = vcmp.eq.s32.totalorder %v3688_v5, 0 }
 0x262   : > { %vm8625_vm9 = vcmp.le.f32.partialorder %v9745_v51, 0.7853982  ;;  %v3593_v19 = vsel %vm3586_vm5, %v3589_v8, %v3592_v40  ;;  %v8638_v48 = vpop.eup %6696  ;;  %vm3693_vm13 = vcmp.eq.s32.totalorder %v3688_v5, 2  ;;  %v3791_v17 = vand.u32 3, %v8615_v28 }
 0x263   : > { %v1924_v25 = vsel %vm8625_vm9, %v7619_v24, %v8199_v61  ;;  %vm788_vm10 = vcmp.eq.s32.totalorder %v786_v59, 0  ;;  %v3594_v63 = vsel %vm1616_vm7, nan, %v3593_v19  ;;  %v9599_v54 = vxor.u32 2147483648, %v8638_v48 }
 0x264   : > { %v3695_v8 = vsel %vm3693_vm13, %v9598_v60, %v8638_v48  ;;  %v9749_v40 = vxor.u32 2147483648, %v8282_v53  ;;  %6184 = vmatmul.mubr.msk.f32.gmra.mrb[18].mxu0 %vm4523_vm11, %v3594_v63  ;;  %vm791_vm5 = vcmp.eq.s32.totalorder %v786_v59, 2  ;;  %v1923_v42 = vsel %vm1838_vm14, %v1922_v14, %v9748_v0 }
 0x265   : > { %6702 = vcosq.f32 %v1924_v25  ;;  %v889_v51 = vadd.s32 3, %v8263_v26  ;;  %v3692_v19 = vsel %vm3690_vm2, %v8617_v49, %v9599_v54  ;;  %6215 = vmatprep.mubr.msk.f32.mxu0 %vm6751_vm4, %v9661_v36  ;;  %v8665_v63 = vsel %vm8625_vm9, 0, %v1923_v42 }
 0x266   : > { %v790_v61 = vsel %vm788_vm10, %v8275_v15, %v9749_v40  ;;  %v9750_v40 = vxor.u32 2147483648, %v8275_v15  ;;  %6704 = vsinq.f32 %v1924_v25  ;;  %v3696_v0 = vsel %vm3689_vm6, %v3692_v19, %v3695_v8  ;;  %v9751_v15 = vld [vmem:[#allocation28_spill] sm:$0xff] }
 0x267   : > { %vm1824_vm14 = vweird.f32 %v9737_v41  ;;  %vm787_vm10 = vcmp.lt.s32.totalorder %v786_v59, 2  ;;  %v890_v26 = vand.u32 3, %v889_v51  ;;  %v3697_v54 = vsel %vm9600_vm12, nan, %v3696_v0 }
 0x268   : > { %v793_v60 = vsel %vm791_vm5, %v9750_v40, %v8282_v53  ;;  %vm3792_vm2 = vcmp.lt.s32.totalorder %v3791_v17, 2  ;;  %vm3793_vm13 = vcmp.eq.s32.totalorder %v3791_v17, 0  ;;  %v2026_v53 = vsub.s32 4, %v9751_v15  ;;  %6187 = vmatmul.mubr.msk.f32.vlgmr.msra.gmra.mrb[0].mxu1 %vm4523_vm11, %v3697_v54  ;;  %6216 = vmatmul.mubr.msk.f32.vlgmr.msra.gmra.mrb[0].mxu0 %vm4523_vm11, %v8420_v37 }
 0x269   : > { %v8669_v14 = vpop.eup %6698  ;;  %vm3796_vm9 = vcmp.eq.s32.totalorder %v3791_v17, 2  ;;  %v794_v59 = vsel %vm787_vm10, %v790_v61, %v793_v60  ;;  %v3894_v33 = vand.u32 3, %v8665_v63  ;;  %6189 = vmatprep.mubr.msk.f32.mxu1 %vm6751_vm4, %v9661_v36  ;;  %6469 = vmatpush3.bf16.msra.mxu0 %v6468_v34  ;;  %vm892_vm6 = vcmp.eq.s32.totalorder %v890_v26, 0 }
 0x26a   : > { %v8674_v40 = vpop.eup %6700  ;;  %v1832_v5 = vxor.u32 2147483648, %v8669_v14  ;;  %vm895_vm5 = vcmp.eq.s32.totalorder %v890_v26, 2  ;;  %v9752_v8 = vand.u32 2147483647, %v7655_v44  ;;  %6218 = vmatprep.mubr.msk.f32.mxu0 %vm6751_vm4, %v9661_v36  ;;  %v9755_v60 = vxor.u32 2147483648, %v8310_v52 }
 0x26b   : > { %v1829_v25 = vxor.u32 2147483648, %v8674_v40  ;;  %v9756_v61 = vxor.u32 2147483648, %v8304_v47  ;;  %v2027_v51 = vsel %vm1942_vm8, %v2026_v53, %v9751_v15  ;;  %v795_v0 = vsel %vm784_vm0, nan, %v794_v59 }
 0x26c   : > { %vm8686_vm12 = vcmp.le.f32.partialorder %v9752_v8, 0.7853982  ;;  %v3798_v37 = vsel %vm3796_vm9, %v1832_v5, %v8674_v40  ;;  %v894_v34 = vsel %vm892_vm6, %v8304_v47, %v9755_v60  ;;  %vm9602_vm10 = vweird.f32 %v7619_v24  ;;  %6219 = vmatmul.mubr.msk.f32.gmra.mrb[2].mxu0 %vm4523_vm11, %v795_v0 }
 0x26d   : > { %v897_v42 = vsel %vm895_vm5, %v9756_v61, %v8310_v52  ;;  %v3795_v19 = vsel %vm3793_vm13, %v8669_v14, %v1829_v25  ;;  %vm891_vm9 = vcmp.lt.s32.totalorder %v890_v26, 2  ;;  %v2028_v47 = vsel %vm8686_vm12, %v7655_v44, %v8214_v38  ;;  %6221 = vmatprep.mubr.msk.f32.mxu0 %vm6751_vm4, %v9661_v36 }
 0x26e   : > { %v9757_v52 = vmov 0.0|0.0   ;;  %v3799_v15 = vsel %vm3792_vm2, %v3795_v19, %v3798_v37  ;;  %vm3895_vm8 = vcmp.lt.s32.totalorder %v3894_v33, 2  ;;  %v898_v53 = vsel %vm891_vm9, %v894_v34, %v897_v42  ;;  %v9761_v37 = vld [vmem:[#allocation31_spill] sm:$0xff] }
 0x26f   : > { %6470 = vmatprep.subr.bf16.mxu0 %v9757_v52  ;;  %6706 = vcosq.f32 %v2028_v47  ;;  %v3800_v31 = vsel %vm1824_vm14, nan, %v3799_v15  ;;  %v8724_v26 = vsel %vm8686_vm12, 0, %v2027_v51  ;;  %v993_v38 = vadd.s32 3, %v8279_v23  ;;  %v8727_v17 = vpop.eup %6702 }
 0x270   : > { %6708 = vsinq.f32 %v2028_v47  ;;  %6190 = vmatmul.mubr.msk.f32.gmra.mrb[2].mxu1 %vm4523_vm11, %v3800_v31  ;;  %vm3896_vm0 = vcmp.eq.s32.totalorder %v3894_v33, 0  ;;  %vm3899_vm2 = vcmp.eq.s32.totalorder %v3894_v33, 2  ;;  %v9758_v59 = vand.u32 2147483647, %v7694_v20  ;;  %v8737_v54 = vpop.eup %6704 }
 0x271   : > { %v2130_v60 = vsub.s32 4, %v9761_v37  ;;  %6192 = vmatprep.mubr.msk.f32.mxu1 %vm6751_vm4, %v9661_v36  ;;  %v1936_v23 = vxor.u32 2147483648, %v8727_v17  ;;  %v899_v34 = vsel %vm888_vm15, nan, %v898_v53  ;;  %v994_v61 = vand.u32 3, %v993_v38 }
 0x272   : > { %vm8732_vm13 = vcmp.le.f32.partialorder %v9758_v59, 0.7853982  ;;  %v1933_v51 = vxor.u32 2147483648, %v8737_v54  ;;  %6222 = vmatmul.mubr.msk.f32.gmra.mrb[4].mxu0 %vm4523_vm11, %v899_v34  ;;  %v3997_v19 = vand.u32 3, %v8724_v26  ;;  %v1097_v0 = vadd.s32 3, %v8308_v39 }
 0x273   : > { %v2132_v42 = vsel %vm8732_vm13, %v7694_v20, %v8228_v18  ;;  %v3901_v45 = vsel %vm3899_vm2, %v1936_v23, %v8737_v54  ;;  %6224 = vmatprep.mubr.msk.f32.mxu0 %vm6751_vm4, %v9661_v36  ;;  %vm996_vm15 = vcmp.eq.s32.totalorder %v994_v61, 0  ;;  %vm999_vm12 = vcmp.eq.s32.totalorder %v994_v61, 2 }
 0x274   : > { %6710 = vcosq.f32 %v2132_v42  ;;  %vm9762_vm6 = vcmp.lt.s32.totalorder %v7694_v20, 0  ;;  %v3898_v47 = vsel %vm3896_vm0, %v8727_v17, %v1933_v51  ;;  %vm995_vm5 = vcmp.lt.s32.totalorder %v994_v61, 2  ;;  %v9769_v61 = vld [vmem:[#allocation33_spill] sm:$0xff] }
 0x275   : > { %v2131_v18 = vsel %vm9762_vm6, %v2130_v60, %v9761_v37  ;;  %v9763_v39 = vxor.u32 2147483648, %v8337_v57  ;;  %v9764_v53 = vxor.u32 2147483648, %v8318_v29  ;;  %v3902_v38 = vsel %vm3895_vm8, %v3898_v47, %v3901_v45 }
 0x276   : > { %vm9601_vm9 = vweird.f32 %v7655_v44  ;;  %6712 = vsinq.f32 %v2132_v42  ;;  %v3903_v37 = vsel %vm9602_vm10, nan, %v3902_v38  ;;  %vm3998_vm2 = vcmp.lt.s32.totalorder %v3997_v19, 2 }
 0x277   : > { %v998_v15 = vsel %vm996_vm15, %v8318_v29, %v9763_v39  ;;  %v1001_v31 = vsel %vm999_vm12, %v9764_v53, %v8337_v57  ;;  %vm9765_vm0 = vweird.f32 %v9672_v50  ;;  %v1098_v34 = vand.u32 3, %v1097_v0  ;;  %6193 = vmatmul.mubr.msk.f32.gmra.mrb[4].mxu1 %vm4523_vm11, %v3903_v37 }
 0x278   : > { %v1002_v59 = vsel %vm995_vm5, %v998_v15, %v1001_v31  ;;  %vm4002_vm15 = vcmp.eq.s32.totalorder %v3997_v19, 2  ;;  %v8780_v29 = vsel %vm8732_vm13, 0, %v2131_v18  ;;  %v9766_v57 = vand.u32 2147483647, %v7825_v4  ;;  %6195 = vmatprep.mubr.msk.f32.mxu1 %vm6751_vm4, %v9661_v36 }
 0x279   : > { %v1003_v60 = vsel %vm9765_vm0, nan, %v1002_v59  ;;  %v2234_v42 = vsub.s32 4, %v9769_v61  ;;  %v8789_v50 = vpop.eup %6706  ;;  %vm1099_vm12 = vcmp.lt.s32.totalorder %v1098_v34, 2  ;;  %vm1100_vm6 = vcmp.eq.s32.totalorder %v1098_v34, 0 }
 0x27a   : > { %6225 = vmatmul.mubr.msk.f32.gmra.mrb[6].mxu0 %vm4523_vm11, %v1003_v60  ;;  %vm8784_vm8 = vcmp.le.f32.partialorder %v9766_v57, 0.7853982  ;;  %vm1103_vm13 = vcmp.eq.s32.totalorder %v1098_v34, 2  ;;  %v8799_v0 = vpop.eup %6708  ;;  %v2040_v45 = vxor.u32 2147483648, %v8789_v50  ;;  %v9770_v18 = vxor.u32 2147483648, %v8366_v35 }
 0x27b   : > { %6227 = vmatprep.mubr.msk.f32.mxu0 %vm6751_vm4, %v9661_v36  ;;  %v2236_v8 = vsel %vm8784_vm8, %v7825_v4, %v8233_v12  ;;  %v9771_v39 = vxor.u32 2147483648, %v8356_v16  ;;  %vm9772_vm5 = vcmp.lt.s32.totalorder %v7825_v4, 0  ;;  %v2037_v31 = vxor.u32 2147483648, %v8799_v0 }
 0x27c   : > { %v1102_v47 = vsel %vm1100_vm6, %v8356_v16, %v9770_v18  ;;  %v2235_v53 = vsel %vm9772_vm5, %v2234_v42, %v9769_v61  ;;  %v4100_v12 = vand.u32 3, %v8780_v29  ;;  %6714 = vcosq.f32 %v2236_v8 }
 0x27d   : > { %v1105_v15 = vsel %vm1103_vm13, %v9771_v39, %v8366_v35  ;;  %vm3999_vm0 = vcmp.eq.s32.totalorder %v3997_v19, 0  ;;  %v4004_v59 = vsel %vm4002_vm15, %v2040_v45, %v8799_v0  ;;  %vm9773_vm6 = vweird.f32 %v9678_v22 }
 0x27e   : > { %v1106_v38 = vsel %vm1099_vm12, %v1102_v47, %v1105_v15  ;;  %6716 = vsinq.f32 %v2236_v8  ;;  %v8819_v35 = vpop.eup %6710  ;;  %v4001_v37 = vsel %vm3999_vm0, %v8789_v50, %v2037_v31  ;;  %v8827_v60 = vsel %vm8784_vm8, 0, %v2235_v53 }
 0x27f   : > { %v1107_v16 = vsel %vm9773_vm6, nan, %v1106_v38  ;;  %v1201_v34 = vadd.s32 3, %v8370_v21  ;;  %v9774_v57 = vand.u32 2147483647, %v7904_v58  ;;  %v4005_v61 = vsel %vm3998_vm2, %v4001_v37, %v4004_v59 }
 0x280   : > { %6228 = vmatmul.mubr.msk.f32.gmra.mrb[8].mxu0 %vm4523_vm11, %v1107_v16  ;;  %v9607_v42 = vxor.u32 2147483648, %v8819_v35  ;;  %v2338_v8 = vsub.s32 4, %v8071_v30  ;;  %v4006_v33 = vsel %vm9601_vm9, nan, %v4005_v61  ;;  %vm2136_vm8 = vweird.f32 %v7694_v20  ;;  %v8848_v19 = vpop.eup %6712 }
 0x281   : > { %vm8832_vm15 = vcmp.le.f32.partialorder %v9774_v57, 0.7853982  ;;  %6230 = vmatprep.mubr.msk.f32.mxu0 %vm6751_vm4, %v9661_v36  ;;  %vm4101_vm12 = vcmp.lt.s32.totalorder %v4100_v12, 2  ;;  %vm4105_vm13 = vcmp.eq.s32.totalorder %v4100_v12, 2  ;;  %6196 = vmatmul.mubr.msk.f32.gmra.mrb[6].mxu1 %vm4523_vm11, %v4006_v33  ;;  %v4203_v18 = vand.u32 3, %v8827_v60 }
 0x282   : > { %v2340_v21 = vsel %vm8832_vm15, %v7904_v58, %v8415_v56  ;;  %v1202_v47 = vand.u32 3, %v1201_v34  ;;  %vm9777_vm2 = vcmp.lt.s32.totalorder %v7904_v58, 0  ;;  %6198 = vmatprep.mubr.msk.f32.mxu1 %vm6751_vm4, %v9661_v36  ;;  %v2141_v56 = vxor.u32 2147483648, %v8848_v19 }
 0x283   : > { %v2339_v39 = vsel %vm9777_vm2, %v2338_v8, %v8071_v30  ;;  %6718 = vcosq.f32 %v2340_v21  ;;  %vm4102_vm5 = vcmp.eq.s32.totalorder %v4100_v12, 0  ;;  %v4107_v15 = vsel %vm4105_vm13, %v9607_v42, %v8848_v19 }
 0x284   : > { %6720 = vsinq.f32 %v2340_v21  ;;  %vm2240_vm0 = vweird.f32 %v7825_v4  ;;  %vm1203_vm6 = vcmp.lt.s32.totalorder %v1202_v47, 2  ;;  %vm1204_vm9 = vcmp.eq.s32.totalorder %v1202_v47, 0 }
 0x285   : > { %vm1207_vm10 = vcmp.eq.s32.totalorder %v1202_v47, 2  ;;  %v8864_v30 = vsel %vm8832_vm15, 0, %v2339_v39  ;;  %v4104_v53 = vsel %vm4102_vm5, %v8819_v35, %v2141_v56  ;;  %v9778_v38 = vxor.u32 2147483648, %v8452_v9 }
 0x286   : > { %v9779_v16 = vxor.u32 2147483648, %v8440_v43  ;;  %v1305_v34 = vadd.s32 3, %v8438_v32  ;;  %v4108_v57 = vsel %vm4101_vm12, %v4104_v53, %v4107_v15  ;;  %vm4204_vm13 = vcmp.lt.s32.totalorder %v4203_v18, 2  ;;  %v8877_v61 = vpop.eup %6714 }
 0x287   : > { %v1206_v59 = vsel %vm1204_vm9, %v8440_v43, %v9778_v38  ;;  %vm4205_vm2 = vcmp.eq.s32.totalorder %v4203_v18, 0  ;;  %v4109_v8 = vsel %vm2136_vm8, nan, %v4108_v57  ;;  %vm4208_vm15 = vcmp.eq.s32.totalorder %v4203_v18, 2 }
 0x288   : > { %v1209_v37 = vsel %vm1207_vm10, %v9779_v16, %v8452_v9  ;;  %v1306_v33 = vand.u32 3, %v1305_v34  ;;  %v8883_v47 = vpop.eup %6716  ;;  %6199 = vmatmul.mubr.msk.f32.gmra.mrb[8].mxu1 %vm4523_vm11, %v4109_v8  ;;  %v9605_v32 = vxor.u32 2147483648, %v8877_v61  ;;  %v4306_v43 = vand.u32 3, %v8864_v30 }
 0x289   : > { %v1210_v22 = vsel %vm1203_vm6, %v1206_v59, %v1209_v37  ;;  %v9780_v9 = vand.u32 2147483647, %v7952_v62  ;;  %v2442_v13 = vsub.s32 4, %v8131_v1  ;;  %6201 = vmatprep.mubr.msk.f32.mxu1 %vm6751_vm4, %v9661_v36  ;;  %v9606_v39 = vxor.u32 2147483648, %v8883_v47 }
 0x28a   : > { %v1211_v21 = vsel %vm1200_vm1, nan, %v1210_v22  ;;  %vm1307_vm1 = vcmp.lt.s32.totalorder %v1306_v33, 2  ;;  %vm1308_vm9 = vcmp.eq.s32.totalorder %v1306_v33, 0  ;;  %vm1311_vm12 = vcmp.eq.s32.totalorder %v1306_v33, 2 }
 0x28b   : > { %6231 = vmatmul.mubr.msk.f32.gmra.mrb[10].mxu0 %vm4523_vm11, %v1211_v21  ;;  %vm8891_vm10 = vcmp.le.f32.partialorder %v9780_v9, 0.7853982  ;;  %v4210_v15 = vsel %vm4208_vm15, %v9605_v32, %v8883_v47  ;;  %v9783_v53 = vxor.u32 2147483648, %v8495_v46  ;;  %v9784_v59 = vxor.u32 2147483648, %v8490_v3 }
 0x28c   : > { %6233 = vmatprep.mubr.msk.f32.mxu0 %vm6751_vm4, %v9661_v36  ;;  %vm9785_vm5 = vcmp.lt.s32.totalorder %v7952_v62, 0  ;;  %v4207_v34 = vsel %vm4205_vm2, %v8877_v61, %v9606_v39  ;;  %vm2344_vm6 = vweird.f32 %v7904_v58  ;;  %v2444_v22 = vsel %vm8891_vm10, %v7952_v62, %v8431_v10  ;;  %v9787_v10 = vld [vmem:[#allocation2_spill] sm:$0xff] }
 0x28d   : > { %v1310_v38 = vsel %vm1308_vm9, %v8490_v3, %v9783_v53  ;;  %v1313_v16 = vsel %vm1311_vm12, %v9784_v59, %v8495_v46  ;;  %v2443_v37 = vsel %vm9785_vm5, %v2442_v13, %v8131_v1  ;;  %v8923_v8 = vpop.eup %6718  ;;  %v4211_v3 = vsel %vm4204_vm13, %v4207_v34, %v4210_v15  ;;  %v9788_v15 = vld [vmem:[#allocation32_spill] sm:$0xff]  ;;  %v9792_v59 = vld [vmem:[#allocation34_spill] sm:$0xff]  ;;  %v9793_v34 = vld [vmem:[#allocation5_spill] sm:$0xff] }
 0x28e   : > { %v1314_v57 = vsel %vm1307_vm1, %v1310_v38, %v1313_v16  ;;  %vm9786_vm15 = vweird.f32 %v9693_v2  ;;  %v8930_v46 = vsel %vm8891_vm10, 0, %v2443_v37  ;;  %6722 = vcosq.f32 %v2444_v22  ;;  %v8932_v21 = vpop.eup %6720 }
 0x28f   : > { %v1315_v1 = vsel %vm9786_vm15, nan, %v1314_v57  ;;  %v4212_v33 = vsel %vm2240_vm0, nan, %v4211_v3  ;;  %v9603_v9 = vxor.u32 2147483648, %v8923_v8  ;;  %6724 = vsinq.f32 %v2444_v22  ;;  %v9794_v22 = vld [vmem:[#allocation14_spill] sm:$0xff] }
 0x290   : > { %6234 = vmatmul.mubr.msk.f32.gmra.mrb[12].mxu0 %vm4523_vm11, %v1315_v1  ;;  %v1409_v18 = vadd.s32 3, %v9787_v10  ;;  %6202 = vmatmul.mubr.msk.f32.gmra.mrb[10].mxu1 %vm4523_vm11, %v4212_v33  ;;  %v9604_v2 = vxor.u32 2147483648, %v8932_v21  ;;  %vm4307_vm13 = vcmp.lt.s32.totalorder %v4306_v43, 2  ;;  %vm4308_vm2 = vcmp.eq.s32.totalorder %v4306_v43, 0  ;;  %v9795_v10 = vld [vmem:[#allocation18_spill] sm:$0xff] }
 0x291   : > { %vm4311_vm10 = vcmp.eq.s32.totalorder %v4306_v43, 2  ;;  %6236 = vmatprep.mubr.msk.f32.mxu0 %vm6751_vm4, %v9661_v36  ;;  %6204 = vmatprep.mubr.msk.f32.mxu1 %vm6751_vm4, %v9661_v36  ;;  %v9789_v53 = vand.u32 2147483647, %v9788_v15  ;;  %v2546_v16 = vsub.s32 4, %v9792_v59  ;;  %v4409_v37 = vand.u32 3, %v8930_v46 }
 0x292   : > { %v4313_v12 = vsel %vm4311_vm10, %v9603_v9, %v8932_v21  ;;  %v1410_v13 = vand.u32 3, %v1409_v18  ;;  %v4310_v43 = vsel %vm4308_vm2, %v8923_v8, %v9604_v2  ;;  %v1513_v3 = vadd.s32 3, %v9794_v22 }
 0x293   : > { %vm8950_vm1 = vcmp.le.f32.partialorder %v9789_v53, 0.7853982  ;;  %v4314_v1 = vsel %vm4307_vm13, %v4310_v43, %v4313_v12  ;;  %v9796_v18 = vxor.u32 2147483648, %v9795_v10  ;;  %v9797_v53 = vld [vmem:[#allocation3_spill] sm:$0xff]  ;;  %vm9799_vm15 = vcmp.lt.s32.totalorder %v9788_v15, 0  ;;  %v4979_v12 = vld [vmem:[%s9470_s5 + $0x10] sm:$0xff] }
 0x294   : > { %v2548_v57 = vsel %vm8950_vm1, %v9788_v15, %v9793_v34  ;;  %vm1411_vm9 = vcmp.lt.s32.totalorder %v1410_v13, 2  ;;  %vm1412_vm12 = vcmp.eq.s32.totalorder %v1410_v13, 0  ;;  %vm1415_vm5 = vcmp.eq.s32.totalorder %v1410_v13, 2  ;;  %v4980_v13 = vld [vmem:[%s9470_s5 + $0x18] sm:$0xff] }
 0x295   : > { %v4315_v33 = vsel %vm2344_vm6, nan, %v4314_v1  ;;  %v1414_v9 = vsel %vm1412_vm12, %v9797_v53, %v9796_v18  ;;  %v9798_v2 = vxor.u32 2147483648, %v9797_v53  ;;  %v2547_v34 = vsel %vm9799_vm15, %v2546_v16, %v9792_v59  ;;  %v9801_v1 = vld [vmem:[#allocation7_spill] sm:$0xff] }
 0x296   : > { %6205 = vmatmul.mubr.msk.f32.gmra.mrb[12].mxu1 %vm4523_vm11, %v4315_v33  ;;  %vm2448_vm13 = vweird.f32 %v7952_v62  ;;  %6726 = vcosq.f32 %v2548_v57  ;;  %v1514_v22 = vand.u32 3, %v1513_v3  ;;  %vm4410_vm2 = vcmp.lt.s32.totalorder %v4409_v37, 2  ;;  %v9802_v3 = vld [vmem:[#allocation9_spill] sm:$0xff]  ;;  %v9806_v59 = vld [vmem:[#allocation19_spill] sm:$0xff] }
 0x297   : > { %v1417_v32 = vsel %vm1415_vm5, %v9798_v2, %v9795_v10  ;;  %v8985_v2 = vsel %vm8950_vm1, 0, %v2547_v34  ;;  %6207 = vmatprep.mubr.msk.f32.mxu1 %vm6751_vm4, %v9661_v36  ;;  %6728 = vsinq.f32 %v2548_v57  ;;  %v1617_v10 = vadd.s32 3, %v9801_v1  ;;  %v9804_v57 = vld [vmem:[#allocation4_spill] sm:$0xff] }
 0x298   : > { %v1418_v43 = vsel %vm1411_vm9, %v1414_v9, %v1417_v32  ;;  %vm4411_vm10 = vcmp.eq.s32.totalorder %v4409_v37, 0  ;;  %v8994_v32 = vand.u32 3, %v8985_v2  ;;  %vm1516_vm1 = vcmp.eq.s32.totalorder %v1514_v22, 0  ;;  %v8996_v38 = vpop.eup %6722 }
 0x299   : > { %v1419_v16 = vsel %vm1408_vm3, nan, %v1418_v43  ;;  %v6471_v9 = vpack.c.bf16 %v4980_v13, %v4979_v12  ;;  %vm4414_vm9 = vcmp.eq.s32.totalorder %v4409_v37, 2  ;;  %vm1515_vm12 = vcmp.lt.s32.totalorder %v1514_v22, 2  ;;  %v9003_v53 = vpop.eup %6724 }
 0x29a   : > { %6237 = vmatmul.mubr.msk.f32.gmra.mrb[14].mxu0 %vm4523_vm11, %v1419_v16  ;;  %v9803_v33 = vxor.u32 2147483648, %v9802_v3  ;;  %vm1519_vm3 = vcmp.eq.s32.totalorder %v1514_v22, 2  ;;  %v2456_v34 = vxor.u32 2147483648, %v8996_v38  ;;  %v9805_v43 = vxor.u32 2147483648, %v9804_v57 }
 0x29b   : > { %6239 = vmatprep.mubr.msk.f32.mxu0 %vm6751_vm4, %v9661_v36  ;;  %v1618_v13 = vand.u32 3, %v1617_v10  ;;  %6472 = vmatpush3.bf16.msra.mxu0 %v6471_v9  ;;  %v1721_v16 = vadd.s32 3, %v9806_v59  ;;  %v2453_v1 = vxor.u32 2147483648, %v9003_v53  ;;  %v1825_v42 = vadd.s32 3, %v8615_v28 }
 0x29c   : > { %v1518_v18 = vsel %vm1516_vm1, %v9804_v57, %v9803_v33  ;;  %v1521_v12 = vsel %vm1519_vm3, %v9805_v43, %v9802_v3  ;;  %v1929_v33 = vadd.s32 3, %v8665_v63  ;;  %v4416_v22 = vsel %vm4414_vm9, %v2456_v34, %v9003_v53 }
 0x29d   : > { %v1522_v39 = vsel %vm1515_vm12, %v1518_v18, %v1521_v12  ;;  %vm4513_vm5 = vcmp.lt.s32.totalorder %v8994_v32, 2  ;;  %vm4517_vm15 = vcmp.eq.s32.totalorder %v8994_v32, 2  ;;  %vm9807_vm1 = vweird.f32 %v9706_v6 }
 0x29e   : > { %v1523_v10 = vsel %vm9807_vm1, nan, %v1522_v39  ;;  %vm1620_vm3 = vcmp.eq.s32.totalorder %v1618_v13, 0  ;;  %v4413_v9 = vsel %vm4411_vm10, %v8996_v38, %v2453_v1  ;;  %vm2552_vm12 = vweird.f32 %v9788_v15  ;;  %v4959_v15 = vld [vmem:[%s9171_s18 + $0x8] sm:$0xff] }
 0x29f   : > { %6240 = vmatmul.mubr.msk.f32.gmra.mrb[16].mxu0 %vm4523_vm11, %v1523_v10  ;;  %v9808_v28 = vxor.u32 2147483648, %v8591_v7  ;;  %vm1623_vm9 = vcmp.eq.s32.totalorder %v1618_v13, 2  ;;  %v1722_v3 = vand.u32 3, %v1721_v16  ;;  %v4417_v57 = vsel %vm4410_vm2, %v4413_v9, %v4416_v22 }
 0x2a0   : > { %6242 = vmatprep.mubr.msk.f32.mxu0 %vm6751_vm4, %v9661_v36  ;;  %vm1619_vm1 = vcmp.lt.s32.totalorder %v1618_v13, 2  ;;  %v9809_v6 = vxor.u32 2147483648, %v8571_v55  ;;  %v1826_v18 = vand.u32 3, %v1825_v42  ;;  %v4418_v43 = vsel %vm2448_vm13, nan, %v4417_v57  ;;  %v9037_v10 = vpop.eup %6726 }
 0x2a1   : > { %v1622_v63 = vsel %vm1620_vm3, %v8571_v55, %v9808_v28  ;;  %vm1724_vm10 = vcmp.eq.s32.totalorder %v1722_v3, 0  ;;  %v1930_v59 = vand.u32 3, %v1929_v33  ;;  %6208 = vmatmul.mubr.msk.f32.gmra.mrb[14].mxu1 %vm4523_vm11, %v4418_v43  ;;  %vm1723_vm2 = vcmp.lt.s32.totalorder %v1722_v3, 2 }
 0x2a2   : > { %v1625_v39 = vsel %vm1623_vm9, %v9809_v6, %v8591_v7  ;;  %v9810_v13 = vxor.u32 2147483648, %v8638_v48  ;;  %vm1727_vm3 = vcmp.eq.s32.totalorder %v1722_v3, 2  ;;  %v9045_v7 = vpop.eup %6728  ;;  %6210 = vmatprep.mubr.msk.f32.mxu1 %vm6751_vm4, %v9661_v36  ;;  %v2560_v42 = vxor.u32 2147483648, %v9037_v10 }
 0x2a3   : > { %v1626_v12 = vsel %vm1619_vm1, %v1622_v63, %v1625_v39  ;;  %v9811_v16 = vxor.u32 2147483648, %v8617_v49  ;;  %vm1831_vm9 = vcmp.eq.s32.totalorder %v1826_v18, 2  ;;  %v2557_v33 = vxor.u32 2147483648, %v9045_v7 }
 0x2a4   : > { %v1627_v37 = vsel %vm1616_vm7, nan, %v1626_v12  ;;  %v1726_v55 = vsel %vm1724_vm10, %v8617_v49, %v9810_v13  ;;  %vm1828_vm7 = vcmp.eq.s32.totalorder %v1826_v18, 0  ;;  %v1833_v28 = vsel %vm1831_vm9, %v1832_v5, %v8674_v40 }
 0x2a5   : > { %6243 = vmatmul.mubr.msk.f32.gmra.mrb[18].mxu0 %vm4523_vm11, %v1627_v37  ;;  %v1729_v11 = vsel %vm1727_vm3, %v9811_v16, %v8638_v48  ;;  %v1830_v9 = vsel %vm1828_vm7, %v8669_v14, %v1829_v25  ;;  %vm4514_vm1 = vcmp.eq.s32.totalorder %v8994_v32, 0  ;;  %v4519_v49 = vsel %vm4517_vm15, %v2560_v42, %v9045_v7 }
 0x2a6   : > { %6245 = vmatprep.mubr.msk.f32.mxu0 %vm6751_vm4, %v9661_v36  ;;  %v1730_v22 = vsel %vm1723_vm2, %v1726_v55, %v1729_v11  ;;  %vm9812_vm10 = vweird.f32 %v9722_v27  ;;  %vm1827_vm2 = vcmp.lt.s32.totalorder %v1826_v18, 2  ;;  %v4516_v25 = vsel %vm4514_vm1, %v9037_v10, %v2557_v33  ;;  %v4963_v11 = vld [vmem:[%s9171_s18 + $0x28] sm:$0xff] }
 0x2a7   : > { %v1731_v48 = vsel %vm9812_vm10, nan, %v1730_v22  ;;  %v1834_v63 = vsel %vm1827_vm2, %v1830_v9, %v1833_v28  ;;  %vm1932_vm3 = vcmp.eq.s32.totalorder %v1930_v59, 0  ;;  %vm1935_vm7 = vcmp.eq.s32.totalorder %v1930_v59, 2  ;;  %v4965_v22 = vld [vmem:[%s9171_s18 + $0x38] sm:$0xff]  ;;  %v4966_v9 = vld [vmem:[%s9171_s18 + $0x40] sm:$0xff]  ;;  %v4967_v28 = vld [vmem:[%s9171_s18 + $0x48] sm:$0xff] }
 0x2a8   : > { %v4520_v14 = vsel %vm4513_vm5, %v4516_v25, %v4519_v49  ;;  %v1934_v40 = vsel %vm1932_vm3, %v8727_v17, %v1933_v51  ;;  %v1937_v27 = vsel %vm1935_vm7, %v1936_v23, %v8737_v54  ;;  %v2033_v5 = vadd.s32 3, %v8724_v26  ;;  %v4968_v49 = vld [vmem:[%s9171_s18 + $0x50] sm:$0xff]  ;;  %v4970_v25 = vld [vmem:[%s9171_s18 + $0x60] sm:$0xff] }
 0x2a9   : > { %6246 = vmatmul.mubr.msk.f32.gmra.mrb[20].mxu0 %vm4523_vm11, %v1731_v48  ;;  %v4521_v3 = vsel %vm2552_vm12, nan, %v4520_v14  ;;  %v2137_v32 = vadd.s32 3, %v8780_v29  ;;  %vm1931_vm5 = vcmp.lt.s32.totalorder %v1930_v59, 2  ;;  %v1835_v51 = vsel %vm1824_vm14, nan, %v1834_v63  ;;  %v4969_v48 = vld [vmem:[%s9171_s18 + $0x58] sm:$0xff]  ;;  %v4971_v63 = vld [vmem:[%s9171_s18 + $0x68] sm:$0xff] }
 0x2aa   : > { %6248 = vmatprep.mubr.msk.f32.mxu0 %vm6751_vm4, %v9661_v36  ;;  %6211 = vmatmul.mubr.msk.f32.gmra.mrb[16].mxu1 %vm4523_vm11, %v4521_v3  ;;  %v2034_v57 = vand.u32 3, %v2033_v5  ;;  %v1938_v6 = vsel %vm1931_vm5, %v1934_v40, %v1937_v27  ;;  %v2241_v17 = vadd.s32 3, %v8827_v60  ;;  %vm9813_vm14 = vweird.f32 %v7619_v24  ;;  %v5237_v14 = vld [vmem:[%s9471_s6] sm:$0xff]  ;;  %v5238_v40 = vld [vmem:[%s9471_s6 + $0x8] sm:$0xff]  ;;  %v5239_v27 = vld [vmem:[%s9471_s6 + $0x10] sm:$0xff] }
 0x2ab   : > { %6345 = vmatprep.mubr.msk.f32.mxu1 %vm6751_vm4, %v9661_v36  ;;  %v2138_v26 = vand.u32 3, %v2137_v32  ;;  %v1939_v23 = vsel %vm9813_vm14, nan, %v1938_v6  ;;  %v2345_v29 = vadd.s32 3, %v8864_v30  ;;  %v9814_v24 = vxor.u32 2147483648, %v8819_v35  ;;  %v5240_v3 = vld [vmem:[%s9471_s6 + $0x18] sm:$0xff]  ;;  %v4972_v32 = vld [vmem:[%s9171_s18 + $0x70] sm:$0xff] }
 0x2ac   : > { %vm2036_vm15 = vcmp.eq.s32.totalorder %v2034_v57, 0  ;;  %vm2039_vm9 = vcmp.eq.s32.totalorder %v2034_v57, 2  ;;  %vm2035_vm1 = vcmp.lt.s32.totalorder %v2034_v57, 2  ;;  %v2242_v39 = vand.u32 3, %v2241_v17  ;;  %v4974_v6 = vld [vmem:[%s9171_s18 + $0x80] sm:$0xff]  ;;  %v4976_v17 = vld [vmem:[%s9171_s18 + $0x90] sm:$0xff] }
 0x2ad   : > { %6249 = vmatmul.mubr.msk.f32.gmra.mrb[22].mxu0 %vm4523_vm11, %v1835_v51  ;;  %v2038_v54 = vsel %vm2036_vm15, %v8789_v50, %v2037_v31  ;;  %v2041_v41 = vsel %vm2039_vm9, %v2040_v45, %v8799_v0  ;;  %vm2140_vm10 = vcmp.eq.s32.totalorder %v2138_v26, 0  ;;  %vm2143_vm2 = vcmp.eq.s32.totalorder %v2138_v26, 2  ;;  %v4973_v51 = vld [vmem:[%s9171_s18 + $0x78] sm:$0xff] }
 0x2ae   : > { %6251 = vmatprep.mubr.msk.f32.mxu0 %vm6751_vm4, %v9661_v36  ;;  %v2042_v60 = vsel %vm2035_vm1, %v2038_v54, %v2041_v41  ;;  %v2142_v50 = vsel %vm2140_vm10, %v8819_v35, %v2141_v56  ;;  %v2145_v0 = vsel %vm2143_vm2, %v9814_v24, %v8848_v19  ;;  %vm9815_vm3 = vweird.f32 %v7655_v44 }
 0x2af   : > { %v2043_v45 = vsel %vm9815_vm3, nan, %v2042_v60  ;;  %vm2139_vm7 = vcmp.lt.s32.totalorder %v2138_v26, 2  ;;  %v2449_v31 = vadd.s32 3, %v8930_v46  ;;  %vm2244_vm5 = vcmp.eq.s32.totalorder %v2242_v39, 0  ;;  %v4975_v26 = vld [vmem:[%s9171_s18 + $0x88] sm:$0xff] }
 0x2b0   : > { %v2146_v30 = vsel %vm2139_vm7, %v2142_v50, %v2145_v0  ;;  %vm2247_vm15 = vcmp.eq.s32.totalorder %v2242_v39, 2  ;;  %v2346_v18 = vand.u32 3, %v2345_v29  ;;  %v9816_v56 = vxor.u32 2147483648, %v8883_v47 }
 0x2b1   : > { %6252 = vmatmul.mubr.msk.f32.gmra.mrb[24].mxu0 %vm4523_vm11, %v1939_v23  ;;  %v9817_v44 = vxor.u32 2147483648, %v8877_v61  ;;  %v2147_v46 = vsel %vm2136_vm8, nan, %v2146_v30  ;;  %vm2243_vm9 = vcmp.lt.s32.totalorder %v2242_v39, 2  ;;  %v2553_v43 = vadd.s32 3, %v8985_v2 }
 0x2b2   : > { %6254 = vmatprep.mubr.msk.f32.mxu0 %vm6751_vm4, %v9661_v36  ;;  %v2246_v35 = vsel %vm2244_vm5, %v8877_v61, %v9816_v56  ;;  %vm2348_vm14 = vcmp.eq.s32.totalorder %v2346_v18, 0  ;;  %vm2351_vm1 = vcmp.eq.s32.totalorder %v2346_v18, 2  ;;  %v2450_v59 = vand.u32 3, %v2449_v31 }
 0x2b3   : > { %v2249_v19 = vsel %vm2247_vm15, %v9817_v44, %v8883_v47  ;;  %v9818_v37 = vxor.u32 2147483648, %v8932_v21  ;;  %v9819_v20 = vxor.u32 2147483648, %v8923_v8  ;;  %vm2347_vm8 = vcmp.lt.s32.totalorder %v2346_v18, 2 }
 0x2b4   : > { %v2250_v12 = vsel %vm2243_vm9, %v2246_v35, %v2249_v19  ;;  %vm2452_vm10 = vcmp.eq.s32.totalorder %v2450_v59, 0  ;;  %vm2455_vm2 = vcmp.eq.s32.totalorder %v2450_v59, 2  ;;  %v2554_v55 = vand.u32 3, %v2553_v43  ;;  %v5477_v43 = vld [vmem:[%s9472_s7] sm:$0xff] }
 0x2b5   : > { %6255 = vmatmul.mubr.msk.f32.gmra.mrb[26].mxu0 %vm4523_vm11, %v2043_v45  ;;  %v2350_v61 = vsel %vm2348_vm14, %v8923_v8, %v9818_v37  ;;  %v2353_v47 = vsel %vm2351_vm1, %v9819_v20, %v8932_v21  ;;  %v2251_v2 = vsel %vm2240_vm0, nan, %v2250_v12  ;;  %v2454_v16 = vsel %vm2452_vm10, %v8996_v38, %v2453_v1  ;;  %v5478_v12 = vld [vmem:[%s9472_s7 + $0x8] sm:$0xff] }
 0x2b6   : > { %6257 = vmatprep.mubr.msk.f32.mxu0 %vm6751_vm4, %v9661_v36  ;;  %v2354_v13 = vsel %vm2347_vm8, %v2350_v61, %v2353_v47  ;;  %v2457_v4 = vsel %vm2455_vm2, %v2456_v34, %v9003_v53  ;;  %vm2451_vm0 = vcmp.lt.s32.totalorder %v2450_v59, 2  ;;  %vm2556_vm3 = vcmp.eq.s32.totalorder %v2554_v55, 0  ;;  %v4958_v34 = vld [vmem:[%s9171_s18] sm:$0xff]  ;;  %v5479_v47 = vld [vmem:[%s9472_s7 + $0x10] sm:$0xff] }
 0x2b7   : > { %v2355_v8 = vsel %vm2344_vm6, nan, %v2354_v13  ;;  %v2458_v21 = vsel %vm2451_vm0, %v2454_v16, %v2457_v4  ;;  %vm2559_vm7 = vcmp.eq.s32.totalorder %v2554_v55, 2  ;;  %v2558_v1 = vsel %vm2556_vm3, %v9037_v10, %v2557_v33  ;;  %v4960_v10 = vld [vmem:[%s9171_s18 + $0x10] sm:$0xff] }
 0x2b8   : > { %v2561_v38 = vsel %vm2559_vm7, %v2560_v42, %v9045_v7  ;;  %v2459_v58 = vsel %vm2448_vm13, nan, %v2458_v21  ;;  %vm2555_vm6 = vcmp.lt.s32.totalorder %v2554_v55, 2  ;;  %vm4981_vm13 = vcmask 261120   ;;  %v4961_v7 = vld [vmem:[%s9171_s18 + $0x18] sm:$0xff]  ;;  %v4962_v42 = vld [vmem:[%s9171_s18 + $0x20] sm:$0xff]  ;;  %v4964_v33 = vld [vmem:[%s9171_s18 + $0x30] sm:$0xff] }
 0x2b9   : > { %6258 = vmatmul.mubr.msk.f32.gmra.mrb[28].mxu0 %vm4523_vm11, %v2147_v46  ;;  %v2562_v53 = vsel %vm2555_vm6, %v2558_v1, %v2561_v38  ;;  %v6474_v5 = vpack.c.bf16 %v5238_v40, %v5237_v14  ;;  %v6477_v57 = vpack.c.bf16 %v5240_v3, %v5239_v27  ;;  %v6480_v37 = vpack.c.bf16 %v5478_v12, %v5477_v43 }
 0x2ba   : > { %6260 = vmatprep.mubr.msk.f32.mxu0 %vm6751_vm4, %v9661_v36  ;;  %v2563_v62 = vsel %vm2552_vm12, nan, %v2562_v53 }
 0x2bb   : > { %6475 = vmatpush3.bf16.msra.mxu1 %v6474_v5 }
 0x2bc   : > { %6476 = vmatprep.subr.bf16.mxu1 %v9757_v52 }
 0x2bd   : > { %6261 = vmatmul.mubr.msk.f32.gmra.mrb[30].mxu0 %vm4523_vm11, %v2251_v2  ;;  %v5480_v2 = vld [vmem:[%s9472_s7 + $0x18] sm:$0xff] }
 0x2be   : > { %6263 = vmatprep.mubr.msk.f32.mxu0 %vm6751_vm4, %v9661_v36  ;;  %v6483_v55 = vpack.c.bf16 %v5480_v2, %v5479_v47 }
 0x2bf   : > { %6478 = vmatpush3.bf16.msra.mxu1 %v6477_v57 }
 0x2c0   : > { %6479 = vmatprep.subr.bf16.mxu1 %v9757_v52 }
 0x2c1   : > { %6264 = vmatmul.mubr.msk.f32.gmra.mrb[32].mxu0 %vm4523_vm11, %v2355_v8 }
 0x2c2   : > { %6266 = vmatprep.mubr.msk.f32.mxu0 %vm6751_vm4, %v9661_v36 }
 0x2c5   : > { %6267 = vmatmul.mubr.msk.f32.gmra.mrb[34].mxu0 %vm4523_vm11, %v2459_v58 }
 0x2c6   : > { %6269 = vmatprep.mubr.msk.f32.mxu0 %vm6751_vm4, %v9661_v36 }
 0x2c9   : > { %6270 = vmatmul.mubr.msk.f32.gmra.mrb[36].mxu0 %vm4523_vm11, %v2563_v62  ;;  %vm5698_vm11 = vcmask 31744  }
 0x2ca   : > { %6280 = vmatprep.mubr.msk.f32.mxu0 %vm6751_vm4, %v9661_v36 }
 0x2cd   : > { %6281 = vmatmul.mubr.msk.f32.vlgmr.msra.gmra.mrb[0].mxu0 %vm4981_vm13, %v4958_v34 }
 0x2ce   : > { %6283 = vmatprep.mubr.msk.f32.mxu0 %vm6751_vm4, %v9661_v36 }
 0x2d1   : > { %6284 = vmatmul.mubr.msk.f32.gmra.mrb[2].mxu0 %vm4981_vm13, %v4959_v15 }
 0x2d2   : > { %6286 = vmatprep.mubr.msk.f32.mxu0 %vm6751_vm4, %v9661_v36 }
 0x2d5   : > { %6287 = vmatmul.mubr.msk.f32.gmra.mrb[4].mxu0 %vm4981_vm13, %v4960_v10 }
 0x2d6   : > { %6289 = vmatprep.mubr.msk.f32.mxu0 %vm6751_vm4, %v9661_v36 }
 0x2d9   : > { %6290 = vmatmul.mubr.msk.f32.gmra.mrb[6].mxu0 %vm4981_vm13, %v4961_v7 }
 0x2da   : > { %6292 = vmatprep.mubr.msk.f32.mxu0 %vm6751_vm4, %v9661_v36 }
 0x2dd   : > { %6293 = vmatmul.mubr.msk.f32.gmra.mrb[8].mxu0 %vm4981_vm13, %v4962_v42 }
 0x2de   : > { %6295 = vmatprep.mubr.msk.f32.mxu0 %vm6751_vm4, %v9661_v36 }
 0x2e1   : > { %6296 = vmatmul.mubr.msk.f32.gmra.mrb[10].mxu0 %vm4981_vm13, %v4963_v11 }
 0x2e2   : > { %6298 = vmatprep.mubr.msk.f32.mxu0 %vm6751_vm4, %v9661_v36 }
 0x2e5   : > { %6299 = vmatmul.mubr.msk.f32.gmra.mrb[12].mxu0 %vm4981_vm13, %v4964_v33 }
 0x2e6   : > { %6301 = vmatprep.mubr.msk.f32.mxu0 %vm6751_vm4, %v9661_v36 }
 0x2e9   : > { %6302 = vmatmul.mubr.msk.f32.gmra.mrb[14].mxu0 %vm4981_vm13, %v4965_v22 }
 0x2ea   : > { %6304 = vmatprep.mubr.msk.f32.mxu0 %vm6751_vm4, %v9661_v36 }
 0x2ed   : > { %6305 = vmatmul.mubr.msk.f32.gmra.mrb[16].mxu0 %vm4981_vm13, %v4966_v9 }
 0x2ee   : > { %6307 = vmatprep.mubr.msk.f32.mxu0 %vm6751_vm4, %v9661_v36 }
 0x2f1   : > { %6308 = vmatmul.mubr.msk.f32.gmra.mrb[18].mxu0 %vm4981_vm13, %v4967_v28 }
 0x2f2   : > { %6310 = vmatprep.mubr.msk.f32.mxu0 %vm6751_vm4, %v9661_v36 }
 0x2f5   : > { %6311 = vmatmul.mubr.msk.f32.gmra.mrb[20].mxu0 %vm4981_vm13, %v4968_v49 }
 0x2f6   : > { %6313 = vmatprep.mubr.msk.f32.mxu0 %vm6751_vm4, %v9661_v36 }
 0x2f9   : > { %6314 = vmatmul.mubr.msk.f32.gmra.mrb[22].mxu0 %vm4981_vm13, %v4969_v48 }
 0x2fa   : > { %6316 = vmatprep.mubr.msk.f32.mxu0 %vm6751_vm4, %v9661_v36 }
 0x2fd   : > { %6317 = vmatmul.mubr.msk.f32.gmra.mrb[24].mxu0 %vm4981_vm13, %v4970_v25 }
 0x2fe   : > { %6319 = vmatprep.mubr.msk.f32.mxu0 %vm6751_vm4, %v9661_v36 }
 0x301   : > { %6320 = vmatmul.mubr.msk.f32.gmra.mrb[26].mxu0 %vm4981_vm13, %v4971_v63 }
 0x302   : > { %6322 = vmatprep.mubr.msk.f32.mxu0 %vm6751_vm4, %v9661_v36 }
 0x305   : > { %6323 = vmatmul.mubr.msk.f32.gmra.mrb[28].mxu0 %vm4981_vm13, %v4972_v32 }
 0x306   : > { %6325 = vmatprep.mubr.msk.f32.mxu0 %vm6751_vm4, %v9661_v36 }
 0x309   : > { %6326 = vmatmul.mubr.msk.f32.gmra.mrb[30].mxu0 %vm4981_vm13, %v4973_v51 }
 0x30a   : > { %6328 = vmatprep.mubr.msk.f32.mxu0 %vm6751_vm4, %v9661_v36 }
 0x30d   : > { %6329 = vmatmul.mubr.msk.f32.gmra.mrb[32].mxu0 %vm4981_vm13, %v4974_v6 }
 0x30e   : > { %6331 = vmatprep.mubr.msk.f32.mxu0 %vm6751_vm4, %v9661_v36 }
 0x311   : > { %6332 = vmatmul.mubr.msk.f32.gmra.mrb[34].mxu0 %vm4981_vm13, %v4975_v26 }
 0x312   : > { %6334 = vmatprep.mubr.msk.f32.mxu0 %vm6751_vm4, %v9661_v36 }
 0x315   : > { %6335 = vmatmul.mubr.msk.f32.gmra.mrb[36].mxu0 %vm4981_vm13, %v4976_v17 }
 0x33b   : > { %v9266_v54 = vpop.f32.mrb[0].mxu1 }
 0x33c   : > { %v6188_v41 = vpop.f32.mrb[1].mxu1 }
 0x343   : > { %v9268_v23 = vpop.f32.mrb[2].mxu1 }
 0x344   : > { %v6191_v29 = vpop.f32.mrb[3].mxu1 }
 0x34a   : > { %v9270_v60 = vpop.f32.mrb[4].mxu1 }
 0x34b   : > { %v6194_v39 = vpop.f32.mrb[5].mxu1 }
 0x354   : > { %v9272_v50 = vpop.f32.mrb[6].mxu1 }
 0x355   : > { %v6197_v24 = vpop.f32.mrb[7].mxu1 }
 0x35b   : > { %v9274_v0 = vpop.f32.mrb[8].mxu1 }
 0x35c   : > { %v6200_v45 = vpop.f32.mrb[9].mxu1 }
 0x363   : > { %v9276_v31 = vpop.f32.mrb[10].mxu1 }
 0x364   : > { %v6203_v30 = vpop.f32.mrb[11].mxu1 }
 0x369   : > { %v9278_v18 = vpop.f32.mrb[12].mxu1 }
 0x36a   : > { %v6206_v56 = vpop.f32.mrb[13].mxu1 }
 0x374   : > { %v9280_v35 = vpop.f32.mrb[14].mxu1 }
 0x375   : > { %v6209_v44 = vpop.f32.mrb[15].mxu1 }
 0x37d   : > { %v9282_v19 = vpop.f32.mrb[16].mxu1 }
 0x37e   : > { %v6212_v46 = vpop.f32.mrb[17].mxu1 }
 0x3a0   : > { %v5105_v59 = vpop.f32.mrb[0].mxu0 }
 0x3a1   : > { %v5218_v61 = vmax.f32 %v5105_v59, 0.0  ;;  %v6282_v20 = vpop.f32.mrb[1].mxu0 }
 0x3a3   : > { %6346 = vmatmul.mubr.msk.f32.vlgmr.msra.gmra.mrb[18].mxu1 %vm4981_vm13, %v5218_v61 }
 0x3a4   : > { %v5110_v13 = vpop.f32.mrb[2].mxu0  ;;  %6348 = vmatprep.mubr.msk.f32.mxu1 %vm6751_vm4, %v9661_v36  ;;  %6481 = vmatpush3.bf16.msra.mxu1 %v6480_v37 }
 0x3a5   : > { %v5219_v16 = vmax.f32 %v5110_v13, 0.0  ;;  %v6285_v4 = vpop.f32.mrb[3].mxu0  ;;  %6482 = vmatprep.subr.bf16.mxu1 %v9757_v52 }
 0x3a7   : > { %6349 = vmatmul.mubr.msk.f32.gmra.mrb[20].mxu1 %vm4981_vm13, %v5219_v16 }
 0x3a8   : > { %v5115_v8 = vpop.f32.mrb[4].mxu0  ;;  %6351 = vmatprep.mubr.msk.f32.mxu1 %vm6751_vm4, %v9661_v36  ;;  %6484 = vmatpush3.bf16.msra.mxu1 %v6483_v55 }
 0x3a9   : > { %v5220_v21 = vmax.f32 %v5115_v8, 0.0  ;;  %v6288_v1 = vpop.f32.mrb[5].mxu0 }
 0x3ab   : > { %6352 = vmatmul.mubr.msk.f32.gmra.mrb[22].mxu1 %vm4981_vm13, %v5220_v21 }
 0x3ac   : > { %v5120_v38 = vpop.f32.mrb[6].mxu0  ;;  %6354 = vmatprep.mubr.msk.f32.mxu1 %vm6751_vm4, %v9661_v36 }
 0x3ad   : > { %v5221_v58 = vmax.f32 %v5120_v38, 0.0  ;;  %v6291_v53 = vpop.f32.mrb[7].mxu0 }
 0x3af   : > { %6355 = vmatmul.mubr.msk.f32.gmra.mrb[24].mxu1 %vm4981_vm13, %v5221_v58 }
 0x3b0   : > { %v5125_v52 = vpop.f32.mrb[8].mxu0  ;;  %6357 = vmatprep.mubr.msk.f32.mxu1 %vm6751_vm4, %v9661_v36 }
 0x3b1   : > { %v5222_v62 = vmax.f32 %v5125_v52, 0.0  ;;  %v6294_v34 = vpop.f32.mrb[9].mxu0 }
 0x3b3   : > { %6358 = vmatmul.mubr.msk.f32.gmra.mrb[26].mxu1 %vm4981_vm13, %v5222_v62 }
 0x3b4   : > { %v5130_v15 = vpop.f32.mrb[10].mxu0  ;;  %6360 = vmatprep.mubr.msk.f32.mxu1 %vm6751_vm4, %v9661_v36 }
 0x3b5   : > { %v5223_v10 = vmax.f32 %v5130_v15, 0.0  ;;  %v6297_v7 = vpop.f32.mrb[11].mxu0 }
 0x3b7   : > { %6361 = vmatmul.mubr.msk.f32.gmra.mrb[28].mxu1 %vm4981_vm13, %v5223_v10 }
 0x3b8   : > { %v5135_v42 = vpop.f32.mrb[12].mxu0  ;;  %6363 = vmatprep.mubr.msk.f32.mxu1 %vm6751_vm4, %v9661_v36 }
 0x3b9   : > { %v5224_v11 = vmax.f32 %v5135_v42, 0.0  ;;  %v6300_v33 = vpop.f32.mrb[13].mxu0 }
 0x3bb   : > { %6364 = vmatmul.mubr.msk.f32.gmra.mrb[30].mxu1 %vm4981_vm13, %v5224_v11 }
 0x3bc   : > { %v5140_v22 = vpop.f32.mrb[14].mxu0  ;;  %6366 = vmatprep.mubr.msk.f32.mxu1 %vm6751_vm4, %v9661_v36 }
 0x3bd   : > { %v5225_v9 = vmax.f32 %v5140_v22, 0.0  ;;  %v6303_v28 = vpop.f32.mrb[15].mxu0 }
 0x3bf   : > { %6367 = vmatmul.mubr.msk.f32.gmra.mrb[32].mxu1 %vm4981_vm13, %v5225_v9 }
 0x3c0   : > { %v5145_v49 = vpop.f32.mrb[16].mxu0  ;;  %6369 = vmatprep.mubr.msk.f32.mxu1 %vm6751_vm4, %v9661_v36 }
 0x3c1   : > { %v5226_v48 = vmax.f32 %v5145_v49, 0.0  ;;  %v6306_v25 = vpop.f32.mrb[17].mxu0 }
 0x3c3   : > { %6370 = vmatmul.mubr.msk.f32.gmra.mrb[34].mxu1 %vm4981_vm13, %v5226_v48 }
 0x3c4   : > { %v5150_v63 = vpop.f32.mrb[18].mxu0  ;;  %6372 = vmatprep.mubr.msk.f32.mxu1 %vm6751_vm4, %v9661_v36 }
 0x3c5   : > { %v5227_v14 = vmax.f32 %v5150_v63, 0.0  ;;  %v6309_v40 = vpop.f32.mrb[19].mxu0 }
 0x3c7   : > { %6373 = vmatmul.mubr.msk.f32.gmra.mrb[36].mxu1 %vm4981_vm13, %v5227_v14 }
 0x3c8   : > { %v5155_v27 = vpop.f32.mrb[20].mxu0  ;;  %6375 = vmatprep.mubr.msk.f32.mxu1 %vm6751_vm4, %v9661_v36 }
 0x3c9   : > { %v6487_v5 = vadd.f32 %v5155_v27, %v9266_v54  ;;  %v6312_v3 = vpop.f32.mrb[21].mxu0 }
 0x3cb   : > { %v5228_v32 = vmax.f32 %v6487_v5, 0.0 }
 0x3cc   : > { %v5160_v57 = vpop.f32.mrb[22].mxu0 }
 0x3cd   : > { %v6488_v51 = vadd.f32 %v5160_v57, %v9268_v23  ;;  %v6315_v6 = vpop.f32.mrb[23].mxu0  ;;  %6376 = vmatmul.mubr.msk.f32.gmra.mrb[38].mxu1 %vm4981_vm13, %v5228_v32 }
 0x3ce   : > { %6378 = vmatprep.mubr.msk.f32.mxu1 %vm6751_vm4, %v9661_v36 }
 0x3cf   : > { %v5229_v26 = vmax.f32 %v6488_v51, 0.0 }
 0x3d0   : > { %v5165_v17 = vpop.f32.mrb[24].mxu0 }
 0x3d1   : > { %v6489_v41 = vadd.f32 %v5165_v17, %v9270_v60  ;;  %v6318_v29 = vpop.f32.mrb[25].mxu0  ;;  %6379 = vmatmul.mubr.msk.f32.gmra.mrb[40].mxu1 %vm4981_vm13, %v5229_v26 }
 0x3d2   : > { %6381 = vmatprep.mubr.msk.f32.mxu1 %vm6751_vm4, %v9661_v36 }
 0x3d3   : > { %v5230_v54 = vmax.f32 %v6489_v41, 0.0 }
 0x3d4   : > { %v5170_v39 = vpop.f32.mrb[26].mxu0 }
 0x3d5   : > { %v6490_v23 = vadd.f32 %v5170_v39, %v9272_v50  ;;  %v6321_v24 = vpop.f32.mrb[27].mxu0  ;;  %6382 = vmatmul.mubr.msk.f32.gmra.mrb[42].mxu1 %vm4981_vm13, %v5230_v54 }
 0x3d6   : > { %6384 = vmatprep.mubr.msk.f32.mxu1 %vm6751_vm4, %v9661_v36 }
 0x3d7   : > { %v5231_v45 = vmax.f32 %v6490_v23, 0.0 }
 0x3d8   : > { %v5175_v30 = vpop.f32.mrb[28].mxu0 }
 0x3d9   : > { %v6491_v60 = vadd.f32 %v5175_v30, %v9274_v0  ;;  %v6324_v56 = vpop.f32.mrb[29].mxu0  ;;  %6385 = vmatmul.mubr.msk.f32.gmra.mrb[44].mxu1 %vm4981_vm13, %v5231_v45 }
 0x3da   : > { %6387 = vmatprep.mubr.msk.f32.mxu1 %vm6751_vm4, %v9661_v36 }
 0x3db   : > { %v5232_v44 = vmax.f32 %v6491_v60, 0.0 }
 0x3dc   : > { %v5180_v46 = vpop.f32.mrb[30].mxu0 }
 0x3dd   : > { %v6492_v50 = vadd.f32 %v5180_v46, %v9276_v31  ;;  %v6327_v43 = vpop.f32.mrb[31].mxu0  ;;  %6388 = vmatmul.mubr.msk.f32.gmra.mrb[46].mxu1 %vm4981_vm13, %v5232_v44 }
 0x3de   : > { %6390 = vmatprep.mubr.msk.f32.mxu1 %vm6751_vm4, %v9661_v36 }
 0x3df   : > { %v5233_v12 = vmax.f32 %v6492_v50, 0.0 }
 0x3e0   : > { %v5185_v59 = vpop.f32.mrb[32].mxu0 }
 0x3e1   : > { %v6493_v0 = vadd.f32 %v5185_v59, %v9278_v18  ;;  %v6330_v37 = vpop.f32.mrb[33].mxu0  ;;  %6391 = vmatmul.mubr.msk.f32.gmra.mrb[48].mxu1 %vm4981_vm13, %v5233_v12 }
 0x3e2   : > { %6393 = vmatprep.mubr.msk.f32.mxu1 %vm6751_vm4, %v9661_v36 }
 0x3e3   : > { %v5234_v61 = vmax.f32 %v6493_v0, 0.0 }
 0x3e4   : > { %v5190_v20 = vpop.f32.mrb[34].mxu0 }
 0x3e5   : > { %v6494_v31 = vadd.f32 %v5190_v20, %v9280_v35  ;;  %v6333_v47 = vpop.f32.mrb[35].mxu0  ;;  %6394 = vmatmul.mubr.msk.f32.gmra.mrb[50].mxu1 %vm4981_vm13, %v5234_v61 }
 0x3e6   : > { %6396 = vmatprep.mubr.msk.f32.mxu1 %vm6751_vm4, %v9661_v36 }
 0x3e7   : > { %v5235_v2 = vmax.f32 %v6494_v31, 0.0 }
 0x3e8   : > { %v5195_v13 = vpop.f32.mrb[36].mxu0 }
 0x3e9   : > { %v6495_v18 = vadd.f32 %v5195_v13, %v9282_v19  ;;  %v6336_v55 = vpop.f32.mrb[37].mxu0  ;;  %6397 = vmatmul.mubr.msk.f32.gmra.mrb[52].mxu1 %vm4981_vm13, %v5235_v2 }
 0x3ea   : > { %6399 = vmatprep.mubr.msk.f32.mxu1 %vm6751_vm4, %v9661_v36 }
 0x3eb   : > { %v5236_v16 = vmax.f32 %v6495_v18, 0.0 }
 0x3ed   : > { %6400 = vmatmul.mubr.msk.f32.gmra.mrb[54].mxu1 %vm4981_vm13, %v5236_v16 }
 0x3ee   : > { %6410 = vmatprep.mubr.msk.f32.mxu1 %vm6751_vm4, %v9661_v36 }
 0x476   : > { %v5364_v35 = vpop.f32.mrb[18].mxu1 }
 0x477   : > { %v5458_v4 = vmax.f32 %v5364_v35, 0.0  ;;  %v6347_v8 = vpop.f32.mrb[19].mxu1 }
 0x479   : > { %6411 = vmatmul.mubr.msk.f32.vlgmr.msra.gmra.mrb[56].mxu1 %vm4981_vm13, %v5458_v4 }
 0x47a   : > { %v5369_v21 = vpop.f32.mrb[20].mxu1  ;;  %6413 = vmatprep.mubr.msk.f32.mxu1 %vm6751_vm4, %v9661_v36 }
 0x47b   : > { %v5459_v19 = vmax.f32 %v5369_v21, 0.0  ;;  %v6350_v1 = vpop.f32.mrb[21].mxu1 }
 0x47d   : > { %6414 = vmatmul.mubr.msk.f32.gmra.mrb[58].mxu1 %vm4981_vm13, %v5459_v19 }
 0x47e   : > { %v5374_v38 = vpop.f32.mrb[22].mxu1  ;;  %6416 = vmatprep.mubr.msk.f32.mxu1 %vm6751_vm4, %v9661_v36 }
 0x47f   : > { %v5460_v58 = vmax.f32 %v5374_v38, 0.0  ;;  %v6353_v53 = vpop.f32.mrb[23].mxu1 }
 0x481   : > { %6417 = vmatmul.mubr.msk.f32.gmra.mrb[60].mxu1 %vm4981_vm13, %v5460_v58 }
 0x482   : > { %v5379_v52 = vpop.f32.mrb[24].mxu1  ;;  %6419 = vmatprep.mubr.msk.f32.mxu1 %vm6751_vm4, %v9661_v36 }
 0x483   : > { %v5461_v62 = vmax.f32 %v5379_v52, 0.0  ;;  %v6356_v34 = vpop.f32.mrb[25].mxu1 }
 0x485   : > { %6420 = vmatmul.mubr.msk.f32.gmra.mrb[62].mxu1 %vm4981_vm13, %v5461_v62 }
 0x486   : > { %v5384_v15 = vpop.f32.mrb[26].mxu1  ;;  %6422 = vmatprep.mubr.msk.f32.mxu1 %vm6751_vm4, %v9661_v36 }
 0x487   : > { %v5462_v10 = vmax.f32 %v5384_v15, 0.0  ;;  %v6359_v7 = vpop.f32.mrb[27].mxu1 }
 0x489   : > { %6423 = vmatmul.mubr.msk.f32.gmra.mrb[64].mxu1 %vm4981_vm13, %v5462_v10 }
 0x48a   : > { %v5389_v42 = vpop.f32.mrb[28].mxu1  ;;  %6425 = vmatprep.mubr.msk.f32.mxu1 %vm6751_vm4, %v9661_v36 }
 0x48b   : > { %v5463_v11 = vmax.f32 %v5389_v42, 0.0  ;;  %v6362_v33 = vpop.f32.mrb[29].mxu1 }
 0x48d   : > { %6426 = vmatmul.mubr.msk.f32.gmra.mrb[66].mxu1 %vm4981_vm13, %v5463_v11 }
 0x48e   : > { %v5394_v22 = vpop.f32.mrb[30].mxu1  ;;  %6428 = vmatprep.mubr.msk.f32.mxu1 %vm6751_vm4, %v9661_v36 }
 0x48f   : > { %v5464_v9 = vmax.f32 %v5394_v22, 0.0  ;;  %v6365_v28 = vpop.f32.mrb[31].mxu1 }
 0x491   : > { %6429 = vmatmul.mubr.msk.f32.gmra.mrb[68].mxu1 %vm4981_vm13, %v5464_v9 }
 0x492   : > { %v5399_v49 = vpop.f32.mrb[32].mxu1  ;;  %6431 = vmatprep.mubr.msk.f32.mxu1 %vm6751_vm4, %v9661_v36 }
 0x493   : > { %v5465_v48 = vmax.f32 %v5399_v49, 0.0  ;;  %v6368_v25 = vpop.f32.mrb[33].mxu1 }
 0x495   : > { %6432 = vmatmul.mubr.msk.f32.gmra.mrb[70].mxu1 %vm4981_vm13, %v5465_v48 }
 0x496   : > { %v5404_v63 = vpop.f32.mrb[34].mxu1  ;;  %6434 = vmatprep.mubr.msk.f32.mxu1 %vm6751_vm4, %v9661_v36 }
 0x497   : > { %v5466_v14 = vmax.f32 %v5404_v63, 0.0  ;;  %v6371_v40 = vpop.f32.mrb[35].mxu1 }
 0x499   : > { %6435 = vmatmul.mubr.msk.f32.gmra.mrb[72].mxu1 %vm4981_vm13, %v5466_v14 }
 0x49a   : > { %v5409_v27 = vpop.f32.mrb[36].mxu1  ;;  %6437 = vmatprep.mubr.msk.f32.mxu1 %vm6751_vm4, %v9661_v36 }
 0x49b   : > { %v5467_v5 = vmax.f32 %v5409_v27, 0.0  ;;  %v6374_v3 = vpop.f32.mrb[37].mxu1 }
 0x49d   : > { %6438 = vmatmul.mubr.msk.f32.gmra.mrb[74].mxu1 %vm4981_vm13, %v5467_v5 }
 0x49e   : > { %6440 = vmatprep.mubr.msk.f32.mxu1 %vm6751_vm4, %v9661_v36 }
 0x4a0   : > { %v5414_v32 = vpop.f32.mrb[38].mxu1 }
 0x4a1   : > { %v5468_v57 = vmax.f32 %v5414_v32, 0.0  ;;  %v6377_v51 = vpop.f32.mrb[39].mxu1 }
 0x4a3   : > { %6441 = vmatmul.mubr.msk.f32.gmra.mrb[76].mxu1 %vm4981_vm13, %v5468_v57 }
 0x4a4   : > { %v5419_v6 = vpop.f32.mrb[40].mxu1  ;;  %6443 = vmatprep.mubr.msk.f32.mxu1 %vm6751_vm4, %v9661_v36 }
 0x4a5   : > { %v5469_v26 = vmax.f32 %v5419_v6, 0.0  ;;  %v6380_v17 = vpop.f32.mrb[41].mxu1 }
 0x4a7   : > { %6444 = vmatmul.mubr.msk.f32.gmra.mrb[78].mxu1 %vm4981_vm13, %v5469_v26 }
 0x4a8   : > { %v5424_v41 = vpop.f32.mrb[42].mxu1  ;;  %6446 = vmatprep.mubr.msk.f32.mxu1 %vm6751_vm4, %v9661_v36 }
 0x4a9   : > { %v5470_v29 = vmax.f32 %v5424_v41, 0.0  ;;  %v6383_v54 = vpop.f32.mrb[43].mxu1 }
 0x4ab   : > { %6447 = vmatmul.mubr.msk.f32.gmra.mrb[80].mxu1 %vm4981_vm13, %v5470_v29 }
 0x4ac   : > { %v5429_v39 = vpop.f32.mrb[44].mxu1  ;;  %6449 = vmatprep.mubr.msk.f32.mxu1 %vm6751_vm4, %v9661_v36 }
 0x4ad   : > { %v5471_v23 = vmax.f32 %v5429_v39, 0.0  ;;  %v6386_v24 = vpop.f32.mrb[45].mxu1 }
 0x4af   : > { %6450 = vmatmul.mubr.msk.f32.gmra.mrb[82].mxu1 %vm4981_vm13, %v5471_v23 }
 0x4b0   : > { %v5434_v45 = vpop.f32.mrb[46].mxu1  ;;  %6452 = vmatprep.mubr.msk.f32.mxu1 %vm6751_vm4, %v9661_v36 }
 0x4b1   : > { %v5472_v30 = vmax.f32 %v5434_v45, 0.0  ;;  %v6389_v60 = vpop.f32.mrb[47].mxu1 }
 0x4b3   : > { %6453 = vmatmul.mubr.msk.f32.gmra.mrb[84].mxu1 %vm4981_vm13, %v5472_v30 }
 0x4b4   : > { %v5439_v56 = vpop.f32.mrb[48].mxu1  ;;  %6455 = vmatprep.mubr.msk.f32.mxu1 %vm6751_vm4, %v9661_v36 }
 0x4b5   : > { %v5473_v44 = vmax.f32 %v5439_v56, 0.0  ;;  %v6392_v46 = vpop.f32.mrb[49].mxu1 }
 0x4b7   : > { %6456 = vmatmul.mubr.msk.f32.gmra.mrb[86].mxu1 %vm4981_vm13, %v5473_v44 }
 0x4b8   : > { %v5444_v50 = vpop.f32.mrb[50].mxu1  ;;  %6458 = vmatprep.mubr.msk.f32.mxu1 %vm6751_vm4, %v9661_v36 }
 0x4b9   : > { %v5474_v43 = vmax.f32 %v5444_v50, 0.0  ;;  %v6395_v12 = vpop.f32.mrb[51].mxu1 }
 0x4bb   : > { %6459 = vmatmul.mubr.msk.f32.gmra.mrb[88].mxu1 %vm4981_vm13, %v5474_v43 }
 0x4bc   : > { %v5449_v59 = vpop.f32.mrb[52].mxu1  ;;  %6461 = vmatprep.mubr.msk.f32.mxu1 %vm6751_vm4, %v9661_v36 }
 0x4bd   : > { %v5475_v0 = vmax.f32 %v5449_v59, 0.0  ;;  %v6398_v37 = vpop.f32.mrb[53].mxu1 }
 0x4bf   : > { %6462 = vmatmul.mubr.msk.f32.gmra.mrb[90].mxu1 %vm4981_vm13, %v5475_v0 }
 0x4c0   : > { %v5454_v61 = vpop.f32.mrb[54].mxu1  ;;  %6464 = vmatprep.mubr.msk.f32.mxu1 %vm6751_vm4, %v9661_v36 }
 0x4c1   : > { %v5476_v20 = vmax.f32 %v5454_v61, 0.0  ;;  %v6401_v31 = vpop.f32.mrb[55].mxu1 }
 0x4c3   : > { %6465 = vmatmul.mubr.msk.f32.gmra.mrb[92].mxu1 %vm4981_vm13, %v5476_v20 }
 0x54c   : > { %v5604_v47 = vpop.f32.mrb[56].mxu1 }
 0x54d   : > { %5699 = vst.msk [vmem:[%s9422_s17] sm:$0xff] %vm5698_vm11, %v5604_v47  ;;  %v6412_v36 = vpop.f32.mrb[57].mxu1 }
 0x550   : > { %v5609_v2 = vpop.f32.mrb[58].mxu1 }
 0x551   : > { %5700 = vst.msk [vmem:[%s9422_s17 + $0x8] sm:$0xff] %vm5698_vm11, %v5609_v2  ;;  %v6415_v13 = vpop.f32.mrb[59].mxu1 }
 0x554   : > { %v5614_v18 = vpop.f32.mrb[60].mxu1 }
 0x555   : > { %5701 = vst.msk [vmem:[%s9422_s17 + $0x10] sm:$0xff] %vm5698_vm11, %v5614_v18  ;;  %v6418_v55 = vpop.f32.mrb[61].mxu1 }
 0x558   : > { %v5619_v16 = vpop.f32.mrb[62].mxu1 }
 0x559   : > { %5702 = vst.msk [vmem:[%s9422_s17 + $0x18] sm:$0xff] %vm5698_vm11, %v5619_v16  ;;  %v6421_v35 = vpop.f32.mrb[63].mxu1 }
 0x55c   : > { %v5624_v4 = vpop.f32.mrb[64].mxu1 }
 0x55d   : > { %5703 = vst.msk [vmem:[%s9422_s17 + $0x20] sm:$0xff] %vm5698_vm11, %v5624_v4  ;;  %v6424_v8 = vpop.f32.mrb[65].mxu1 }
 0x560   : > { %v5629_v21 = vpop.f32.mrb[66].mxu1 }
 0x561   : > { %5704 = vst.msk [vmem:[%s9422_s17 + $0x28] sm:$0xff] %vm5698_vm11, %v5629_v21  ;;  %v6427_v19 = vpop.f32.mrb[67].mxu1 }
 0x564   : > { %v5634_v1 = vpop.f32.mrb[68].mxu1 }
 0x565   : > { %5705 = vst.msk [vmem:[%s9422_s17 + $0x30] sm:$0xff] %vm5698_vm11, %v5634_v1  ;;  %v6430_v38 = vpop.f32.mrb[69].mxu1 }
 0x568   : > { %v5639_v58 = vpop.f32.mrb[70].mxu1 }
 0x569   : > { %5706 = vst.msk [vmem:[%s9422_s17 + $0x38] sm:$0xff] %vm5698_vm11, %v5639_v58  ;;  %v6433_v53 = vpop.f32.mrb[71].mxu1 }
 0x56c   : > { %v5644_v52 = vpop.f32.mrb[72].mxu1 }
 0x56d   : > { %5707 = vst.msk [vmem:[%s9422_s17 + $0x40] sm:$0xff] %vm5698_vm11, %v5644_v52  ;;  %v6436_v62 = vpop.f32.mrb[73].mxu1 }
 0x570   : > { %v5649_v34 = vpop.f32.mrb[74].mxu1 }
 0x571   : > { %5708 = vst.msk [vmem:[%s9422_s17 + $0x48] sm:$0xff] %vm5698_vm11, %v5649_v34  ;;  %v6439_v15 = vpop.f32.mrb[75].mxu1 }
 0x576   : > { %v5654_v10 = vpop.f32.mrb[76].mxu1 }
 0x577   : > { %5709 = vst.msk [vmem:[%s9422_s17 + $0x50] sm:$0xff] %vm5698_vm11, %v5654_v10  ;;  %v6442_v7 = vpop.f32.mrb[77].mxu1 }
 0x57a   : > { %v5659_v42 = vpop.f32.mrb[78].mxu1 }
 0x57b   : > { %5710 = vst.msk [vmem:[%s9422_s17 + $0x58] sm:$0xff] %vm5698_vm11, %v5659_v42  ;;  %v6445_v11 = vpop.f32.mrb[79].mxu1 }
 0x57e   : > { %v5664_v33 = vpop.f32.mrb[80].mxu1 }
 0x57f   : > { %5711 = vst.msk [vmem:[%s9422_s17 + $0x60] sm:$0xff] %vm5698_vm11, %v5664_v33  ;;  %v6448_v22 = vpop.f32.mrb[81].mxu1 }
 0x582   : > { %v5669_v9 = vpop.f32.mrb[82].mxu1 }
 0x583   : > { %5712 = vst.msk [vmem:[%s9422_s17 + $0x68] sm:$0xff] %vm5698_vm11, %v5669_v9  ;;  %v6451_v28 = vpop.f32.mrb[83].mxu1 }
 0x586   : > { %v5674_v49 = vpop.f32.mrb[84].mxu1 }
 0x587   : > { %5713 = vst.msk [vmem:[%s9422_s17 + $0x70] sm:$0xff] %vm5698_vm11, %v5674_v49  ;;  %v6454_v48 = vpop.f32.mrb[85].mxu1 }
 0x58a   : > { %v5679_v25 = vpop.f32.mrb[86].mxu1 }
 0x58b   : > { %5714 = vst.msk [vmem:[%s9422_s17 + $0x78] sm:$0xff] %vm5698_vm11, %v5679_v25  ;;  %v6457_v63 = vpop.f32.mrb[87].mxu1 }
 0x58e   : > { %v5684_v14 = vpop.f32.mrb[88].mxu1 }
 0x58f   : > { %5715 = vst.msk [vmem:[%s9422_s17 + $0x80] sm:$0xff] %vm5698_vm11, %v5684_v14  ;;  %v6460_v40 = vpop.f32.mrb[89].mxu1 }
 0x592   : > { %v5689_v27 = vpop.f32.mrb[90].mxu1 }
 0x593   : > { %5716 = vst.msk [vmem:[%s9422_s17 + $0x88] sm:$0xff] %vm5698_vm11, %v5689_v27  ;;  %v6463_v5 = vpop.f32.mrb[91].mxu1 }
 0x596   : > { %v5694_v3 = vpop.f32.mrb[92].mxu1 }
 0x597   : > { %5717 = vst.msk [vmem:[%s9422_s17 + $0x90] sm:$0xff] %vm5698_vm11, %v5694_v3  ;;  %v6466_v32 = vpop.f32.mrb[93].mxu1 }
 0x598 PF: > { %s18_s27 = sadd.s32 1, %s6740_s27  }
 0x599   : > { %p15_p4 = scmp.ge.s32.totalorder %s18_s27, 4  }
 0x59b   :  { %17 = sbr.rel (!%p15_p4) target bundleno = 1 (0x1), region = 85 }

</bundles_post_ra>
